<compile_context>
chip_gen: v7x
topology: tpu7x:2x2x1
jax: 0.10.0
libtpu: 0.0.40
codegen_flags: <defaults>
</compile_context>

<pallas_src>
import functools

import jax
import jax.numpy as jnp
from jax.experimental import pallas as pl
from jax.experimental.pallas import tpu as pltpu


def _round_up(x, m):
    return (x + m - 1) // m * m


# ----------------------------------------------------------------------------
# Kernels
# ----------------------------------------------------------------------------
def _make_conv_kernel(Cp, H, W, Lpad, *, fuse_relu_residual):
    """3x3 direct conv as 9 per-tap matmuls on lane-shifted views.

    Activation layout (per sample): (Cp, Lpad) where lane q = hp*(W+2)+wp
    indexes the zero-padded (H+2, W+2) image; lanes >= (H+2)*(W+2) are zero
    tail.  The conv result for "oversize" pixel p = h*(W+2)+w needs input lane
    p + kh*(W+2) + kw for tap (kh, kw) -> a uniform lane shift per tap.
    The kernel re-emits its output in the SAME zero-padded layout (junk
    columns masked, interior shifted by W+3), so conv1's output feeds conv2
    directly with no XLA re-pad in between.
    """
    Wp2 = W + 2
    Lout = H * Wp2               # oversize output span (2 junk cols per row)
    lead = Wp2 + 1               # shift into the zero-padded layout
    tail = Lpad - lead - Lout    # >= Wp2 + 1 by construction

    def conv_core(w_ref, b_ref, x):
        acc = None
        for kh in range(3):
            for kw in range(3):
                t = kh * 3 + kw
                off = kh * Wp2 + kw
                xs = x[:, off:off + Lout]                     # lane-shifted view
                d = jnp.dot(w_ref[t], xs, preferred_element_type=jnp.float32)
                acc = d if acc is None else acc + d
        return acc + b_ref[...]                               # (Cp,Lout)+(Cp,1)

    if fuse_relu_residual:
        def kernel(w_ref, b_ref, mask_ref, x_ref, o_ref):
            x = x_ref[0]                                      # (Cp, Lpad) bf16
            acc = conv_core(w_ref, b_ref, x)
            acc = jnp.maximum(acc, 0.0) * mask_ref[...]       # ReLU + zero junk
            full = jnp.concatenate(
                [jnp.zeros((Cp, lead), jnp.float32), acc,
                 jnp.zeros((Cp, tail), jnp.float32)], axis=1)
            full = full + x.astype(jnp.float32)               # fused residual
            o_ref[0] = full.astype(o_ref.dtype)
    else:
        def kernel(w_ref, b_ref, mask_ref, x_ref, o_ref, psum_ref):
            x = x_ref[0]
            acc = conv_core(w_ref, b_ref, x)
            acc = acc * mask_ref[...]                         # zero junk cols
            # fused CALayer global-average-pool partial sums (per sample)
            psum_ref[0] = jnp.sum(acc, axis=1, keepdims=True)
            full = jnp.concatenate(
                [jnp.zeros((Cp, lead), jnp.float32), acc,
                 jnp.zeros((Cp, tail), jnp.float32)], axis=1)
            o_ref[0] = full.astype(o_ref.dtype)

    return kernel


def _tail_kernel(r_ref, g_ref, x_ref, wpa1_ref, bpa1_ref, wpa2_ref, bpa2_ref,
                 o_ref):
    """Fused Block tail: CA apply, PALayer (two 1x1 convs + sigmoid), +x."""
    res3 = r_ref[0].astype(jnp.float32) * g_ref[0]            # (Cp,Lpad)*(Cp,1)
    t = jnp.dot(wpa1_ref[...], res3, preferred_element_type=jnp.float32)
    t = jnp.maximum(t + bpa1_ref[...], 0.0)                   # (C8p, Lpad)
    z = jnp.sum(t * wpa2_ref[...], axis=0, keepdims=True)     # (1, Lpad)
    z = jax.nn.sigmoid(z + bpa2_ref[...])
    out = res3 * z + x_ref[0].astype(jnp.float32)             # PA apply + res
    o_ref[0] = out.astype(o_ref.dtype)


# ----------------------------------------------------------------------------
# pallas_call wrappers
# ----------------------------------------------------------------------------
def _conv_pallas(kernel, wm, b, mask, xpad, *, Cp, Lpad, with_pool):
    N = xpad.shape[0]
    act_spec = pl.BlockSpec((1, Cp, Lpad), lambda n: (n, 0, 0))
    in_specs = [
        pl.BlockSpec(wm.shape, lambda n: (0, 0, 0)),       # (9, Cp, Cp) bf16
        pl.BlockSpec(b.shape, lambda n: (0, 0)),            # (Cp, 1) f32
        pl.BlockSpec(mask.shape, lambda n: (0, 0)),         # (1, Lout) f32
        act_spec,                                            # padded activation
    ]
    if with_pool:
        out_shape = (jax.ShapeDtypeStruct((N, Cp, Lpad), jnp.bfloat16),
                     jax.ShapeDtypeStruct((N, Cp, 1), jnp.float32))
        out_specs = (act_spec, pl.BlockSpec((1, Cp, 1), lambda n: (n, 0, 0)))
    else:
        out_shape = jax.ShapeDtypeStruct((N, Cp, Lpad), jnp.bfloat16)
        out_specs = act_spec
    return pl.pallas_call(
        kernel,
        out_shape=out_shape,
        grid=(N,),
        in_specs=in_specs,
        out_specs=out_specs,
        compiler_params=pltpu.CompilerParams(dimension_semantics=("parallel",)),
    )(wm, b, mask, xpad)


def _tail_pallas(res2, gate, xpad, wpa1, bpa1, wpa2, bpa2, *, Cp, Lpad):
    N = res2.shape[0]
    act_spec = pl.BlockSpec((1, Cp, Lpad), lambda n: (n, 0, 0))
    return pl.pallas_call(
        _tail_kernel,
        out_shape=jax.ShapeDtypeStruct((N, Cp, Lpad), jnp.float32),
        grid=(N,),
        in_specs=[
            act_spec,                                          # res2 (bf16)
            pl.BlockSpec((1, Cp, 1), lambda n: (n, 0, 0)),     # CA gate table
            act_spec,                                          # residual x
            pl.BlockSpec(wpa1.shape, lambda n: (0, 0)),
            pl.BlockSpec(bpa1.shape, lambda n: (0, 0)),
            pl.BlockSpec(wpa2.shape, lambda n: (0, 0)),
            pl.BlockSpec(bpa2.shape, lambda n: (0, 0)),
        ],
        out_specs=act_spec,
        compiler_params=pltpu.CompilerParams(dimension_semantics=("parallel",)),
    )(res2, gate, xpad, wpa1, bpa1, wpa2, bpa2)


# ----------------------------------------------------------------------------
# Parameter prep (reshape / pad / cast weights ONCE, outside the forward)
# ----------------------------------------------------------------------------
def prepare_block_params(p):
    C = p['w1'].shape[0]
    C8 = C // 8                      # NOTE: assumes C % 8 == 0 (FFA-Net default)
    Cp = _round_up(C, 8)
    C8p = _round_up(max(C8, 1), 8)

    def conv_w(w):                   # (C,C,3,3) -> (9, Cp, Cp) bf16, [t][co,ci]
        wm = jnp.transpose(w, (2, 3, 0, 1)).reshape(9, C, C)
        wm = jnp.pad(wm, ((0, 0), (0, Cp - C), (0, Cp - C)))
        return wm.astype(jnp.bfloat16)

    def col(b, rows):
        return jnp.pad(b.reshape(-1, 1).astype(jnp.float32),
                       ((0, rows - b.shape[0]), (0, 0)))

    return dict(
        C=C, Cp=Cp, C8p=C8p,
        w1m=conv_w(p['w1']), b1=col(p['b1'], Cp),
        w2m=conv_w(p['w2']), b2=col(p['b2'], Cp),
        # CALayer squeeze MLP stays in plain JAX (operates on N*C scalars)
        wca1=p['wca1'], bca1=p['bca1'], wca2=p['wca2'], bca2=p['bca2'],
        wpa1=jnp.pad(p['wpa1'], ((0, C8p - C8), (0, Cp - C))).astype(jnp.float32),
        bpa1=col(p['bpa1'], C8p),
        wpa2=jnp.pad(p['wpa2'].T, ((0, C8p - C8), (0, 0))).astype(jnp.float32),
        bpa2=p['bpa2'].reshape(1, 1).astype(jnp.float32),
    )


# ----------------------------------------------------------------------------
# Block forward (Pallas path)
# ----------------------------------------------------------------------------
def block_forward(q, x):
    """x: (N, C, H, W) f32 -> (N, C, H, W) f32; mirrors Block.forward."""
    N, C, H, W = x.shape
    Cp = q['Cp']
    Hp2, Wp2 = H + 2, W + 2
    Lin = Hp2 * Wp2
    Lout = H * Wp2
    Lpad = _round_up(Lin + 2, 128)   # +2 keeps the last tap slice in bounds

    # Pack x once into the zero-padded, lane-flat bf16 layout (N, Cp, Lpad).
    xp = jnp.pad(x, ((0, 0), (0, Cp - C), (1, 1), (1, 1)))
    xflat = jnp.pad(xp.reshape(N, Cp, Lin), ((0, 0), (0, 0), (0, Lpad - Lin)))
    xflat = xflat.astype(jnp.bfloat16)

    # 1/0 mask that zeroes the 2 junk columns per image row (constant-folded).
    mask = ((jnp.arange(Lout, dtype=jnp.int32) % Wp2) < W)
    mask = mask.astype(jnp.float32).reshape(1, Lout)

    conv1_k = _make_conv_kernel(Cp, H, W, Lpad, fuse_relu_residual=True)
    conv2_k = _make_conv_kernel(Cp, H, W, Lpad, fuse_relu_residual=False)

    # conv1 + bias + ReLU + residual (output already re-padded for conv2)
    res1 = _conv_pallas(conv1_k, q['w1m'], q['b1'], mask, xflat,
                        Cp=Cp, Lpad=Lpad, with_pool=False)
    # conv2 + bias, with fused CALayer global-average-pool partial sums
    res2, psum = _conv_pallas(conv2_k, q['w2m'], q['b2'], mask, res1,
                              Cp=Cp, Lpad=Lpad, with_pool=True)

    # CALayer squeeze MLP on (N, C) scalars -- plain JAX glue (tiny).
    hp = jax.lax.Precision.HIGHEST
    pooled = psum[:, :C, 0] / float(H * W)                               # (N,C)
    t = jax.nn.relu(jnp.matmul(pooled, q['wca1'].T, precision=hp) + q['bca1'])
    ca = jax.nn.sigmoid(jnp.matmul(t, q['wca2'].T, precision=hp) + q['bca2'])
    gate = jnp.pad(ca, ((0, 0), (0, Cp - C)))[:, :, None].astype(jnp.float32)

    # CA apply + PALayer + final residual (one kernel)
    out_pad = _tail_pallas(res2, gate, xflat, q['wpa1'], q['bpa1'],
                           q['wpa2'], q['bpa2'], Cp=Cp, Lpad=Lpad)

    out = out_pad[:, :C, :Lin].reshape(N, C, Hp2, Wp2)[:, :, 1:1 + H, 1:1 + W]
    return out


# ----------------------------------------------------------------------------
# Pure-JAX reference of Block.forward (for self-check)
# ----------------------------------------------------------------------------
def block_forward_ref(p, x):
    hp = jax.lax.Precision.HIGHEST

    def conv3x3(z, w, b):
        o = jax.lax.conv_general_dilated(
            z, w, window_strides=(1, 1), padding=((1, 1), (1, 1)),
            dimension_numbers=('NCHW', 'OIHW', 'NCHW'), precision=hp)
        return o + b[None, :, None, None]

    res = jax.nn.relu(conv3x3(x, p['w1'], p['b1'])) + x
    res = conv3x3(res, p['w2'], p['b2'])
    # CALayer
    y = res.mean(axis=(2, 3))
    y = jax.nn.relu(jnp.matmul(y, p['wca1'].T, precision=hp) + p['bca1'])
    y = jax.nn.sigmoid(jnp.matmul(y, p['wca2'].T, precision=hp) + p['bca2'])
    res = res * y[:, :, None, None]
    # PALayer
    z = jnp.einsum('oc,nchw->nohw', p['wpa1'], res, precision=hp)
    z = jax.nn.relu(z + p['bpa1'][None, :, None, None])
    z = jnp.einsum('oc,nchw->nohw', p['wpa2'], z, precision=hp)
    z = jax.nn.sigmoid(z + p['bpa2'][None, :, None, None])
    res = res * z
    return res + x


# ----------------------------------------------------------------------------
# Deterministic parameter construction
# ----------------------------------------------------------------------------
def init_block_params(key, dim):
    c8 = dim // 8
    ks = jax.random.split(key, 12)

    def n(k, shape, s=0.05):
        return s * jax.random.normal(k, shape, dtype=jnp.float32)

    return dict(
        w1=n(ks[0], (dim, dim, 3, 3)), b1=n(ks[1], (dim,), 0.02),
        w2=n(ks[2], (dim, dim, 3, 3)), b2=n(ks[3], (dim,), 0.02),
        wca1=n(ks[4], (c8, dim)), bca1=n(ks[5], (c8,), 0.02),
        wca2=n(ks[6], (dim, c8)), bca2=n(ks[7], (dim,), 0.02),
        wpa1=n(ks[8], (c8, dim)), bpa1=n(ks[9], (c8,), 0.02),
        wpa2=n(ks[10], (1, c8)), bpa2=n(ks[11], (1,), 0.02),
    )


# ----------------------------------------------------------------------------
if __name__ == "__main__":
    dim, batch, H, W = 64, 2, 16, 16          # FFA-Net default dim=64

    key = jax.random.PRNGKey(0)
    kx, kp = jax.random.split(key)
    x = jax.random.normal(kx, (batch, dim, H, W), dtype=jnp.float32)

    params = init_block_params(kp, dim)
    prepared = prepare_block_params(params)

    fwd = jax.jit(functools.partial(block_forward, prepared))
    out = jax.block_until_ready(fwd(x))

    assert out.shape == x.shape, out.shape
    assert bool(jnp.all(jnp.isfinite(out)))

    # Self-check against a pure-JAX/XLA f32 reference of Block.forward.
    # Tolerance covers the bf16 activation/weight quantization (acc in f32).
    ref = jax.block_until_ready(block_forward_ref(params, x))
    rel = float(jnp.max(jnp.abs(out - ref)) / (jnp.max(jnp.abs(ref)) + 1e-6))
    assert rel < 2e-2, rel

    print("KERNEL_OK")
</pallas_src>

<mosaic_0001>
module attributes {stable_mosaic.version = 11 : i64} {
  func.func @kernel(%arg0: i32, %arg1: memref<9x64x64xbf16, #tpu.memory_space<vmem>>, %arg2: memref<64x1xf32, #tpu.memory_space<vmem>>, %arg3: memref<1x288xf32, #tpu.memory_space<vmem>>, %arg4: memref<1x64x384xbf16, #tpu.memory_space<vmem>>, %arg5: memref<1x64x384xbf16, #tpu.memory_space<vmem>>) attributes {dimension_semantics = [#tpu.dimension_semantics<parallel>], iteration_bounds = array<i64: 2>, scalar_prefetch = 0 : i64, scratch_operands = 0 : i64, tpu.core_type = #tpu.core_type<tc>, window_params = [{pipeline_mode = #tpu.pipeline_mode<synchronous>, transform_indices = @transform_0, window_bounds = array<i64: 9, 64, 64>}, {pipeline_mode = #tpu.pipeline_mode<synchronous>, transform_indices = @transform_1, window_bounds = array<i64: 64, 1>}, {pipeline_mode = #tpu.pipeline_mode<synchronous>, transform_indices = @transform_2, window_bounds = array<i64: 1, 288>}, {transform_indices = @transform_3, window_bounds = array<i64: 1, 64, 384>}, {transform_indices = @transform_4, window_bounds = array<i64: 1, 64, 384>}]} {
    %c0 = arith.constant 0 : index
    %c0_0 = arith.constant 0 : index
    %c0_1 = arith.constant 0 : index
    %0 = vector.load %arg4[%c0, %c0_0, %c0_1] : memref<1x64x384xbf16, #tpu.memory_space<vmem>>, vector<1x64x384xbf16>
    %1 = vector.shape_cast %0 : vector<1x64x384xbf16> to vector<64x384xbf16>
    %2 = vector.extract_strided_slice %1 {offsets = [0, 0], sizes = [64, 288], strides = [1, 1]} : vector<64x384xbf16> to vector<64x288xbf16>
    %c0_2 = arith.constant 0 : index
    %c0_3 = arith.constant 0 : index
    %c0_4 = arith.constant 0 : index
    %3 = vector.load %arg1[%c0_2, %c0_3, %c0_4] : memref<9x64x64xbf16, #tpu.memory_space<vmem>>, vector<1x64x64xbf16>
    %4 = vector.shape_cast %3 : vector<1x64x64xbf16> to vector<64x64xbf16>
    %cst = arith.constant dense<0.000000e+00> : vector<64x288xf32>
    %5 = tpu.matmul %4, %2, %cst {dimension_numbers = #tpu.dot_dimension_numbers<[1], [0], [0], [1], [0, 0, 1, 1], [], []>} : vector<64x64xbf16>, vector<64x288xbf16>, vector<64x288xf32> -> vector<64x288xf32>
    %6 = vector.extract_strided_slice %1 {offsets = [0, 1], sizes = [64, 288], strides = [1, 1]} : vector<64x384xbf16> to vector<64x288xbf16>
    %c1 = arith.constant 1 : index
    %c0_5 = arith.constant 0 : index
    %c0_6 = arith.constant 0 : index
    %7 = vector.load %arg1[%c1, %c0_5, %c0_6] : memref<9x64x64xbf16, #tpu.memory_space<vmem>>, vector<1x64x64xbf16>
    %8 = vector.shape_cast %7 : vector<1x64x64xbf16> to vector<64x64xbf16>
    %cst_7 = arith.constant dense<0.000000e+00> : vector<64x288xf32>
    %9 = tpu.matmul %8, %6, %cst_7 {dimension_numbers = #tpu.dot_dimension_numbers<[1], [0], [0], [1], [0, 0, 1, 1], [], []>} : vector<64x64xbf16>, vector<64x288xbf16>, vector<64x288xf32> -> vector<64x288xf32>
    %10 = arith.addf %5, %9 : vector<64x288xf32>
    %11 = vector.extract_strided_slice %1 {offsets = [0, 2], sizes = [64, 288], strides = [1, 1]} : vector<64x384xbf16> to vector<64x288xbf16>
    %c2 = arith.constant 2 : index
    %c0_8 = arith.constant 0 : index
    %c0_9 = arith.constant 0 : index
    %12 = vector.load %arg1[%c2, %c0_8, %c0_9] : memref<9x64x64xbf16, #tpu.memory_space<vmem>>, vector<1x64x64xbf16>
    %13 = vector.shape_cast %12 : vector<1x64x64xbf16> to vector<64x64xbf16>
    %cst_10 = arith.constant dense<0.000000e+00> : vector<64x288xf32>
    %14 = tpu.matmul %13, %11, %cst_10 {dimension_numbers = #tpu.dot_dimension_numbers<[1], [0], [0], [1], [0, 0, 1, 1], [], []>} : vector<64x64xbf16>, vector<64x288xbf16>, vector<64x288xf32> -> vector<64x288xf32>
    %15 = arith.addf %10, %14 : vector<64x288xf32>
    %16 = vector.extract_strided_slice %1 {offsets = [0, 18], sizes = [64, 288], strides = [1, 1]} : vector<64x384xbf16> to vector<64x288xbf16>
    %c3 = arith.constant 3 : index
    %c0_11 = arith.constant 0 : index
    %c0_12 = arith.constant 0 : index
    %17 = vector.load %arg1[%c3, %c0_11, %c0_12] : memref<9x64x64xbf16, #tpu.memory_space<vmem>>, vector<1x64x64xbf16>
    %18 = vector.shape_cast %17 : vector<1x64x64xbf16> to vector<64x64xbf16>
    %cst_13 = arith.constant dense<0.000000e+00> : vector<64x288xf32>
    %19 = tpu.matmul %18, %16, %cst_13 {dimension_numbers = #tpu.dot_dimension_numbers<[1], [0], [0], [1], [0, 0, 1, 1], [], []>} : vector<64x64xbf16>, vector<64x288xbf16>, vector<64x288xf32> -> vector<64x288xf32>
    %20 = arith.addf %15, %19 : vector<64x288xf32>
    %21 = vector.extract_strided_slice %1 {offsets = [0, 19], sizes = [64, 288], strides = [1, 1]} : vector<64x384xbf16> to vector<64x288xbf16>
    %c4 = arith.constant 4 : index
    %c0_14 = arith.constant 0 : index
    %c0_15 = arith.constant 0 : index
    %22 = vector.load %arg1[%c4, %c0_14, %c0_15] : memref<9x64x64xbf16, #tpu.memory_space<vmem>>, vector<1x64x64xbf16>
    %23 = vector.shape_cast %22 : vector<1x64x64xbf16> to vector<64x64xbf16>
    %cst_16 = arith.constant dense<0.000000e+00> : vector<64x288xf32>
    %24 = tpu.matmul %23, %21, %cst_16 {dimension_numbers = #tpu.dot_dimension_numbers<[1], [0], [0], [1], [0, 0, 1, 1], [], []>} : vector<64x64xbf16>, vector<64x288xbf16>, vector<64x288xf32> -> vector<64x288xf32>
    %25 = arith.addf %20, %24 : vector<64x288xf32>
    %26 = vector.extract_strided_slice %1 {offsets = [0, 20], sizes = [64, 288], strides = [1, 1]} : vector<64x384xbf16> to vector<64x288xbf16>
    %c5 = arith.constant 5 : index
    %c0_17 = arith.constant 0 : index
    %c0_18 = arith.constant 0 : index
    %27 = vector.load %arg1[%c5, %c0_17, %c0_18] : memref<9x64x64xbf16, #tpu.memory_space<vmem>>, vector<1x64x64xbf16>
    %28 = vector.shape_cast %27 : vector<1x64x64xbf16> to vector<64x64xbf16>
    %cst_19 = arith.constant dense<0.000000e+00> : vector<64x288xf32>
    %29 = tpu.matmul %28, %26, %cst_19 {dimension_numbers = #tpu.dot_dimension_numbers<[1], [0], [0], [1], [0, 0, 1, 1], [], []>} : vector<64x64xbf16>, vector<64x288xbf16>, vector<64x288xf32> -> vector<64x288xf32>
    %30 = arith.addf %25, %29 : vector<64x288xf32>
    %31 = vector.extract_strided_slice %1 {offsets = [0, 36], sizes = [64, 288], strides = [1, 1]} : vector<64x384xbf16> to vector<64x288xbf16>
    %c6 = arith.constant 6 : index
    %c0_20 = arith.constant 0 : index
    %c0_21 = arith.constant 0 : index
    %32 = vector.load %arg1[%c6, %c0_20, %c0_21] : memref<9x64x64xbf16, #tpu.memory_space<vmem>>, vector<1x64x64xbf16>
    %33 = vector.shape_cast %32 : vector<1x64x64xbf16> to vector<64x64xbf16>
    %cst_22 = arith.constant dense<0.000000e+00> : vector<64x288xf32>
    %34 = tpu.matmul %33, %31, %cst_22 {dimension_numbers = #tpu.dot_dimension_numbers<[1], [0], [0], [1], [0, 0, 1, 1], [], []>} : vector<64x64xbf16>, vector<64x288xbf16>, vector<64x288xf32> -> vector<64x288xf32>
    %35 = arith.addf %30, %34 : vector<64x288xf32>
    %36 = vector.extract_strided_slice %1 {offsets = [0, 37], sizes = [64, 288], strides = [1, 1]} : vector<64x384xbf16> to vector<64x288xbf16>
    %c7 = arith.constant 7 : index
    %c0_23 = arith.constant 0 : index
    %c0_24 = arith.constant 0 : index
    %37 = vector.load %arg1[%c7, %c0_23, %c0_24] : memref<9x64x64xbf16, #tpu.memory_space<vmem>>, vector<1x64x64xbf16>
    %38 = vector.shape_cast %37 : vector<1x64x64xbf16> to vector<64x64xbf16>
    %cst_25 = arith.constant dense<0.000000e+00> : vector<64x288xf32>
    %39 = tpu.matmul %38, %36, %cst_25 {dimension_numbers = #tpu.dot_dimension_numbers<[1], [0], [0], [1], [0, 0, 1, 1], [], []>} : vector<64x64xbf16>, vector<64x288xbf16>, vector<64x288xf32> -> vector<64x288xf32>
    %40 = arith.addf %35, %39 : vector<64x288xf32>
    %41 = vector.extract_strided_slice %1 {offsets = [0, 38], sizes = [64, 288], strides = [1, 1]} : vector<64x384xbf16> to vector<64x288xbf16>
    %c8 = arith.constant 8 : index
    %c0_26 = arith.constant 0 : index
    %c0_27 = arith.constant 0 : index
    %42 = vector.load %arg1[%c8, %c0_26, %c0_27] : memref<9x64x64xbf16, #tpu.memory_space<vmem>>, vector<1x64x64xbf16>
    %43 = vector.shape_cast %42 : vector<1x64x64xbf16> to vector<64x64xbf16>
    %cst_28 = arith.constant dense<0.000000e+00> : vector<64x288xf32>
    %44 = tpu.matmul %43, %41, %cst_28 {dimension_numbers = #tpu.dot_dimension_numbers<[1], [0], [0], [1], [0, 0, 1, 1], [], []>} : vector<64x64xbf16>, vector<64x288xbf16>, vector<64x288xf32> -> vector<64x288xf32>
    %45 = arith.addf %40, %44 : vector<64x288xf32>
    %c0_29 = arith.constant 0 : index
    %c0_30 = arith.constant 0 : index
    %46 = vector.load %arg2[%c0_29, %c0_30] : memref<64x1xf32, #tpu.memory_space<vmem>>, vector<64x1xf32>
    %47 = vector.broadcast %46 : vector<64x1xf32> to vector<64x288xf32>
    %48 = arith.addf %45, %47 : vector<64x288xf32>
    %cst_31 = arith.constant 0.000000e+00 : f32
    %49 = vector.broadcast %cst_31 : f32 to vector<64x288xf32>
    %50 = arith.maximumf %48, %49 : vector<64x288xf32>
    %c0_32 = arith.constant 0 : index
    %c0_33 = arith.constant 0 : index
    %51 = vector.load %arg3[%c0_32, %c0_33] : memref<1x288xf32, #tpu.memory_space<vmem>>, vector<1x288xf32>
    %52 = vector.broadcast %51 : vector<1x288xf32> to vector<64x288xf32>
    %53 = arith.mulf %50, %52 : vector<64x288xf32>
    %cst_34 = arith.constant 0.000000e+00 : f32
    %54 = vector.broadcast %cst_34 : f32 to vector<64x19xf32>
    %cst_35 = arith.constant 0.000000e+00 : f32
    %55 = vector.broadcast %cst_35 : f32 to vector<64x77xf32>
    %56 = tpu.concatenate %54, %53, %55 in 1 : vector<64x19xf32>, vector<64x288xf32>, vector<64x77xf32> -> vector<64x384xf32>
    %57 = arith.extf %1 : vector<64x384xbf16> to vector<64x384xf32>
    %58 = arith.addf %56, %57 : vector<64x384xf32>
    %59 = arith.truncf %58 : vector<64x384xf32> to vector<64x384xbf16>
    %c0_36 = arith.constant 0 : index
    %c0_37 = arith.constant 0 : index
    %c0_38 = arith.constant 0 : index
    %60 = vector.load %arg5[%c0_36, %c0_37, %c0_38] : memref<1x64x384xbf16, #tpu.memory_space<vmem>>, vector<1x64x384xbf16>
    %61 = vector.shape_cast %60 : vector<1x64x384xbf16> to vector<64x384xbf16>
    %62 = vector.shape_cast %59 : vector<64x384xbf16> to vector<1x64x384xbf16>
    tpu.vector_store %arg5[%c0_36, %c0_37, %c0_38], %62 {strides = array<i32>} : memref<1x64x384xbf16, #tpu.memory_space<vmem>>, vector<1x64x384xbf16>,
    return
  }
  func.func @transform_0(%arg0: i32) -> (i32, i32, i32) {
    %c0_i32 = arith.constant 0 : i32
    %c0_i32_0 = arith.constant 0 : i32
    %c0_i32_1 = arith.constant 0 : i32
    %c0_i32_2 = arith.constant 0 : i32
    return %c0_i32, %c0_i32_0, %c0_i32_1 : i32, i32, i32
  }
  func.func @transform_1(%arg0: i32) -> (i32, i32) {
    %c0_i32 = arith.constant 0 : i32
    %c0_i32_0 = arith.constant 0 : i32
    %c0_i32_1 = arith.constant 0 : i32
    return %c0_i32, %c0_i32_0 : i32, i32
  }
  func.func @transform_2(%arg0: i32) -> (i32, i32) {
    %c0_i32 = arith.constant 0 : i32
    %c0_i32_0 = arith.constant 0 : i32
    %c0_i32_1 = arith.constant 0 : i32
    return %c0_i32, %c0_i32_0 : i32, i32
  }
  func.func @transform_3(%arg0: i32) -> (i32, i32, i32) {
    %c0_i32 = arith.constant 0 : i32
    %c0_i32_0 = arith.constant 0 : i32
    %c0_i32_1 = arith.constant 0 : i32
    return %arg0, %c0_i32, %c0_i32_0 : i32, i32, i32
  }
  func.func @transform_4(%arg0: i32) -> (i32, i32, i32) {
    %c0_i32 = arith.constant 0 : i32
    %c0_i32_0 = arith.constant 0 : i32
    %c0_i32_1 = arith.constant 0 : i32
    return %arg0, %c0_i32, %c0_i32_0 : i32, i32, i32
  }
}

module attributes {stable_mosaic.version = 11 : i64} {
  func.func @kernel(%arg0: i32, %arg1: memref<9x64x64xbf16, #tpu.memory_space<vmem>>, %arg2: memref<64x1xf32, #tpu.memory_space<vmem>>, %arg3: memref<1x288xf32, #tpu.memory_space<vmem>>, %arg4: memref<1x64x384xbf16, #tpu.memory_space<vmem>>, %arg5: memref<1x64x384xbf16, #tpu.memory_space<vmem>>, %arg6: memref<1x64x1xf32, #tpu.memory_space<vmem>>) attributes {dimension_semantics = [#tpu.dimension_semantics<parallel>], iteration_bounds = array<i64: 2>, scalar_prefetch = 0 : i64, scratch_operands = 0 : i64, tpu.core_type = #tpu.core_type<tc>, window_params = [{pipeline_mode = #tpu.pipeline_mode<synchronous>, transform_indices = @transform_0, window_bounds = array<i64: 9, 64, 64>}, {pipeline_mode = #tpu.pipeline_mode<synchronous>, transform_indices = @transform_1, window_bounds = array<i64: 64, 1>}, {pipeline_mode = #tpu.pipeline_mode<synchronous>, transform_indices = @transform_2, window_bounds = array<i64: 1, 288>}, {transform_indices = @transform_3, window_bounds = array<i64: 1, 64, 384>}, {transform_indices = @transform_4, window_bounds = array<i64: 1, 64, 384>}, {transform_indices = @transform_5, window_bounds = array<i64: 1, 64, 1>}]} {
    %c0 = arith.constant 0 : index
    %c0_0 = arith.constant 0 : index
    %c0_1 = arith.constant 0 : index
    %0 = vector.load %arg4[%c0, %c0_0, %c0_1] : memref<1x64x384xbf16, #tpu.memory_space<vmem>>, vector<1x64x384xbf16>
    %1 = vector.shape_cast %0 : vector<1x64x384xbf16> to vector<64x384xbf16>
    %2 = vector.extract_strided_slice %1 {offsets = [0, 0], sizes = [64, 288], strides = [1, 1]} : vector<64x384xbf16> to vector<64x288xbf16>
    %c0_2 = arith.constant 0 : index
    %c0_3 = arith.constant 0 : index
    %c0_4 = arith.constant 0 : index
    %3 = vector.load %arg1[%c0_2, %c0_3, %c0_4] : memref<9x64x64xbf16, #tpu.memory_space<vmem>>, vector<1x64x64xbf16>
    %4 = vector.shape_cast %3 : vector<1x64x64xbf16> to vector<64x64xbf16>
    %cst = arith.constant dense<0.000000e+00> : vector<64x288xf32>
    %5 = tpu.matmul %4, %2, %cst {dimension_numbers = #tpu.dot_dimension_numbers<[1], [0], [0], [1], [0, 0, 1, 1], [], []>} : vector<64x64xbf16>, vector<64x288xbf16>, vector<64x288xf32> -> vector<64x288xf32>
    %6 = vector.extract_strided_slice %1 {offsets = [0, 1], sizes = [64, 288], strides = [1, 1]} : vector<64x384xbf16> to vector<64x288xbf16>
    %c1 = arith.constant 1 : index
    %c0_5 = arith.constant 0 : index
    %c0_6 = arith.constant 0 : index
    %7 = vector.load %arg1[%c1, %c0_5, %c0_6] : memref<9x64x64xbf16, #tpu.memory_space<vmem>>, vector<1x64x64xbf16>
    %8 = vector.shape_cast %7 : vector<1x64x64xbf16> to vector<64x64xbf16>
    %cst_7 = arith.constant dense<0.000000e+00> : vector<64x288xf32>
    %9 = tpu.matmul %8, %6, %cst_7 {dimension_numbers = #tpu.dot_dimension_numbers<[1], [0], [0], [1], [0, 0, 1, 1], [], []>} : vector<64x64xbf16>, vector<64x288xbf16>, vector<64x288xf32> -> vector<64x288xf32>
    %10 = arith.addf %5, %9 : vector<64x288xf32>
    %11 = vector.extract_strided_slice %1 {offsets = [0, 2], sizes = [64, 288], strides = [1, 1]} : vector<64x384xbf16> to vector<64x288xbf16>
    %c2 = arith.constant 2 : index
    %c0_8 = arith.constant 0 : index
    %c0_9 = arith.constant 0 : index
    %12 = vector.load %arg1[%c2, %c0_8, %c0_9] : memref<9x64x64xbf16, #tpu.memory_space<vmem>>, vector<1x64x64xbf16>
    %13 = vector.shape_cast %12 : vector<1x64x64xbf16> to vector<64x64xbf16>
    %cst_10 = arith.constant dense<0.000000e+00> : vector<64x288xf32>
    %14 = tpu.matmul %13, %11, %cst_10 {dimension_numbers = #tpu.dot_dimension_numbers<[1], [0], [0], [1], [0, 0, 1, 1], [], []>} : vector<64x64xbf16>, vector<64x288xbf16>, vector<64x288xf32> -> vector<64x288xf32>
    %15 = arith.addf %10, %14 : vector<64x288xf32>
    %16 = vector.extract_strided_slice %1 {offsets = [0, 18], sizes = [64, 288], strides = [1, 1]} : vector<64x384xbf16> to vector<64x288xbf16>
    %c3 = arith.constant 3 : index
    %c0_11 = arith.constant 0 : index
    %c0_12 = arith.constant 0 : index
    %17 = vector.load %arg1[%c3, %c0_11, %c0_12] : memref<9x64x64xbf16, #tpu.memory_space<vmem>>, vector<1x64x64xbf16>
    %18 = vector.shape_cast %17 : vector<1x64x64xbf16> to vector<64x64xbf16>
    %cst_13 = arith.constant dense<0.000000e+00> : vector<64x288xf32>
    %19 = tpu.matmul %18, %16, %cst_13 {dimension_numbers = #tpu.dot_dimension_numbers<[1], [0], [0], [1], [0, 0, 1, 1], [], []>} : vector<64x64xbf16>, vector<64x288xbf16>, vector<64x288xf32> -> vector<64x288xf32>
    %20 = arith.addf %15, %19 : vector<64x288xf32>
    %21 = vector.extract_strided_slice %1 {offsets = [0, 19], sizes = [64, 288], strides = [1, 1]} : vector<64x384xbf16> to vector<64x288xbf16>
    %c4 = arith.constant 4 : index
    %c0_14 = arith.constant 0 : index
    %c0_15 = arith.constant 0 : index
    %22 = vector.load %arg1[%c4, %c0_14, %c0_15] : memref<9x64x64xbf16, #tpu.memory_space<vmem>>, vector<1x64x64xbf16>
    %23 = vector.shape_cast %22 : vector<1x64x64xbf16> to vector<64x64xbf16>
    %cst_16 = arith.constant dense<0.000000e+00> : vector<64x288xf32>
    %24 = tpu.matmul %23, %21, %cst_16 {dimension_numbers = #tpu.dot_dimension_numbers<[1], [0], [0], [1], [0, 0, 1, 1], [], []>} : vector<64x64xbf16>, vector<64x288xbf16>, vector<64x288xf32> -> vector<64x288xf32>
    %25 = arith.addf %20, %24 : vector<64x288xf32>
    %26 = vector.extract_strided_slice %1 {offsets = [0, 20], sizes = [64, 288], strides = [1, 1]} : vector<64x384xbf16> to vector<64x288xbf16>
    %c5 = arith.constant 5 : index
    %c0_17 = arith.constant 0 : index
    %c0_18 = arith.constant 0 : index
    %27 = vector.load %arg1[%c5, %c0_17, %c0_18] : memref<9x64x64xbf16, #tpu.memory_space<vmem>>, vector<1x64x64xbf16>
    %28 = vector.shape_cast %27 : vector<1x64x64xbf16> to vector<64x64xbf16>
    %cst_19 = arith.constant dense<0.000000e+00> : vector<64x288xf32>
    %29 = tpu.matmul %28, %26, %cst_19 {dimension_numbers = #tpu.dot_dimension_numbers<[1], [0], [0], [1], [0, 0, 1, 1], [], []>} : vector<64x64xbf16>, vector<64x288xbf16>, vector<64x288xf32> -> vector<64x288xf32>
    %30 = arith.addf %25, %29 : vector<64x288xf32>
    %31 = vector.extract_strided_slice %1 {offsets = [0, 36], sizes = [64, 288], strides = [1, 1]} : vector<64x384xbf16> to vector<64x288xbf16>
    %c6 = arith.constant 6 : index
    %c0_20 = arith.constant 0 : index
    %c0_21 = arith.constant 0 : index
    %32 = vector.load %arg1[%c6, %c0_20, %c0_21] : memref<9x64x64xbf16, #tpu.memory_space<vmem>>, vector<1x64x64xbf16>
    %33 = vector.shape_cast %32 : vector<1x64x64xbf16> to vector<64x64xbf16>
    %cst_22 = arith.constant dense<0.000000e+00> : vector<64x288xf32>
    %34 = tpu.matmul %33, %31, %cst_22 {dimension_numbers = #tpu.dot_dimension_numbers<[1], [0], [0], [1], [0, 0, 1, 1], [], []>} : vector<64x64xbf16>, vector<64x288xbf16>, vector<64x288xf32> -> vector<64x288xf32>
    %35 = arith.addf %30, %34 : vector<64x288xf32>
    %36 = vector.extract_strided_slice %1 {offsets = [0, 37], sizes = [64, 288], strides = [1, 1]} : vector<64x384xbf16> to vector<64x288xbf16>
    %c7 = arith.constant 7 : index
    %c0_23 = arith.constant 0 : index
    %c0_24 = arith.constant 0 : index
    %37 = vector.load %arg1[%c7, %c0_23, %c0_24] : memref<9x64x64xbf16, #tpu.memory_space<vmem>>, vector<1x64x64xbf16>
    %38 = vector.shape_cast %37 : vector<1x64x64xbf16> to vector<64x64xbf16>
    %cst_25 = arith.constant dense<0.000000e+00> : vector<64x288xf32>
    %39 = tpu.matmul %38, %36, %cst_25 {dimension_numbers = #tpu.dot_dimension_numbers<[1], [0], [0], [1], [0, 0, 1, 1], [], []>} : vector<64x64xbf16>, vector<64x288xbf16>, vector<64x288xf32> -> vector<64x288xf32>
    %40 = arith.addf %35, %39 : vector<64x288xf32>
    %41 = vector.extract_strided_slice %1 {offsets = [0, 38], sizes = [64, 288], strides = [1, 1]} : vector<64x384xbf16> to vector<64x288xbf16>
    %c8 = arith.constant 8 : index
    %c0_26 = arith.constant 0 : index
    %c0_27 = arith.constant 0 : index
    %42 = vector.load %arg1[%c8, %c0_26, %c0_27] : memref<9x64x64xbf16, #tpu.memory_space<vmem>>, vector<1x64x64xbf16>
    %43 = vector.shape_cast %42 : vector<1x64x64xbf16> to vector<64x64xbf16>
    %cst_28 = arith.constant dense<0.000000e+00> : vector<64x288xf32>
    %44 = tpu.matmul %43, %41, %cst_28 {dimension_numbers = #tpu.dot_dimension_numbers<[1], [0], [0], [1], [0, 0, 1, 1], [], []>} : vector<64x64xbf16>, vector<64x288xbf16>, vector<64x288xf32> -> vector<64x288xf32>
    %45 = arith.addf %40, %44 : vector<64x288xf32>
    %c0_29 = arith.constant 0 : index
    %c0_30 = arith.constant 0 : index
    %46 = vector.load %arg2[%c0_29, %c0_30] : memref<64x1xf32, #tpu.memory_space<vmem>>, vector<64x1xf32>
    %47 = vector.broadcast %46 : vector<64x1xf32> to vector<64x288xf32>
    %48 = arith.addf %45, %47 : vector<64x288xf32>
    %c0_31 = arith.constant 0 : index
    %c0_32 = arith.constant 0 : index
    %49 = vector.load %arg3[%c0_31, %c0_32] : memref<1x288xf32, #tpu.memory_space<vmem>>, vector<1x288xf32>
    %50 = vector.broadcast %49 : vector<1x288xf32> to vector<64x288xf32>
    %51 = arith.mulf %48, %50 : vector<64x288xf32>
    %cst_33 = arith.constant dense<0.000000e+00> : vector<64xf32>
    %52 = vector.multi_reduction <add>, %51, %cst_33 [1] : vector<64x288xf32> to vector<64xf32>
    %53 = vector.shape_cast %52 : vector<64xf32> to vector<64x1xf32>
    %c0_34 = arith.constant 0 : index
    %c0_35 = arith.constant 0 : index
    %c0_36 = arith.constant 0 : index
    %54 = vector.load %arg6[%c0_34, %c0_35, %c0_36] : memref<1x64x1xf32, #tpu.memory_space<vmem>>, vector<1x64x1xf32>
    %55 = vector.shape_cast %54 : vector<1x64x1xf32> to vector<64x1xf32>
    %56 = vector.shape_cast %53 : vector<64x1xf32> to vector<1x64x1xf32>
    tpu.vector_store %arg6[%c0_34, %c0_35, %c0_36], %56 {strides = array<i32>} : memref<1x64x1xf32, #tpu.memory_space<vmem>>, vector<1x64x1xf32>,
    %cst_37 = arith.constant 0.000000e+00 : f32
    %57 = vector.broadcast %cst_37 : f32 to vector<64x19xf32>
    %cst_38 = arith.constant 0.000000e+00 : f32
    %58 = vector.broadcast %cst_38 : f32 to vector<64x77xf32>
    %59 = tpu.concatenate %57, %51, %58 in 1 : vector<64x19xf32>, vector<64x288xf32>, vector<64x77xf32> -> vector<64x384xf32>
    %60 = arith.truncf %59 : vector<64x384xf32> to vector<64x384xbf16>
    %c0_39 = arith.constant 0 : index
    %c0_40 = arith.constant 0 : index
    %c0_41 = arith.constant 0 : index
    %61 = vector.load %arg5[%c0_39, %c0_40, %c0_41] : memref<1x64x384xbf16, #tpu.memory_space<vmem>>, vector<1x64x384xbf16>
    %62 = vector.shape_cast %61 : vector<1x64x384xbf16> to vector<64x384xbf16>
    %63 = vector.shape_cast %60 : vector<64x384xbf16> to vector<1x64x384xbf16>
    tpu.vector_store %arg5[%c0_39, %c0_40, %c0_41], %63 {strides = array<i32>} : memref<1x64x384xbf16, #tpu.memory_space<vmem>>, vector<1x64x384xbf16>,
    return
  }
  func.func @transform_0(%arg0: i32) -> (i32, i32, i32) {
    %c0_i32 = arith.constant 0 : i32
    %c0_i32_0 = arith.constant 0 : i32
    %c0_i32_1 = arith.constant 0 : i32
    %c0_i32_2 = arith.constant 0 : i32
    return %c0_i32, %c0_i32_0, %c0_i32_1 : i32, i32, i32
  }
  func.func @transform_1(%arg0: i32) -> (i32, i32) {
    %c0_i32 = arith.constant 0 : i32
    %c0_i32_0 = arith.constant 0 : i32
    %c0_i32_1 = arith.constant 0 : i32
    return %c0_i32, %c0_i32_0 : i32, i32
  }
  func.func @transform_2(%arg0: i32) -> (i32, i32) {
    %c0_i32 = arith.constant 0 : i32
    %c0_i32_0 = arith.constant 0 : i32
    %c0_i32_1 = arith.constant 0 : i32
    return %c0_i32, %c0_i32_0 : i32, i32
  }
  func.func @transform_3(%arg0: i32) -> (i32, i32, i32) {
    %c0_i32 = arith.constant 0 : i32
    %c0_i32_0 = arith.constant 0 : i32
    %c0_i32_1 = arith.constant 0 : i32
    return %arg0, %c0_i32, %c0_i32_0 : i32, i32, i32
  }
  func.func @transform_4(%arg0: i32) -> (i32, i32, i32) {
    %c0_i32 = arith.constant 0 : i32
    %c0_i32_0 = arith.constant 0 : i32
    %c0_i32_1 = arith.constant 0 : i32
    return %arg0, %c0_i32, %c0_i32_0 : i32, i32, i32
  }
  func.func @transform_5(%arg0: i32) -> (i32, i32, i32) {
    %c0_i32 = arith.constant 0 : i32
    %c0_i32_0 = arith.constant 0 : i32
    %c0_i32_1 = arith.constant 0 : i32
    return %arg0, %c0_i32, %c0_i32_0 : i32, i32, i32
  }
}

module attributes {stable_mosaic.version = 11 : i64} {
  func.func @_tail_kernel(%arg0: i32, %arg1: memref<1x64x384xbf16, #tpu.memory_space<vmem>>, %arg2: memref<1x64x1xf32, #tpu.memory_space<vmem>>, %arg3: memref<1x64x384xbf16, #tpu.memory_space<vmem>>, %arg4: memref<8x64xf32, #tpu.memory_space<vmem>>, %arg5: memref<8x1xf32, #tpu.memory_space<vmem>>, %arg6: memref<8x1xf32, #tpu.memory_space<vmem>>, %arg7: memref<1x1xf32, #tpu.memory_space<vmem>>, %arg8: memref<1x64x384xf32, #tpu.memory_space<vmem>>) attributes {dimension_semantics = [#tpu.dimension_semantics<parallel>], iteration_bounds = array<i64: 2>, scalar_prefetch = 0 : i64, scratch_operands = 0 : i64, tpu.core_type = #tpu.core_type<tc>, window_params = [{transform_indices = @transform_0, window_bounds = array<i64: 1, 64, 384>}, {transform_indices = @transform_1, window_bounds = array<i64: 1, 64, 1>}, {transform_indices = @transform_2, window_bounds = array<i64: 1, 64, 384>}, {pipeline_mode = #tpu.pipeline_mode<synchronous>, transform_indices = @transform_3, window_bounds = array<i64: 8, 64>}, {pipeline_mode = #tpu.pipeline_mode<synchronous>, transform_indices = @transform_4, window_bounds = array<i64: 8, 1>}, {pipeline_mode = #tpu.pipeline_mode<synchronous>, transform_indices = @transform_5, window_bounds = array<i64: 8, 1>}, {pipeline_mode = #tpu.pipeline_mode<synchronous>, transform_indices = @transform_6, window_bounds = array<i64: 1, 1>}, {transform_indices = @transform_7, window_bounds = array<i64: 1, 64, 384>}]} {
    %c0 = arith.constant 0 : index
    %c0_0 = arith.constant 0 : index
    %c0_1 = arith.constant 0 : index
    %0 = vector.load %arg1[%c0, %c0_0, %c0_1] : memref<1x64x384xbf16, #tpu.memory_space<vmem>>, vector<1x64x384xbf16>
    %1 = vector.shape_cast %0 : vector<1x64x384xbf16> to vector<64x384xbf16>
    %2 = arith.extf %1 : vector<64x384xbf16> to vector<64x384xf32>
    %c0_2 = arith.constant 0 : index
    %c0_3 = arith.constant 0 : index
    %c0_4 = arith.constant 0 : index
    %3 = vector.load %arg2[%c0_2, %c0_3, %c0_4] : memref<1x64x1xf32, #tpu.memory_space<vmem>>, vector<1x64x1xf32>
    %4 = vector.shape_cast %3 : vector<1x64x1xf32> to vector<64x1xf32>
    %5 = vector.broadcast %4 : vector<64x1xf32> to vector<64x384xf32>
    %6 = arith.mulf %2, %5 : vector<64x384xf32>
    %c0_5 = arith.constant 0 : index
    %c0_6 = arith.constant 0 : index
    %7 = vector.load %arg4[%c0_5, %c0_6] : memref<8x64xf32, #tpu.memory_space<vmem>>, vector<8x64xf32>
    %cst = arith.constant dense<0.000000e+00> : vector<8x384xf32>
    %8 = tpu.matmul %7, %6, %cst {dimension_numbers = #tpu.dot_dimension_numbers<[1], [0], [0], [1], [0, 0, 1, 1], [], []>} : vector<8x64xf32>, vector<64x384xf32>, vector<8x384xf32> -> vector<8x384xf32>
    %c0_7 = arith.constant 0 : index
    %c0_8 = arith.constant 0 : index
    %9 = vector.load %arg5[%c0_7, %c0_8] : memref<8x1xf32, #tpu.memory_space<vmem>>, vector<8x1xf32>
    %10 = vector.broadcast %9 : vector<8x1xf32> to vector<8x384xf32>
    %11 = arith.addf %8, %10 : vector<8x384xf32>
    %cst_9 = arith.constant 0.000000e+00 : f32
    %12 = vector.broadcast %cst_9 : f32 to vector<8x384xf32>
    %13 = arith.maximumf %11, %12 : vector<8x384xf32>
    %c0_10 = arith.constant 0 : index
    %c0_11 = arith.constant 0 : index
    %14 = vector.load %arg6[%c0_10, %c0_11] : memref<8x1xf32, #tpu.memory_space<vmem>>, vector<8x1xf32>
    %15 = vector.broadcast %14 : vector<8x1xf32> to vector<8x384xf32>
    %16 = arith.mulf %13, %15 : vector<8x384xf32>
    %cst_12 = arith.constant dense<0.000000e+00> : vector<384xf32>
    %17 = vector.multi_reduction <add>, %16, %cst_12 [0] : vector<8x384xf32> to vector<384xf32>
    %18 = vector.shape_cast %17 : vector<384xf32> to vector<1x384xf32>
    %c0_13 = arith.constant 0 : index
    %c0_14 = arith.constant 0 : index
    %19 = vector.load %arg7[%c0_13, %c0_14] : memref<1x1xf32, #tpu.memory_space<vmem>>, vector<1x1xf32>
    %20 = vector.broadcast %19 : vector<1x1xf32> to vector<1x384xf32>
    %21 = arith.addf %18, %20 : vector<1x384xf32>
    %22 = arith.negf %21 : vector<1x384xf32>
    %23 = math.exp %22 : vector<1x384xf32>
    %cst_15 = arith.constant 1.000000e+00 : f32
    %24 = vector.broadcast %cst_15 : f32 to vector<1x384xf32>
    %25 = arith.addf %24, %23 : vector<1x384xf32>
    %26 = arith.divf %24, %25 : vector<1x384xf32>
    %27 = vector.broadcast %26 : vector<1x384xf32> to vector<64x384xf32>
    %28 = arith.mulf %6, %27 : vector<64x384xf32>
    %c0_16 = arith.constant 0 : index
    %c0_17 = arith.constant 0 : index
    %c0_18 = arith.constant 0 : index
    %29 = vector.load %arg3[%c0_16, %c0_17, %c0_18] : memref<1x64x384xbf16, #tpu.memory_space<vmem>>, vector<1x64x384xbf16>
    %30 = vector.shape_cast %29 : vector<1x64x384xbf16> to vector<64x384xbf16>
    %31 = arith.extf %30 : vector<64x384xbf16> to vector<64x384xf32>
    %32 = arith.addf %28, %31 : vector<64x384xf32>
    %c0_19 = arith.constant 0 : index
    %c0_20 = arith.constant 0 : index
    %c0_21 = arith.constant 0 : index
    %33 = vector.load %arg8[%c0_19, %c0_20, %c0_21] : memref<1x64x384xf32, #tpu.memory_space<vmem>>, vector<1x64x384xf32>
    %34 = vector.shape_cast %33 : vector<1x64x384xf32> to vector<64x384xf32>
    %35 = vector.shape_cast %32 : vector<64x384xf32> to vector<1x64x384xf32>
    tpu.vector_store %arg8[%c0_19, %c0_20, %c0_21], %35 {strides = array<i32>} : memref<1x64x384xf32, #tpu.memory_space<vmem>>, vector<1x64x384xf32>,
    return
  }
  func.func @transform_0(%arg0: i32) -> (i32, i32, i32) {
    %c0_i32 = arith.constant 0 : i32
    %c0_i32_0 = arith.constant 0 : i32
    %c0_i32_1 = arith.constant 0 : i32
    return %arg0, %c0_i32, %c0_i32_0 : i32, i32, i32
  }
  func.func @transform_1(%arg0: i32) -> (i32, i32, i32) {
    %c0_i32 = arith.constant 0 : i32
    %c0_i32_0 = arith.constant 0 : i32
    %c0_i32_1 = arith.constant 0 : i32
    return %arg0, %c0_i32, %c0_i32_0 : i32, i32, i32
  }
  func.func @transform_2(%arg0: i32) -> (i32, i32, i32) {
    %c0_i32 = arith.constant 0 : i32
    %c0_i32_0 = arith.constant 0 : i32
    %c0_i32_1 = arith.constant 0 : i32
    return %arg0, %c0_i32, %c0_i32_0 : i32, i32, i32
  }
  func.func @transform_3(%arg0: i32) -> (i32, i32) {
    %c0_i32 = arith.constant 0 : i32
    %c0_i32_0 = arith.constant 0 : i32
    %c0_i32_1 = arith.constant 0 : i32
    return %c0_i32, %c0_i32_0 : i32, i32
  }
  func.func @transform_4(%arg0: i32) -> (i32, i32) {
    %c0_i32 = arith.constant 0 : i32
    %c0_i32_0 = arith.constant 0 : i32
    %c0_i32_1 = arith.constant 0 : i32
    return %c0_i32, %c0_i32_0 : i32, i32
  }
  func.func @transform_5(%arg0: i32) -> (i32, i32) {
    %c0_i32 = arith.constant 0 : i32
    %c0_i32_0 = arith.constant 0 : i32
    %c0_i32_1 = arith.constant 0 : i32
    return %c0_i32, %c0_i32_0 : i32, i32
  }
  func.func @transform_6(%arg0: i32) -> (i32, i32) {
    %c0_i32 = arith.constant 0 : i32
    %c0_i32_0 = arith.constant 0 : i32
    %c0_i32_1 = arith.constant 0 : i32
    return %c0_i32, %c0_i32_0 : i32, i32
  }
  func.func @transform_7(%arg0: i32) -> (i32, i32, i32) {
    %c0_i32 = arith.constant 0 : i32
    %c0_i32_0 = arith.constant 0 : i32
    %c0_i32_1 = arith.constant 0 : i32
    return %arg0, %c0_i32, %c0_i32_0 : i32, i32, i32
  }
}

</mosaic_0001>

<bundles_post_ra>
// kernel: block_forward.5
= control target key start
LH: loop header
LB: loop body
LE: loop exit
PB: predicated region body
PF: predicated region fallthrough
CT: control target
= control target key end

     0   :  { %s994_s26 = smov 0   ;;  %s1227_s0 = inlined_call_operand.vmem [shape: bf16[2,64,384], index: 0, kind: input, shape index: {}]   ;;  %s1228_s1 = inlined_call_operand.vmem [shape: f32[2,64,1], index: 1, kind: input, shape index: {}]   ;;  %s1229_s2 = inlined_call_operand.vmem [shape: bf16[2,64,384], index: 2, kind: input, shape index: {}]   ;;  %s1230_s3 = inlined_call_operand.vmem [shape: f32[8,64], index: 3, kind: input, shape index: {}]   ;;  %s1231_s4 = inlined_call_operand.vmem [shape: f32[8,1], index: 4, kind: input, shape index: {}]   ;;  %s1232_s5 = inlined_call_operand.vmem [shape: f32[8,1], index: 5, kind: input, shape index: {}]   ;;  %s1233_s6 = inlined_call_operand.<no memory space> [shape: f32[1,1], index: 6, kind: input, shape index: {}]   ;;  %s1234_s7 = inlined_call_operand.vmem [shape: f32[2,64,384], index: 7, kind: output, shape index: {}]  }
   0x1   :  { %v12_v0 = vstv %s1233_s6 }
   0x2   :  { %13 = vst [vmem:[#allocation2] sm:$0x1] %v12_v0 }
   0x3 LB: > { %s837_s27 = sadd.s32 4294967295, %s945_s26   ;;  %p841_p0 = scmp.ge.s32.totalorder %s945_s26, 1  ;;  %s945_s26 = sphi %s994_s26, %s19_s26  }
   0x4   : > { %p259_p1 = scmp.lt.s32.totalorder %s945_s26, 3 }
   0x6   : > { %p260_p2 = pnand %p841_p0, %p259_p1 }
   0x7   : > { %p301_p3 = scmp.lt.s32.totalorder (!%p260_p2), %s837_s27, 1  ;;  %v947_v1 = vmov (!%p260_p2), 0   ;;  %v948_v10 = vmov (!%p260_p2), 0.0|0.0   ;;  %v588_v11 = vld [vmem:[%s1232_s5] sm:$0xff] (!%p260_p2)  ;;  %vm949_vm0 = vmmov (!%p260_p2), 0   ;;  %v950_v14 = vmov (!%p260_p2), 0.0  }
   0x8   : > { %263 = sbr.rel (%p260_p2) target bundleno = 446 (0x1be), region = 48  ;;  %926 = vset.pattern.permute.xlu1 (!%p260_p2), %v947_v1  ;;  %925 = vset.pattern.permute.xlu0 (!%p260_p2), %v947_v1  ;;  %v434_v12 = vld [vmem:[%s1231_s4] sm:$0xff] (!%p260_p2)  ;;  %vm440_vm1 = vcmask (!%p260_p2), 523264  }
   0x9   : > { %899 = vmatprep.subr.bf16.mxu1 (!%p260_p2), %v948_v10  ;;  %v615_v13 = vld [vmem:[#allocation2] sm:$0x1] (!%p260_p2)  ;;  %880 = vmatprep.mubr.msk.f32.mxu1 (!%p260_p2), %vm949_vm0, %v950_v14 }
   0xa   : > { %508 = vmatprep.mubr.f32.mxu0 (!%p260_p2), %v950_v14 }
   0xf   : > { %s1242_s27 = smov (!%p301_p3, %s837_s27), 1 }
  0x10   : > { %s854_s6 = sshll.u32 %s1242_s27, 6  ;;  %s911_s12 = smul.u32 96, %s1242_s27 }
  0x11   : > { %s310_s30 = scalar_lea.vmem %s1228_s1, %s854_s6  ;;  %s912_s21 = smul.u32 192, %s1242_s27 }
  0x12   : > { %v363_v2 = vld [vmem:[%s310_s30 + $0x10] sm:$0xff]  ;;  %v361_v3 = vld [vmem:[%s310_s30] sm:$0xff]  ;;  %v364_v4 = vld [vmem:[%s310_s30 + $0x18] sm:$0xff]  ;;  %s1021_s15 = scalar_lea.vmem %s1227_s0, %s911_s12  ;;  %s315_s20 = scalar_lea.vmem %s1229_s2, %s911_s12 }
  0x13   : > { %381 = vperm.xlu1 %926, %v363_v2   ;;  %371 = vperm.xlu0 %925, %v361_v3   ;;  %v362_v5 = vld [vmem:[%s310_s30 + $0x8] sm:$0xff]  ;;  %v365_v7 = vld [vmem:[%s310_s30 + $0x20] sm:$0xff]  ;;  %v368_v8 = vld [vmem:[%s310_s30 + $0x38] sm:$0xff]  ;;  %s1158_s24 = scalar_lea.vmem %s1234_s7, %s912_s21 }
  0x14   : > { %v366_v6 = vld [vmem:[%s310_s30 + $0x28] sm:$0xff]  ;;  %v367_v9 = vld [vmem:[%s310_s30 + $0x30] sm:$0xff]  ;;  %v325_v15 = vld [vmem:[%s1021_s15 + $0x18] sm:$0xff] }
  0x15   : > { %v327_v16 = vld [vmem:[%s1021_s15 + $0x24] sm:$0xff]  ;;  %v323_v18 = vld [vmem:[%s1021_s15 + $0xc] sm:$0xff]  ;;  %v343_v22 = vunpack.c.l.bf16 %v325_v15  ;;  %v331_v24 = vld [vmem:[%s1021_s15 + $0x3c] sm:$0xff]  ;;  %v344_v25 = vunpack.c.h.bf16 %v325_v15 }
  0x16   : > { %v321_v17 = vld [vmem:[%s1021_s15] sm:$0xff]  ;;  %v322_v19 = vld [vmem:[%s1021_s15 + $0x8] ss:$12 sps:$4 sm:$0xff]   ;;  %v347_v26 = vunpack.c.h.bf16 %v327_v16  ;;  %v341_v30 = vunpack.c.h.bf16 %v323_v18  ;;  %v340_v34 = vunpack.c.l.bf16 %v323_v18  ;;  %v346_v36 = vunpack.c.l.bf16 %v327_v16  ;;  %v336_v1 = vld [vmem:[%s1021_s15 + $0x50] ss:$12 sps:$4 sm:$0xff]  }
  0x17   : > { %386 = vperm.xlu1 %926, %v364_v4   ;;  %376 = vperm.xlu0 %925, %v362_v5   ;;  %v326_v21 = vld [vmem:[%s1021_s15 + $0x20] ss:$12 sps:$4 sm:$0xff]   ;;  %v332_v27 = vld [vmem:[%s1021_s15 + $0x38] ss:$12 sps:$4 sm:$0xff]   ;;  %v329_v28 = vld [vmem:[%s1021_s15 + $0x30] sm:$0xff]  ;;  %v338_v29 = vunpack.c.h.bf16 %v321_v17  ;;  %v339_v31 = vunpack.c.l.bf16 %v322_v19  ;;  %v342_v32 = vunpack.c.h.bf16 %v322_v19  ;;  %v337_v33 = vunpack.c.l.bf16 %v321_v17 }
  0x18   : > { %v345_v35 = vunpack.c.l.bf16 %v326_v21  ;;  %v348_v37 = vunpack.c.h.bf16 %v326_v21  ;;  %v352_v38 = vunpack.c.l.bf16 %v331_v24  ;;  %v353_v41 = vunpack.c.h.bf16 %v331_v24  ;;  %v335_v53 = vld [vmem:[%s1021_s15 + $0x54] sm:$0xff]  ;;  %v333_v58 = vld [vmem:[%s1021_s15 + $0x48] sm:$0xff] }
  0x19   : > { %v354_v42 = vunpack.c.h.bf16 %v332_v27  ;;  %v349_v43 = vunpack.c.l.bf16 %v329_v28  ;;  %v350_v44 = vunpack.c.h.bf16 %v329_v28  ;;  %v351_v56 = vunpack.c.l.bf16 %v332_v27 }
  0x1a   : > { %v359_v4 = vunpack.c.h.bf16 %v335_v53  ;;  %v355_v16 = vunpack.c.l.bf16 %v333_v58  ;;  %v357_v17 = vunpack.c.l.bf16 %v336_v1 }
  0x1b   : > { %396 = vperm.xlu1 %926, %v366_v6   ;;  %391 = vperm.xlu0 %925, %v365_v7   ;;  %v358_v7 = vunpack.c.l.bf16 %v335_v53 }
  0x1f   : > { %406 = vperm.xlu1 %926, %v368_v8   ;;  %401 = vperm.xlu0 %925, %v367_v9   ;;  %v356_v8 = vunpack.c.h.bf16 %v333_v58 }
  0x23   : > { %591 = vperm.xlu1 %926, %v588_v11   ;;  %437 = vperm.xlu0 %925, %v434_v12  }
  0x27   : > { %618 = vperm.xlu0 %925, %v615_v13   ;;  %v360_v13 = vunpack.c.h.bf16 %v336_v1 }
  0x92   : > { %v382_v20 = vpop.permute.xlu1 %381  ;;  %v372_v23 = vpop.permute.xlu0 %371 }
  0x93   : > { %v1032_v45 = vmul.f32 %v382_v20, %v344_v25  ;;  %v1036_v47 = vmul.f32 %v372_v23, %v338_v29  ;;  %v1040_v49 = vmul.f32 %v372_v23, %v339_v31  ;;  %v1044_v51 = vmul.f32 %v372_v23, %v337_v33 }
  0x94   : > { %v1049_v54 = vmul.f32 %v382_v20, %v343_v22  ;;  %v1051_v55 = vmul.f32 %v382_v20, %v345_v35 }
  0x96   : > { %v387_v39 = vpop.permute.xlu1 %386  ;;  %v377_v40 = vpop.permute.xlu0 %376 }
  0x97   : > { %v1034_v46 = vmul.f32 %v387_v39, %v347_v26  ;;  %v1038_v48 = vmul.f32 %v377_v40, %v341_v30  ;;  %v1042_v50 = vmul.f32 %v377_v40, %v342_v32  ;;  %v1046_v52 = vmul.f32 %v377_v40, %v340_v34  ;;  %v433_v32 = vld [vmem:[%s1230_s3] sm:$0xff] }
  0x98   : > { %v1056_v59 = vmul.f32 %v387_v39, %v346_v36  ;;  %v1058_v60 = vmul.f32 %v387_v39, %v348_v37 }
  0x99   : > { %v883_v57 = vpack.c.bf16 %v1038_v48, %v1036_v47  ;;  %v900_v63 = vpack.c.bf16 %v1042_v50, %v1040_v49  ;;  %v885_v0 = vpack.c.bf16 %v1046_v52, %v1044_v51  ;;  %v887_v3 = vpack.c.bf16 %v1034_v46, %v1032_v45 }
  0x9a   : > { %v397_v61 = vpop.permute.xlu1 %396  ;;  %v392_v62 = vpop.permute.xlu0 %391  ;;  %v903_v18 = vpack.c.bf16 %v1058_v60, %v1051_v55  ;;  %v889_v19 = vpack.c.bf16 %v1056_v59, %v1049_v54 }
  0x9b   : > { %v1065_v2 = vmul.f32 %v397_v61, %v353_v41  ;;  %884 = vmatprep.subr.bf16.mxu0 %v883_v57  ;;  %v1069_v5 = vmul.f32 %v397_v61, %v352_v38  ;;  %v1071_v6 = vmul.f32 %v392_v62, %v350_v44  ;;  %901 = vmatpush3.bf16.msra.mxu1 %v900_v63  ;;  %v621_v44 = vlaneseq }
  0x9c   : > { %886 = vmatpush1.bf16.msra.mxu0 %v885_v0  ;;  %v1073_v9 = vmul.f32 %v397_v61, %v354_v42  ;;  %v1075_v11 = vmul.f32 %v392_v62, %v349_v43  ;;  %v1077_v12 = vmul.f32 %v392_v62, %v351_v56  ;;  %902 = vmatprep.subr.bf16.mxu1 %v948_v10 }
  0x9d   : > { %888 = vmatprep.subr.bf16.mxu0 %v887_v3  ;;  %v891_v21 = vpack.c.bf16 %v1065_v2, %v1071_v6  ;;  %v622_v63 = vshrl.u32 %v621_v44, 7 }
  0x9e   : > { %v407_v14 = vpop.permute.xlu1 %406  ;;  %v402_v15 = vpop.permute.xlu0 %401  ;;  %v906_v23 = vpack.c.bf16 %v1073_v9, %v1077_v12  ;;  %v893_v24 = vpack.c.bf16 %v1069_v5, %v1075_v11 }
  0x9f   : > { %v1084_v20 = vmul.f32 %v407_v14, %v359_v4  ;;  %v1088_v22 = vmul.f32 %v402_v15, %v356_v8  ;;  %904 = vmatpush3.bf16.msra.mxu1 %v903_v18  ;;  %v1095_v25 = vmul.f32 %v407_v14, %v358_v7  ;;  %v1097_v26 = vmul.f32 %v407_v14, %v360_v13 }
  0xa0   : > { %890 = vmatpush1.bf16.msra.mxu0 %v889_v19  ;;  %905 = vmatprep.subr.bf16.mxu1 %v948_v10  ;;  %v1099_v27 = vmul.f32 %v402_v15, %v355_v16  ;;  %v1101_v28 = vmul.f32 %v402_v15, %v357_v17  ;;  %v623_v13 = vsub.s32 0, %v622_v63  ;;  %v1129_v63 = vld [vmem:[%s315_s20 + $0x3c] sm:$0xff] }
  0xa1   : > { %892 = vmatprep.subr.bf16.mxu0 %v891_v21  ;;  %v895_v29 = vpack.c.bf16 %v1084_v20, %v1088_v22 }
  0xa2   : > { %v909_v30 = vpack.c.bf16 %v1097_v26, %v1101_v28  ;;  %v897_v31 = vpack.c.bf16 %v1095_v25, %v1099_v27  ;;  %v438_v33 = vpop.permute.xlu0 %437  ;;  %v592_v42 = vpop.permute.xlu1 %591 }
  0xa3   : > { %907 = vmatpush3.bf16.msra.mxu1 %v906_v23 }
  0xa4   : > { %894 = vmatpush1.bf16.msra.mxu0 %v893_v24  ;;  %908 = vmatprep.subr.bf16.mxu1 %v948_v10 }
  0xa5   : > { %896 = vmatprep.subr.bf16.mxu0 %v895_v29 }
  0xa6   : > { %v619_v16 = vpop.permute.xlu0 %618 }
  0xa7   : > { %910 = vmatpush3.bf16.msra.mxu1 %v909_v30  ;;  %v624_v23 = vrot.slane %v619_v16, %v623_v13  ;;  %v1138_v16 = vld [vmem:[%s315_s20 + $0x54] sm:$0xff] }
  0xa8   : > { %898 = vmatpush1.bf16.msra.mxu0 %v897_v31 }
  0xaa   : > { %881 = vmatmul.mubr.msk.f32.vlgmr.msra.gmra.mrb[0].mxu1 %vm440_vm1, %v433_v32 }
  0xab   : > { %847 = vmatmul.mubr.msk.f32.vlgmr.msra.gmra.mrb[0].mxu0 %vm440_vm1, %v433_v32 }
 0x17d   : > { %v581_v34 = vpop.f32.mrb[0].mxu1 }
 0x17e   : > { %v510_v35 = vpop.f32.mrb[0].mxu0  ;;  %v582_v36 = vadd.f32 %v581_v34, %v438_v33  ;;  %v882_v38 = vpop.f32.mrb[1].mxu1 }
 0x17f   : > { %v511_v10 = vadd.f32 %v510_v35, %v438_v33  ;;  %v512_v37 = vpop.f32.mrb[1].mxu0 }
 0x180   : > { %v513_v39 = vadd.f32 %v512_v37, %v438_v33  ;;  %v587_v40 = vmax.f32 %v582_v36, 0.0 }
 0x181   : > { %v585_v41 = vmax.f32 %v511_v10, 0.0 }
 0x182   : > { %v586_v43 = vmax.f32 %v513_v39, 0.0  ;;  %v596_v53 = vmul.f32 %v592_v42, %v587_v40 }
 0x183   : > { %v594_v56 = vmul.f32 %v592_v42, %v585_v41  ;;  %v1118_v41 = vld [vmem:[%s315_s20] sm:$0xff] }
 0x184   : > { %v595_v57 = vmul.f32 %v592_v42, %v586_v43  ;;  %v609_v58 = vrot.slane %v596_v53, 4  ;;  %v671_v42 = vld [vmem:[%s315_s20 + $0x8] ss:$12 sps:$4 sm:$0xff]   ;;  %v1120_v43 = vld [vmem:[%s315_s20 + $0xc] sm:$0xff] }
 0x185   : > { %v597_v61 = vrot.slane %v594_v56, 4 }
 0x186   : > { %v603_v62 = vrot.slane %v595_v57, 4  ;;  %v610_v0 = vadd.f32 %v609_v58, %v596_v53  ;;  %v1122_v53 = vld [vmem:[%s315_s20 + $0x18] sm:$0xff]  ;;  %v686_v58 = vunpack.c.l.bf16 %v1118_v41 }
 0x187   : > { %v598_v1 = vadd.f32 %v597_v61, %v594_v56  ;;  %v675_v56 = vld [vmem:[%s315_s20 + $0x20] ss:$12 sps:$4 sm:$0xff]   ;;  %v1127_v61 = vld [vmem:[%s315_s20 + $0x30] sm:$0xff]  ;;  %v692_v13 = vunpack.c.l.bf16 %v1122_v53 }
 0x188   : > { %v604_v3 = vadd.f32 %v603_v62, %v595_v57  ;;  %v611_v4 = vrot.slane %v610_v0, 2  ;;  %v1124_v57 = vld [vmem:[%s315_s20 + $0x24] sm:$0xff] }
 0x189   : > { %v599_v7 = vrot.slane %v598_v1, 2  ;;  %v679_v62 = vld [vmem:[%s315_s20 + $0x38] ss:$12 sps:$4 sm:$0xff]  }
 0x18a   : > { %v605_v8 = vrot.slane %v604_v3, 2  ;;  %v612_v14 = vadd.f32 %v611_v4, %v610_v0  ;;  %v687_v0 = vunpack.c.h.bf16 %v1118_v41  ;;  %v690_v4 = vunpack.c.h.bf16 %v1120_v43 }
 0x18b   : > { %v600_v15 = vadd.f32 %v599_v7, %v598_v1  ;;  %v688_v1 = vunpack.c.l.bf16 %v671_v42  ;;  %v1134_v7 = vld [vmem:[%s315_s20 + $0x48] sm:$0xff] }
 0x18c   : > { %v606_v17 = vadd.f32 %v605_v8, %v604_v3  ;;  %v613_v18 = vrot.slane %v612_v14, 1  ;;  %v689_v3 = vunpack.c.l.bf16 %v1120_v43  ;;  %v691_v8 = vunpack.c.h.bf16 %v671_v42 }
 0x18d   : > { %v601_v19 = vrot.slane %v600_v15, 1 }
 0x18e   : > { %v607_v21 = vrot.slane %v606_v17, 1  ;;  %v614_v24 = vadd.f32 %v613_v18, %v612_v14  ;;  %v695_v18 = vunpack.c.l.bf16 %v1124_v57 }
 0x18f   : > { %v602_v29 = vadd.f32 %v601_v19, %v600_v15  ;;  %v683_v15 = vld [vmem:[%s315_s20 + $0x50] ss:$12 sps:$4 sm:$0xff]  }
 0x190   : > { %v608_v30 = vadd.f32 %v607_v21, %v606_v17  ;;  %v627_v31 = vadd.f32 %v624_v23, %v614_v24  ;;  %v694_v17 = vunpack.c.l.bf16 %v675_v56  ;;  %v697_v21 = vunpack.c.h.bf16 %v675_v56 }
 0x191   : > { %v625_v32 = vadd.f32 %v624_v23, %v602_v29  ;;  %v700_v29 = vunpack.c.l.bf16 %v679_v62 }
 0x192   : > { %v626_v33 = vadd.f32 %v624_v23, %v608_v30  ;;  %v851_v34 = vmul.f32 -1.442695, %v627_v31  ;;  %v698_v23 = vunpack.c.l.bf16 %v1127_v61  ;;  %v701_v30 = vunpack.c.l.bf16 %v1129_v63 }
 0x193   : > { %v849_v35 = vmul.f32 -1.442695, %v625_v32  ;;  %v703_v32 = vunpack.c.h.bf16 %v679_v62 }
 0x194   : > { %v850_v36 = vmul.f32 -1.442695, %v626_v33  ;;  %927 = vpow2.f32 %v851_v34  ;;  %v704_v33 = vunpack.c.l.bf16 %v1134_v7 }
 0x195   : > { %929 = vpow2.f32 %v849_v35 }
 0x196   : > { %931 = vpow2.f32 %v850_v36  ;;  %v706_v36 = vunpack.c.l.bf16 %v683_v15 }
 0x19e   : > { %v928_v10 = vpop.eup %927 }
 0x19f   : > { %v930_v37 = vpop.eup %929  ;;  %v639_v38 = vadd.f32 1.0, %v928_v10  ;;  %v707_v10 = vunpack.c.l.bf16 %v1138_v16 }
 0x1a0   : > { %v932_v39 = vpop.eup %931  ;;  %v637_v40 = vadd.f32 1.0, %v930_v37 }
 0x1a1   : > { %933 = vrcp.f32 %v639_v38  ;;  %v638_v44 = vadd.f32 1.0, %v932_v39  ;;  %v709_v38 = vunpack.c.h.bf16 %v683_v15 }
 0x1a2   : > { %935 = vrcp.f32 %v637_v40 }
 0x1a3   : > { %937 = vrcp.f32 %v638_v44 }
 0x1ab   : > { %v934_v35 = vpop.eup %933 }
 0x1ac   : > { %v648_v39 = vmul.f32 %v934_v35, %v1040_v49  ;;  %v651_v40 = vmul.f32 %v934_v35, %v1042_v50  ;;  %v654_v42 = vmul.f32 %v934_v35, %v1051_v55  ;;  %v657_v44 = vmul.f32 %v934_v35, %v1058_v60  ;;  %v936_v56 = vpop.eup %935 }
 0x1ad   : > { %v660_v62 = vmul.f32 %v934_v35, %v1077_v12  ;;  %v663_v49 = vmul.f32 %v934_v35, %v1073_v9  ;;  %v666_v50 = vmul.f32 %v934_v35, %v1101_v28  ;;  %v669_v55 = vmul.f32 %v934_v35, %v1097_v26 }
 0x1ae   : > { %v712_v15 = vadd.f32 %v688_v1, %v648_v39  ;;  %v715_v60 = vadd.f32 %v691_v8, %v651_v40  ;;  %v718_v37 = vadd.f32 %v694_v17, %v654_v42  ;;  %v721_v34 = vadd.f32 %v697_v21, %v657_v44  ;;  %v938_v1 = vpop.eup %937 }
 0x1af   : > { %v724_v31 = vadd.f32 %v700_v29, %v660_v62  ;;  %v727_v24 = vadd.f32 %v703_v32, %v663_v49  ;;  %v730_v19 = vadd.f32 %v706_v36, %v666_v50  ;;  %v733_v14 = vadd.f32 %v709_v38, %v669_v55 }
 0x1b0   : > { %736 = vst [vmem:[%s1158_s24 + $0x10] sm:$0xff] %v712_v15  ;;  %739 = vst [vmem:[%s1158_s24 + $0x28] sm:$0xff] %v715_v60  ;;  %v646_v9 = vmul.f32 %v936_v56, %v1044_v51  ;;  %v649_v12 = vmul.f32 %v936_v56, %v1046_v52  ;;  %v652_v26 = vmul.f32 %v936_v56, %v1049_v54 }
 0x1b1   : > { %742 = vst [vmem:[%s1158_s24 + $0x40] sm:$0xff] %v718_v37  ;;  %745 = vst [vmem:[%s1158_s24 + $0x58] sm:$0xff] %v721_v34  ;;  %v655_v28 = vmul.f32 %v936_v56, %v1056_v59  ;;  %v658_v8 = vmul.f32 %v936_v56, %v1075_v11  ;;  %v661_v17 = vmul.f32 %v936_v56, %v1069_v5 }
 0x1b2   : > { %748 = vst [vmem:[%s1158_s24 + $0x70] sm:$0xff] %v724_v31  ;;  %751 = vst [vmem:[%s1158_s24 + $0x88] sm:$0xff] %v727_v24  ;;  %v664_v51 = vmul.f32 %v936_v56, %v1099_v27  ;;  %v667_v52 = vmul.f32 %v936_v56, %v1095_v25  ;;  %v710_v54 = vadd.f32 %v686_v58, %v646_v9 }
 0x1b3   : > { %754 = vst [vmem:[%s1158_s24 + $0xa0] sm:$0xff] %v730_v19  ;;  %757 = vst [vmem:[%s1158_s24 + $0xb8] sm:$0xff] %v733_v14  ;;  %v713_v59 = vadd.f32 %v689_v3, %v649_v12  ;;  %v716_v19 = vadd.f32 %v692_v13, %v652_v26  ;;  %v719_v14 = vadd.f32 %v695_v18, %v655_v28 }
 0x1b4   : > { %v722_v21 = vadd.f32 %v698_v23, %v658_v8  ;;  %v725_v11 = vadd.f32 %v701_v30, %v661_v17  ;;  %v728_v24 = vadd.f32 %v704_v33, %v664_v51  ;;  %v731_v5 = vadd.f32 %v707_v10, %v667_v52  ;;  %734 = vst [vmem:[%s1158_s24] sm:$0xff] %v710_v54 }
 0x1b5   : > { %737 = vst [vmem:[%s1158_s24 + $0x18] sm:$0xff] %v713_v59  ;;  %740 = vst [vmem:[%s1158_s24 + $0x30] sm:$0xff] %v716_v19  ;;  %v647_v25 = vmul.f32 %v938_v1, %v1036_v47  ;;  %v650_v27 = vmul.f32 %v938_v1, %v1038_v48  ;;  %v653_v58 = vmul.f32 %v938_v1, %v1032_v45  ;;  %v1235_v23 = vunpack.c.h.bf16 %v1122_v53 }
 0x1b6   : > { %743 = vst [vmem:[%s1158_s24 + $0x48] sm:$0xff] %v719_v14  ;;  %v656_v3 = vmul.f32 %v938_v1, %v1034_v46  ;;  %746 = vst [vmem:[%s1158_s24 + $0x60] sm:$0xff] %v722_v21  ;;  %v659_v13 = vmul.f32 %v938_v1, %v1071_v6  ;;  %v662_v18 = vmul.f32 %v938_v1, %v1065_v2  ;;  %v1236_v6 = vunpack.c.h.bf16 %v1124_v57 }
 0x1b7   : > { %749 = vst [vmem:[%s1158_s24 + $0x78] sm:$0xff] %v725_v11  ;;  %752 = vst [vmem:[%s1158_s24 + $0x90] sm:$0xff] %v728_v24  ;;  %v665_v47 = vmul.f32 %v938_v1, %v1088_v22  ;;  %v668_v45 = vmul.f32 %v938_v1, %v1084_v20  ;;  %v711_v46 = vadd.f32 %v687_v0, %v647_v25  ;;  %v1237_v2 = vunpack.c.h.bf16 %v1127_v61 }
 0x1b8   : > { %755 = vst [vmem:[%s1158_s24 + $0xa8] sm:$0xff] %v731_v5  ;;  %v714_v48 = vadd.f32 %v690_v4, %v650_v27  ;;  %v717_v29 = vadd.f32 %v1235_v23, %v653_v58  ;;  %v720_v30 = vadd.f32 %v1236_v6, %v656_v3  ;;  %v1238_v22 = vunpack.c.h.bf16 %v1129_v63 }
 0x1b9   : > { %v723_v31 = vadd.f32 %v1237_v2, %v659_v13  ;;  %v1239_v20 = vunpack.c.h.bf16 %v1134_v7  ;;  %v1240_v0 = vunpack.c.h.bf16 %v1138_v16  ;;  %735 = vst [vmem:[%s1158_s24 + $0x8] sm:$0xff] %v711_v46 }
 0x1ba   : > { %v726_v32 = vadd.f32 %v1238_v22, %v662_v18  ;;  %738 = vst [vmem:[%s1158_s24 + $0x20] sm:$0xff] %v714_v48  ;;  %741 = vst [vmem:[%s1158_s24 + $0x38] sm:$0xff] %v717_v29 }
 0x1bb   : > { %v729_v41 = vadd.f32 %v1239_v20, %v665_v47  ;;  %v732_v33 = vadd.f32 %v1240_v0, %v668_v45  ;;  %744 = vst [vmem:[%s1158_s24 + $0x50] sm:$0xff] %v720_v30  ;;  %747 = vst [vmem:[%s1158_s24 + $0x68] sm:$0xff] %v723_v31 }
 0x1bc   : > { %750 = vst [vmem:[%s1158_s24 + $0x80] sm:$0xff] %v726_v32 }
 0x1bd   : > { %753 = vst [vmem:[%s1158_s24 + $0x98] sm:$0xff] %v729_v41  ;;  %756 = vst [vmem:[%s1158_s24 + $0xb0] sm:$0xff] %v732_v33 }
 0x1be PF: > { %s19_s26 = sadd.s32 1, %s945_s26  }
 0x1bf   : > { %p16_p4 = scmp.ge.s32.totalorder %s19_s26, 4  }
 0x1c1   :  { %18 = sbr.rel (!%p16_p4) target bundleno = 3 (0x3), region = 84 }

// kernel: block_forward.4
= control target key start
LH: loop header
LB: loop body
LE: loop exit
PB: predicated region body
PF: predicated region fallthrough
CT: control target
= control target key end

     0   :  { %s3752_s18 = smov 0   ;;  %s4720_s0 = inlined_call_operand.vmem [shape: bf16[9,64,64], index: 0, kind: input, shape index: {}]   ;;  %s4721_s1 = inlined_call_operand.vmem [shape: f32[64,1], index: 1, kind: input, shape index: {}]   ;;  %s4722_s2 = inlined_call_operand.vmem [shape: f32[1,288], index: 2, kind: input, shape index: {}]   ;;  %s4723_s3 = inlined_call_operand.vmem [shape: bf16[2,64,384], index: 3, kind: input, shape index: {}]   ;;  %s4724_s4 = inlined_call_operand.vmem [shape: bf16[2,64,384], index: 4, kind: output, shape index: {0}]   ;;  %s4725_s5 = inlined_call_operand.vmem [shape: f32[2,64,1], index: 5, kind: output, shape index: {1}]  }
   0x1 LB: > { %s2935_s19 = sadd.s32 4294967295, %s3710_s18   ;;  %p2939_p0 = scmp.ge.s32.totalorder %s3710_s18, 1  ;;  %s3710_s18 = sphi %s3752_s18, %s16_s18  }
   0x2   : > { %p190_p1 = scmp.lt.s32.totalorder %s3710_s18, 3 }
   0x4   : > { %p191_p2 = pnand %p2939_p0, %p190_p1 }
   0x5   : > { %p223_p3 = scmp.lt.s32.totalorder (!%p191_p2), %s2935_s19, 1  ;;  %s3712_s24 = smov (!%p191_p2), 126   ;;  %v3714_v12 = vmov (!%p191_p2), 0   ;;  %vm775_vm0 = vcmask (!%p191_p2), 1031168   ;;  %v3895_v33 = vld [vmem:[%s4720_s0 + $0x40] sm:$0xff] (!%p191_p2)   ;;  %vm368_vm1 = vcmask (!%p191_p2), 1039360  }
   0x6   : > { %194 = sbr.rel (%p191_p2) target bundleno = 943 (0x3af), region = 36  ;;  %s3713_s25 = smov (!%p191_p2), 127   ;;  %840 = vmatprep.mubr.bf16.mxu0 (!%p191_p2), %v3714_v12  ;;  %434 = vmatprep.mubr.bf16.mxu1 (!%p191_p2), %v3714_v12  ;;  %vm389_vm2 = vcmask (!%p191_p2), 523264   ;;  %v3913_v40 = vld [vmem:[%s4720_s0 + $0x48] sm:$0xff] (!%p191_p2)   ;;  %v3932_v48 = vld [vmem:[%s4720_s0 + $0x50] sm:$0xff] (!%p191_p2)   ;;  %v3951_v56 = vld [vmem:[%s4720_s0 + $0x20] sm:$0xff] (!%p191_p2)  }
   0x7   : > { %3590 = vset.pattern.permute.xlu0 (!%p191_p2), %v3714_v12  ;;  %3591 = vset.pattern.permute.xlu1 (!%p191_p2), %v3714_v12  ;;  %s3715_s26 = smov (!%p191_p2), 110   ;;  %s3716_s27 = smov (!%p191_p2), 109   ;;  %v3956_v57 = vld [vmem:[%s4720_s0 + $0x58] sm:$0xff] (!%p191_p2)   ;;  %vm1023_vm3 = vcmask (!%p191_p2), 900096   ;;  %vm1271_vm4 = vcmask (!%p191_p2), 891904   ;;  %vm1519_vm5 = vcmask (!%p191_p2), 883712  }
   0x8   : > { %s3717_s28 = smov (!%p191_p2), 108   ;;  %s3718_s29 = smov (!%p191_p2), 92   ;;  %vm1767_vm6 = vcmask (!%p191_p2), 752640   ;;  %vm2015_vm7 = vcmask (!%p191_p2), 744448   ;;  %vm2263_vm8 = vcmask (!%p191_p2), 736256   ;;  %vm2572_vm9 = vcmask (!%p191_p2), 261120  }
   0x9   : > { %s3719_s9 = smov (!%p191_p2), 91   ;;  %s3720_s21 = smov (!%p191_p2), 90   ;;  %vm2693_vm10 = vcmask (!%p191_p2), 154624   ;;  %vm2742_vm11 = vcmask (!%p191_p2), 416768   ;;  %vm2612_vm12 = vcmask (!%p191_p2), 7168  }
   0xd   : > { %s4727_s19 = smov (!%p223_p3, %s2935_s19), 1 }
   0xe   : > { %s3571_s20 = smul.u32 96, %s4727_s19 }
  0x10   : > { %s227_s23 = scalar_lea.vmem %s4723_s3, %s3571_s20  ;;  %s4634_s12 = scalar_lea.vmem %s4724_s4, %s3571_s20 }
  0x11   : > { %v3768_v0 = vld [vmem:[%s227_s23 + $0x4] ss:$12 sps:$4 sm:$0xff]   ;;  %v3770_v1 = vld [vmem:[%s227_s23] ss:$12 sps:$4 sm:$0xff]   ;;  %v3773_v2 = vld [vmem:[%s227_s23 + $0x8] ss:$12 sps:$4 sm:$0xff]  }
  0x12   : > { %753 = vrot.lane.b32.xlu0 %v3768_v0, %s3712_s24  ;;  %751 = vrot.lane.b32.xlu1 %v3770_v1, %s3712_s24  ;;  %v3776_v3 = vld [vmem:[%s227_s23 + $0x1c] ss:$12 sps:$4 sm:$0xff]   ;;  %v3779_v4 = vld [vmem:[%s227_s23 + $0x20] ss:$12 sps:$4 sm:$0xff]   ;;  %s3146_s20 = sshll.u32 %s4727_s19, 6 }
  0x13   : > { %v3782_v5 = vld [vmem:[%s227_s23 + $0x18] ss:$12 sps:$4 sm:$0xff]   ;;  %v3784_v6 = vld [vmem:[%s227_s23 + $0x34] ss:$12 sps:$4 sm:$0xff]   ;;  %v3790_v8 = vld [vmem:[%s227_s23 + $0x30] ss:$12 sps:$4 sm:$0xff]   ;;  %s4653_s15 = scalar_lea.vmem %s4725_s5, %s3146_s20 }
  0x14   : > { %v3786_v7 = vld [vmem:[%s227_s23 + $0x38] ss:$12 sps:$4 sm:$0xff]   ;;  %v3796_v10 = vld [vmem:[%s227_s23 + $0x50] ss:$12 sps:$4 sm:$0xff]   ;;  %v3798_v11 = vld [vmem:[%s227_s23 + $0x48] ss:$12 sps:$4 sm:$0xff]  }
  0x15   : > { %v3792_v9 = vld [vmem:[%s227_s23 + $0x4c] ss:$12 sps:$4 sm:$0xff]  }
  0x16   : > { %755 = vrot.lane.b32.xlu0 %v3773_v2, %s3712_s24  ;;  %759 = vrot.lane.b32.xlu1 %v3776_v3, %s3712_s24 }
  0x1a   : > { %761 = vrot.lane.b32.xlu0 %v3779_v4, %s3712_s24  ;;  %757 = vrot.lane.b32.xlu1 %v3782_v5, %s3712_s24 }
  0x1e   : > { %765 = vrot.lane.b32.xlu0 %v3784_v6, %s3712_s24  ;;  %767 = vrot.lane.b32.xlu1 %v3786_v7, %s3712_s24 }
  0x22   : > { %763 = vrot.lane.b32.xlu0 %v3790_v8, %s3712_s24  ;;  %771 = vrot.lane.b32.xlu1 %v3792_v9, %s3712_s24 }
  0x26   : > { %773 = vrot.lane.b32.xlu0 %v3796_v10, %s3712_s24  ;;  %769 = vrot.lane.b32.xlu1 %v3798_v11, %s3712_s24 }
  0x2a   : > { %346 = vrot.lane.b32.xlu0 %v3768_v0, %s3713_s25  ;;  %348 = vrot.lane.b32.xlu1 %v3773_v2, %s3713_s25 }
  0x2e   : > { %344 = vrot.lane.b32.xlu0 %v3770_v1, %s3713_s25  ;;  %352 = vrot.lane.b32.xlu1 %v3776_v3, %s3713_s25 }
  0x32   : > { %354 = vrot.lane.b32.xlu0 %v3779_v4, %s3713_s25  ;;  %350 = vrot.lane.b32.xlu1 %v3782_v5, %s3713_s25 }
  0x36   : > { %358 = vrot.lane.b32.xlu0 %v3784_v6, %s3713_s25  ;;  %360 = vrot.lane.b32.xlu1 %v3786_v7, %s3713_s25 }
  0x3a   : > { %356 = vrot.lane.b32.xlu0 %v3790_v8, %s3713_s25  ;;  %364 = vrot.lane.b32.xlu1 %v3792_v9, %s3713_s25 }
  0x3e   : > { %366 = vrot.lane.b32.xlu0 %v3796_v10, %s3713_s25  ;;  %362 = vrot.lane.b32.xlu1 %v3798_v11, %s3713_s25 }
  0x42   : > { %1001 = vrot.lane.b32.xlu0 %v3768_v0, %s3715_s26  ;;  %1003 = vrot.lane.b32.xlu1 %v3773_v2, %s3715_s26 }
  0x46   : > { %999 = vrot.lane.b32.xlu0 %v3770_v1, %s3715_s26  ;;  %1007 = vrot.lane.b32.xlu1 %v3776_v3, %s3715_s26 }
  0x4a   : > { %1009 = vrot.lane.b32.xlu0 %v3779_v4, %s3715_s26  ;;  %1005 = vrot.lane.b32.xlu1 %v3782_v5, %s3715_s26 }
  0x4e   : > { %1013 = vrot.lane.b32.xlu0 %v3784_v6, %s3715_s26  ;;  %1015 = vrot.lane.b32.xlu1 %v3786_v7, %s3715_s26 }
  0x52   : > { %1011 = vrot.lane.b32.xlu0 %v3790_v8, %s3715_s26  ;;  %1019 = vrot.lane.b32.xlu1 %v3792_v9, %s3715_s26 }
  0x56   : > { %1021 = vrot.lane.b32.xlu0 %v3796_v10, %s3715_s26  ;;  %1017 = vrot.lane.b32.xlu1 %v3798_v11, %s3715_s26 }
  0x5a   : > { %1249 = vrot.lane.b32.xlu0 %v3768_v0, %s3716_s27  ;;  %1251 = vrot.lane.b32.xlu1 %v3773_v2, %s3716_s27 }
  0x5e   : > { %1247 = vrot.lane.b32.xlu0 %v3770_v1, %s3716_s27  ;;  %1255 = vrot.lane.b32.xlu1 %v3776_v3, %s3716_s27 }
  0x62   : > { %1257 = vrot.lane.b32.xlu0 %v3779_v4, %s3716_s27  ;;  %1253 = vrot.lane.b32.xlu1 %v3782_v5, %s3716_s27 }
  0x66   : > { %1261 = vrot.lane.b32.xlu0 %v3784_v6, %s3716_s27  ;;  %1263 = vrot.lane.b32.xlu1 %v3786_v7, %s3716_s27 }
  0x6a   : > { %1259 = vrot.lane.b32.xlu0 %v3790_v8, %s3716_s27  ;;  %1267 = vrot.lane.b32.xlu1 %v3792_v9, %s3716_s27 }
  0x6e   : > { %1269 = vrot.lane.b32.xlu0 %v3796_v10, %s3716_s27  ;;  %1265 = vrot.lane.b32.xlu1 %v3798_v11, %s3716_s27 }
  0x72   : > { %1497 = vrot.lane.b32.xlu0 %v3768_v0, %s3717_s28  ;;  %1499 = vrot.lane.b32.xlu1 %v3773_v2, %s3717_s28 }
  0x76   : > { %1495 = vrot.lane.b32.xlu0 %v3770_v1, %s3717_s28  ;;  %1503 = vrot.lane.b32.xlu1 %v3776_v3, %s3717_s28 }
  0x7a   : > { %1505 = vrot.lane.b32.xlu0 %v3779_v4, %s3717_s28  ;;  %1501 = vrot.lane.b32.xlu1 %v3782_v5, %s3717_s28 }
  0x7e   : > { %1509 = vrot.lane.b32.xlu0 %v3784_v6, %s3717_s28  ;;  %1511 = vrot.lane.b32.xlu1 %v3786_v7, %s3717_s28 }
  0x82   : > { %1507 = vrot.lane.b32.xlu0 %v3790_v8, %s3717_s28  ;;  %1515 = vrot.lane.b32.xlu1 %v3792_v9, %s3717_s28 }
  0x84   : > { %v754_v13 = vpop.permute.xlu0 %753  ;;  %v752_v14 = vpop.permute.xlu1 %751 }
  0x85   : > { %v776_v18 = vsel %vm775_vm0, %v752_v14, %v754_v13 }
  0x86   : > { %1517 = vrot.lane.b32.xlu0 %v3796_v10, %s3717_s28  ;;  %1513 = vrot.lane.b32.xlu1 %v3798_v11, %s3717_s28 }
  0x88   : > { %v3856_v15 = vpop.permute.xlu0 %755  ;;  %v760_v16 = vpop.permute.xlu1 %759 }
  0x89   : > { %v777_v17 = vsel %vm775_vm0, %v754_v13, %v3856_v15  ;;  %v3978_v13 = vld [vmem:[%s4720_s0 + $0x28] sm:$0xff]  }
  0x8a   : > { %808 = vmatprep.subr.bf16.mxu0 %v777_v17  ;;  %1745 = vrot.lane.b32.xlu0 %v3768_v0, %s3718_s29 }
  0x8b   : > { %809 = vmatpush1.bf16.msra.mxu0 %v776_v18  ;;  %1747 = vrot.lane.b32.xlu1 %v3773_v2, %s3718_s29 }
  0x8c   : > { %v3865_v19 = vpop.permute.xlu0 %761  ;;  %v758_v20 = vpop.permute.xlu1 %757 }
  0x8d   : > { %v779_v21 = vsel %vm775_vm0, %v760_v16, %v3865_v19  ;;  %v778_v22 = vsel %vm775_vm0, %v758_v20, %v760_v16 }
  0x8e   : > { %810 = vmatprep.subr.bf16.mxu0 %v779_v21  ;;  %1743 = vrot.lane.b32.xlu0 %v3770_v1, %s3718_s29 }
  0x8f   : > { %811 = vmatpush1.bf16.msra.mxu0 %v778_v22  ;;  %1751 = vrot.lane.b32.xlu1 %v3776_v3, %s3718_s29 }
  0x90   : > { %v766_v23 = vpop.permute.xlu0 %765  ;;  %v3874_v24 = vpop.permute.xlu1 %767 }
  0x91   : > { %v781_v25 = vsel %vm775_vm0, %v766_v23, %v3874_v24 }
  0x92   : > { %1753 = vrot.lane.b32.xlu0 %v3779_v4, %s3718_s29  ;;  %812 = vmatprep.subr.bf16.mxu0 %v781_v25 }
  0x93   : > { %1749 = vrot.lane.b32.xlu1 %v3782_v5, %s3718_s29 }
  0x94   : > { %v764_v26 = vpop.permute.xlu0 %763  ;;  %v772_v27 = vpop.permute.xlu1 %771 }
  0x95   : > { %v780_v28 = vsel %vm775_vm0, %v764_v26, %v766_v23  ;;  %v3673_v23 = vld [vmem:[%s4720_s0 + $0x30] sm:$0xff]  }
  0x96   : > { %813 = vmatpush1.bf16.msra.mxu0 %v780_v28  ;;  %1757 = vrot.lane.b32.xlu0 %v3784_v6, %s3718_s29 }
  0x97   : > { %1759 = vrot.lane.b32.xlu1 %v3786_v7, %s3718_s29 }
  0x98   : > { %v3887_v29 = vpop.permute.xlu0 %773  ;;  %v770_v30 = vpop.permute.xlu1 %769 }
  0x99   : > { %v783_v31 = vsel %vm775_vm0, %v772_v27, %v3887_v29  ;;  %v782_v32 = vsel %vm775_vm0, %v770_v30, %v772_v27 }
  0x9a   : > { %814 = vmatprep.subr.bf16.mxu0 %v783_v31  ;;  %1755 = vrot.lane.b32.xlu0 %v3790_v8, %s3718_s29 }
  0x9b   : > { %815 = vmatpush1.bf16.msra.mxu0 %v782_v32  ;;  %1763 = vrot.lane.b32.xlu1 %v3792_v9, %s3718_s29  ;;  %v3675_v32 = vld [vmem:[%s4720_s0 + $0x38] sm:$0xff]  }
  0x9c   : > { %v347_v34 = vpop.permute.xlu0 %346  ;;  %v349_v35 = vpop.permute.xlu1 %348 }
  0x9d   : > { %v370_v36 = vsel %vm368_vm1, %v347_v34, %v349_v35 }
  0x9e   : > { %3000 = vmatmul.mubr.msk.bf16.vlgmr.msra.gmra.mrb[0].mxu0 %vm389_vm2, %v3895_v33  ;;  %1765 = vrot.lane.b32.xlu0 %v3796_v10, %s3718_s29 }
  0x9f   : > { %402 = vmatprep.subr.bf16.mxu1 %v370_v36  ;;  %850 = vmatprep.mubr.bf16.mxu0 %v3714_v12 }
  0xa0   : > { %v345_v37 = vpop.permute.xlu0 %344  ;;  %1761 = vrot.lane.b32.xlu1 %v3798_v11, %s3718_s29  ;;  %v353_v38 = vpop.permute.xlu1 %352 }
  0xa1   : > { %v369_v39 = vsel %vm368_vm1, %v345_v37, %v347_v34  ;;  %v4026_v34 = vld [vmem:[%s4720_s0 + $0x60] sm:$0xff]  }
  0xa2   : > { %403 = vmatpush1.bf16.msra.mxu1 %v369_v39  ;;  %1993 = vrot.lane.b32.xlu0 %v3768_v0, %s3719_s9 }
  0xa4   : > { %v355_v41 = vpop.permute.xlu0 %354  ;;  %1995 = vrot.lane.b32.xlu1 %v3773_v2, %s3719_s9  ;;  %v351_v42 = vpop.permute.xlu1 %350 }
  0xa5   : > { %v372_v43 = vsel %vm368_vm1, %v353_v38, %v355_v41  ;;  %v371_v44 = vsel %vm368_vm1, %v351_v42, %v353_v38  ;;  %v4050_v42 = vld [vmem:[%s4720_s0 + $0x68] sm:$0xff]  }
  0xa6   : > { %404 = vmatprep.subr.bf16.mxu1 %v372_v43  ;;  %3001 = vmatmul.mubr.msk.bf16.gmra.mrb[4].mxu0 %vm389_vm2, %v3913_v40 }
  0xa7   : > { %405 = vmatpush1.bf16.msra.mxu1 %v371_v44  ;;  %860 = vmatprep.mubr.bf16.mxu0 %v3714_v12 }
  0xa8   : > { %v359_v45 = vpop.permute.xlu0 %358  ;;  %1991 = vrot.lane.b32.xlu0 %v3770_v1, %s3719_s9  ;;  %1999 = vrot.lane.b32.xlu1 %v3776_v3, %s3719_s9  ;;  %v361_v46 = vpop.permute.xlu1 %360 }
  0xa9   : > { %v374_v47 = vsel %vm368_vm1, %v359_v45, %v361_v46 }
  0xaa   : > { %406 = vmatprep.subr.bf16.mxu1 %v374_v47 }
  0xac   : > { %v357_v49 = vpop.permute.xlu0 %356  ;;  %2001 = vrot.lane.b32.xlu0 %v3779_v4, %s3719_s9  ;;  %1997 = vrot.lane.b32.xlu1 %v3782_v5, %s3719_s9  ;;  %v365_v50 = vpop.permute.xlu1 %364 }
  0xad   : > { %v373_v51 = vsel %vm368_vm1, %v357_v49, %v359_v45 }
  0xae   : > { %407 = vmatpush1.bf16.msra.mxu1 %v373_v51  ;;  %3002 = vmatmul.mubr.msk.bf16.gmra.mrb[8].mxu0 %vm389_vm2, %v3932_v48 }
  0xaf   : > { %870 = vmatprep.mubr.bf16.mxu0 %v3714_v12 }
  0xb0   : > { %v367_v52 = vpop.permute.xlu0 %366  ;;  %2005 = vrot.lane.b32.xlu0 %v3784_v6, %s3719_s9  ;;  %2007 = vrot.lane.b32.xlu1 %v3786_v7, %s3719_s9  ;;  %v363_v53 = vpop.permute.xlu1 %362 }
  0xb1   : > { %v376_v54 = vsel %vm368_vm1, %v365_v50, %v367_v52  ;;  %v375_v55 = vsel %vm368_vm1, %v363_v53, %v365_v50  ;;  %v4072_v50 = vld [vmem:[%s4720_s0 + $0x70] sm:$0xff]  }
  0xb2   : > { %408 = vmatprep.subr.bf16.mxu1 %v376_v54  ;;  %v4093_v54 = vld [vmem:[%s4720_s0] sm:$0xff]  }
  0xb3   : > { %409 = vmatpush1.bf16.msra.mxu1 %v375_v55 }
  0xb4   : > { %v1002_v58 = vpop.permute.xlu0 %1001  ;;  %3235 = vmatprep.subr.bf16.mxu1 %v349_v35  ;;  %2003 = vrot.lane.b32.xlu0 %v3790_v8, %s3719_s9  ;;  %v3960_v59 = vpop.permute.xlu1 %1003 }
  0xb5   : > { %2011 = vrot.lane.b32.xlu1 %v3792_v9, %s3719_s9  ;;  %v1025_v60 = vsel %vm1023_vm3, %v1002_v58, %v3960_v59 }
  0xb6   : > { %2968 = vmatmul.mubr.msk.bf16.vlgmr.msra.gmra.mrb[0].mxu1 %vm389_vm2, %v3951_v56  ;;  %3003 = vmatmul.mubr.msk.bf16.gmra.mrb[12].mxu0 %vm389_vm2, %v3956_v57 }
  0xb7   : > { %1056 = vmatprep.subr.bf16.mxu0 %v1025_v60  ;;  %3236 = vmatpush3.bf16.msra.mxu1 %v349_v35 }
  0xb8   : > { %v1000_v61 = vpop.permute.xlu0 %999  ;;  %3237 = vmatprep.subr.bf16.mxu1 %v355_v41  ;;  %444 = vmatprep.mubr.bf16.mxu1 %v3714_v12  ;;  %v1008_v63 = vpop.permute.xlu1 %1007 }
  0xb9   : > { %v1024_v62 = vsel %vm1023_vm3, %v1000_v61, %v1002_v58  ;;  %1088 = vmatprep.mubr.bf16.mxu0 %v3714_v12  ;;  %2013 = vrot.lane.b32.xlu0 %v3796_v10, %s3719_s9  ;;  %v3681_v61 = vld [vmem:[%s4720_s0 + $0x8] sm:$0xff]  }
  0xba   : > { %1057 = vmatpush1.bf16.msra.mxu0 %v1024_v62  ;;  %2009 = vrot.lane.b32.xlu1 %v3798_v11, %s3719_s9  ;;  %v4121_v62 = vld [vmem:[%s4720_s0 + $0x80] sm:$0xff]   ;;  %s3721_s9 = smov 19  }
  0xbb   : > { %3238 = vmatpush3.bf16.msra.mxu1 %v355_v41 }
  0xbc   : > { %v3982_v14 = vpop.permute.xlu0 %1009  ;;  %3239 = vmatprep.subr.bf16.mxu1 %v361_v46  ;;  %v1006_v16 = vpop.permute.xlu1 %1005 }
  0xbd   : > { %v1027_v17 = vsel %vm1023_vm3, %v1008_v63, %v3982_v14  ;;  %2241 = vrot.lane.b32.xlu0 %v3768_v0, %s3720_s21  ;;  %v1026_v18 = vsel %vm1023_vm3, %v1006_v16, %v1008_v63 }
  0xbe   : > { %2969 = vmatmul.mubr.msk.bf16.gmra.mrb[4].mxu1 %vm389_vm2, %v3978_v13  ;;  %1058 = vmatprep.subr.bf16.mxu0 %v1027_v17 }
  0xbf   : > { %3240 = vmatpush3.bf16.msra.mxu1 %v361_v46  ;;  %1059 = vmatpush1.bf16.msra.mxu0 %v1026_v18  ;;  %v3683_v18 = vld [vmem:[%s4720_s0 + $0x10] sm:$0xff]  }
  0xc0   : > { %v1014_v20 = vpop.permute.xlu0 %1013  ;;  %3241 = vmatprep.subr.bf16.mxu1 %v367_v52  ;;  %454 = vmatprep.mubr.bf16.mxu1 %v3714_v12  ;;  %v3992_v21 = vpop.permute.xlu1 %1015 }
  0xc1   : > { %2243 = vrot.lane.b32.xlu1 %v3773_v2, %s3720_s21  ;;  %2239 = vrot.lane.b32.xlu0 %v3770_v1, %s3720_s21  ;;  %v1029_v22 = vsel %vm1023_vm3, %v1014_v20, %v3992_v21 }
  0xc2   : > { %1060 = vmatprep.subr.bf16.mxu0 %v1029_v22 }
  0xc3   : > { %3242 = vmatpush3.bf16.msra.mxu1 %v367_v52 }
  0xc4   : > { %v1012_v25 = vpop.permute.xlu0 %1011  ;;  %584 = vmatprep.subr.bf16.mxu1 %v3768_v0  ;;  %v1020_v27 = vpop.permute.xlu1 %1019 }
  0xc5   : > { %v1028_v26 = vsel %vm1023_vm3, %v1012_v25, %v1014_v20  ;;  %2247 = vrot.lane.b32.xlu1 %v3776_v3, %s3720_s21  ;;  %2249 = vrot.lane.b32.xlu0 %v3779_v4, %s3720_s21 }
  0xc6   : > { %2970 = vmatmul.mubr.msk.bf16.gmra.mrb[8].mxu1 %vm389_vm2, %v3673_v23  ;;  %1061 = vmatpush1.bf16.msra.mxu0 %v1028_v26 }
  0xc7   : > { %464 = vmatprep.mubr.bf16.mxu1 %v3714_v12 }
  0xc8   : > { %v4011_v28 = vpop.permute.xlu0 %1021  ;;  %v1018_v30 = vpop.permute.xlu1 %1017 }
  0xc9   : > { %v1031_v0 = vsel %vm1023_vm3, %v1020_v27, %v4011_v28  ;;  %2245 = vrot.lane.b32.xlu1 %v3782_v5, %s3720_s21  ;;  %2253 = vrot.lane.b32.xlu0 %v3784_v6, %s3720_s21  ;;  %v1030_v31 = vsel %vm1023_vm3, %v1018_v30, %v1020_v27 }
  0xca   : > { %1062 = vmatprep.subr.bf16.mxu0 %v1031_v0  ;;  %v3685_v0 = vld [vmem:[%s4720_s0 + $0x18] sm:$0xff]  }
  0xcb   : > { %1063 = vmatpush1.bf16.msra.mxu0 %v1030_v31  ;;  %v4168_v31 = vld [vmem:[%s4720_s0 + $0x90] sm:$0xff]  }
  0xcc   : > { %v1250_v35 = vpop.permute.xlu0 %1249  ;;  %v4028_v36 = vpop.permute.xlu1 %1251 }
  0xcd   : > { %2255 = vrot.lane.b32.xlu1 %v3786_v7, %s3720_s21  ;;  %2251 = vrot.lane.b32.xlu0 %v3790_v8, %s3720_s21  ;;  %v1273_v37 = vsel %vm1271_vm4, %v1250_v35, %v4028_v36 }
  0xce   : > { %2971 = vmatmul.mubr.msk.bf16.gmra.mrb[12].mxu1 %vm389_vm2, %v3675_v32  ;;  %3020 = vmatmul.mubr.msk.bf16.vlgmr.msra.gmra.mrb[0].mxu0 %vm389_vm2, %v4026_v34 }
  0xcf   : > { %3243 = vmatprep.mubr.msk.bf16.mxu1 %vm389_vm2, %v3951_v56  ;;  %1098 = vmatprep.mubr.bf16.mxu0 %v3714_v12 }
  0xd0   : > { %v1248_v38 = vpop.permute.xlu0 %1247  ;;  %1304 = vmatprep.subr.bf16.mxu0 %v1273_v37  ;;  %v1256_v41 = vpop.permute.xlu1 %1255 }
  0xd1   : > { %v1272_v39 = vsel %vm1271_vm4, %v1248_v38, %v1250_v35  ;;  %2259 = vrot.lane.b32.xlu1 %v3792_v9, %s3720_s21  ;;  %2261 = vrot.lane.b32.xlu0 %v3796_v10, %s3720_s21 }
  0xd2   : > { %1305 = vmatpush1.bf16.msra.mxu0 %v1272_v39 }
  0xd4   : > { %v4052_v43 = vpop.permute.xlu0 %1257  ;;  %v1254_v44 = vpop.permute.xlu1 %1253 }
  0xd5   : > { %2257 = vrot.lane.b32.xlu1 %v3798_v11, %s3720_s21  ;;  %v1275_v45 = vsel %vm1271_vm4, %v1256_v41, %v4052_v43  ;;  %v1274_v46 = vsel %vm1271_vm4, %v1254_v44, %v1256_v41  ;;  %v4184_v44 = vld [vmem:[%s4720_s0 + $0x98] sm:$0xff]  }
  0xd6   : > { %3244 = vmatmul.mubr.msk.bf16.vlgmr.msra.gmra.mrb[16].mxu1 %vm389_vm2, %v3978_v13  ;;  %3021 = vmatmul.mubr.msk.bf16.gmra.mrb[4].mxu0 %vm389_vm2, %v4050_v42 }
  0xd7   : > { %585 = vmatpush1.bf16.msra.mxu1 %v3770_v1  ;;  %3247 = vmatprep.mubr.msk.bf16.mxu1 %vm389_vm2, %v3673_v23 }
  0xd8   : > { %586 = vmatprep.subr.bf16.mxu1 %v3776_v3  ;;  %1108 = vmatprep.mubr.bf16.mxu0 %v3714_v12  ;;  %v1262_v47 = vpop.permute.xlu0 %1261  ;;  %v4067_v49 = vpop.permute.xlu1 %1263 }
  0xd9   : > { %1306 = vmatprep.subr.bf16.mxu0 %v1275_v45  ;;  %v1277_v1 = vsel %vm1271_vm4, %v1262_v47, %v4067_v49 }
  0xda   : > { %1307 = vmatpush1.bf16.msra.mxu0 %v1274_v46 }
  0xdb   : > { %587 = vmatpush1.bf16.msra.mxu1 %v3782_v5  ;;  %1308 = vmatprep.subr.bf16.mxu0 %v1277_v1  ;;  %v4198_v1 = vld [vmem:[%s4720_s0 + $0xa0] sm:$0xff]  }
  0xdc   : > { %588 = vmatprep.subr.bf16.mxu1 %v3784_v6  ;;  %v1260_v3 = vpop.permute.xlu0 %1259  ;;  %v1268_v51 = vpop.permute.xlu1 %1267 }
  0xdd   : > { %v1276_v52 = vsel %vm1271_vm4, %v1260_v3, %v1262_v47 }
  0xde   : > { %3248 = vmatmul.mubr.msk.bf16.gmra.mrb[20].mxu1 %vm389_vm2, %v3675_v32  ;;  %3022 = vmatmul.mubr.msk.bf16.gmra.mrb[8].mxu0 %vm389_vm2, %v4072_v50 }
  0xdf   : > { %589 = vmatpush1.bf16.msra.mxu1 %v3790_v8  ;;  %616 = vmatprep.mubr.bf16.mxu1 %v3714_v12  ;;  %v4098_v8 = vld [vmem:[%s4720_s0 + $0x78] sm:$0xff]  }
  0xe0   : > { %590 = vmatprep.subr.bf16.mxu1 %v3792_v9  ;;  %1118 = vmatprep.mubr.bf16.mxu0 %v3714_v12  ;;  %v4086_v5 = vpop.permute.xlu0 %1269  ;;  %v1266_v6 = vpop.permute.xlu1 %1265 }
  0xe1   : > { %1309 = vmatpush1.bf16.msra.mxu0 %v1276_v52  ;;  %v1279_v53 = vsel %vm1271_vm4, %v1268_v51, %v4086_v5  ;;  %v1278_v9 = vsel %vm1271_vm4, %v1266_v6, %v1268_v51 }
  0xe2   : > { %1310 = vmatprep.subr.bf16.mxu0 %v1279_v53  ;;  %v4220_v53 = vld [vmem:[%s4720_s0 + $0xa8] sm:$0xff]  }
  0xe3   : > { %591 = vmatpush1.bf16.msra.mxu1 %v3798_v11 }
  0xe4   : > { %3251 = vmatprep.subr.bf16.mxu1 %v3773_v2  ;;  %v1498_v55 = vpop.permute.xlu0 %1497  ;;  %v4103_v56 = vpop.permute.xlu1 %1499 }
  0xe5   : > { %1311 = vmatpush1.bf16.msra.mxu0 %v1278_v9  ;;  %v1521_v58 = vsel %vm1519_vm5, %v1498_v55, %v4103_v56 }
  0xe6   : > { %2980 = vmatmul.mubr.msk.bf16.vlgmr.msra.gmra.mrb[0].mxu1 %vm389_vm2, %v4093_v54  ;;  %3023 = vmatmul.mubr.msk.bf16.gmra.mrb[12].mxu0 %vm389_vm2, %v4098_v8 }
  0xe7   : > { %3252 = vmatpush3.bf16.msra.mxu1 %v3773_v2  ;;  %626 = vmatprep.mubr.bf16.mxu1 %v3714_v12 }
  0xe8   : > { %3253 = vmatprep.subr.bf16.mxu1 %v3779_v4  ;;  %1336 = vmatprep.mubr.bf16.mxu0 %v3714_v12  ;;  %v1496_v11 = vpop.permute.xlu0 %1495  ;;  %v1504_v60 = vpop.permute.xlu1 %1503 }
  0xe9   : > { %1552 = vmatprep.subr.bf16.mxu0 %v1521_v58  ;;  %v1520_v13 = vsel %vm1519_vm5, %v1496_v11, %v1498_v55  ;;  %v4242_v55 = vld [vmem:[%s4720_s0 + $0xb0] sm:$0xff]  }
  0xeb   : > { %3254 = vmatpush3.bf16.msra.mxu1 %v3779_v4 }
  0xec   : > { %3255 = vmatprep.subr.bf16.mxu1 %v3786_v7  ;;  %v4125_v2 = vpop.permute.xlu0 %1505  ;;  %v1502_v63 = vpop.permute.xlu1 %1501 }
  0xed   : > { %v1523_v16 = vsel %vm1519_vm5, %v1504_v60, %v4125_v2  ;;  %v1522_v20 = vsel %vm1519_vm5, %v1502_v63, %v1504_v60  ;;  %v4265_v60 = vld [vmem:[%s4720_s0 + $0xb8] sm:$0xff]  }
  0xee   : > { %2981 = vmatmul.mubr.msk.bf16.gmra.mrb[4].mxu1 %vm389_vm2, %v3681_v61  ;;  %3040 = vmatmul.mubr.msk.bf16.vlgmr.msra.gmra.mrb[0].mxu0 %vm389_vm2, %v4121_v62 }
  0xef   : > { %3256 = vmatpush3.bf16.msra.mxu1 %v3786_v7  ;;  %636 = vmatprep.mubr.bf16.mxu1 %v3714_v12  ;;  %v4145_v7 = vld [vmem:[%s4720_s0 + $0x88] sm:$0xff]  }
  0xf0   : > { %3257 = vmatprep.subr.bf16.mxu1 %v3796_v10  ;;  %1346 = vmatprep.mubr.bf16.mxu0 %v3714_v12  ;;  %v1510_v4 = vpop.permute.xlu0 %1509  ;;  %v4137_v17 = vpop.permute.xlu1 %1511 }
  0xf1   : > { %1553 = vmatpush1.bf16.msra.mxu0 %v1520_v13  ;;  %v1525_v23 = vsel %vm1519_vm5, %v1510_v4, %v4137_v17 }
  0xf2   : > { %1554 = vmatprep.subr.bf16.mxu0 %v1523_v16 }
  0xf3   : > { %3258 = vmatpush3.bf16.msra.mxu1 %v3796_v10 }
  0xf4   : > { %3267 = vmatprep.subr.bf16.mxu1 %v3856_v15  ;;  %v1508_v22 = vpop.permute.xlu0 %1507  ;;  %v1516_v25 = vpop.permute.xlu1 %1515 }
  0xf5   : > { %1555 = vmatpush1.bf16.msra.mxu0 %v1522_v20  ;;  %v1524_v26 = vsel %vm1519_vm5, %v1508_v22, %v1510_v4  ;;  %v2458_v22 = vld [vmem:[%s4721_s1] sm:$0xff] }
  0xf6   : > { %2982 = vmatmul.mubr.msk.bf16.gmra.mrb[8].mxu1 %vm389_vm2, %v3683_v18  ;;  %3041 = vmatmul.mubr.msk.bf16.gmra.mrb[4].mxu0 %vm389_vm2, %v4145_v7 }
  0xf7   : > { %646 = vmatprep.mubr.bf16.mxu1 %v3714_v12  ;;  %1356 = vmatprep.mubr.bf16.mxu0 %v3714_v12 }
  0xf8   : > { %1556 = vmatprep.subr.bf16.mxu0 %v1525_v23  ;;  %v4158_v10 = vpop.permute.xlu0 %1517  ;;  %v1514_v27 = vpop.permute.xlu1 %1513  ;;  %v2459_v23 = vld [vmem:[%s4721_s1 + $0x8] sm:$0xff]  ;;  %2468 = vperm.xlu0 %3590, %v2458_v22  }
  0xf9   : > { %1557 = vmatpush1.bf16.msra.mxu0 %v1524_v26  ;;  %v1527_v30 = vsel %vm1519_vm5, %v1516_v25, %v4158_v10  ;;  %v1526_v32 = vsel %vm1519_vm5, %v1514_v27, %v1516_v25  ;;  %2473 = vperm.xlu1 %3591, %v2459_v23   ;;  %v2461_v25 = vld [vmem:[%s4721_s1 + $0x18] sm:$0xff] }
  0xfa   : > { %1558 = vmatprep.subr.bf16.mxu0 %v1527_v30  ;;  %v2460_v30 = vld [vmem:[%s4721_s1 + $0x10] sm:$0xff] }
  0xfc   : > { %v1746_v35 = vpop.permute.xlu0 %1745  ;;  %2483 = vperm.xlu0 %3590, %v2461_v25  }
  0xfd   : > { %1559 = vmatpush1.bf16.msra.mxu0 %v1526_v32  ;;  %v4171_v37 = vpop.permute.xlu1 %1747  ;;  %2478 = vperm.xlu1 %3591, %v2460_v30   ;;  %v3696_v32 = vld [vmem:[%s4720_s0 + $0xe0] sm:$0xff]  }
  0xfe   : > { %2983 = vmatmul.mubr.msk.bf16.gmra.mrb[12].mxu1 %vm389_vm2, %v3685_v0  ;;  %3042 = vmatmul.mubr.msk.bf16.gmra.mrb[8].mxu0 %vm389_vm2, %v4168_v31  ;;  %v1769_v38 = vsel %vm1767_vm6, %v1746_v35, %v4171_v37 }
  0xff   : > { %3259 = vmatprep.mubr.msk.bf16.mxu1 %vm389_vm2, %v4093_v54  ;;  %1366 = vmatprep.mubr.bf16.mxu0 %v3714_v12 }
 0x100   : > { %v1744_v39 = vpop.permute.xlu0 %1743  ;;  %1800 = vmatprep.subr.bf16.mxu0 %v1769_v38 }
 0x101   : > { %v1752_v41 = vpop.permute.xlu1 %1751 }
 0x104   : > { %v4186_v45 = vpop.permute.xlu0 %1753 }
 0x105   : > { %v1750_v46 = vpop.permute.xlu1 %1749 }
 0x106   : > { %3260 = vmatmul.mubr.msk.bf16.vlgmr.msra.gmra.mrb[16].mxu1 %vm389_vm2, %v3681_v61  ;;  %3043 = vmatmul.mubr.msk.bf16.gmra.mrb[12].mxu0 %vm389_vm2, %v4184_v44 }
 0x107   : > { %3268 = vmatpush3.bf16.msra.mxu1 %v3856_v15  ;;  %3263 = vmatprep.mubr.msk.bf16.mxu1 %vm389_vm2, %v3683_v18  ;;  %v1768_v15 = vsel %vm1767_vm6, %v1744_v39, %v1746_v35  ;;  %v4326_v18 = vld [vmem:[%s4720_s0 + $0xd0] sm:$0xff]   ;;  %v2462_v35 = vld [vmem:[%s4721_s1 + $0x20] sm:$0xff] }
 0x108   : > { %3269 = vmatprep.subr.bf16.mxu1 %v3865_v19  ;;  %1584 = vmatprep.mubr.bf16.mxu0 %v3714_v12  ;;  %v1758_v47 = vpop.permute.xlu0 %1757  ;;  %v2464_v39 = vld [vmem:[%s4721_s1 + $0x30] sm:$0xff] }
 0x109   : > { %v4201_v3 = vpop.permute.xlu1 %1759  ;;  %2488 = vperm.xlu1 %3591, %v2462_v35  }
 0x10a   : > { %v1773_v54 = vsel %vm1767_vm6, %v1758_v47, %v4201_v3 }
 0x10b   : > { %3270 = vmatpush3.bf16.msra.mxu1 %v3865_v19  ;;  %v1771_v19 = vsel %vm1767_vm6, %v1752_v41, %v4186_v45 }
 0x10c   : > { %3271 = vmatprep.subr.bf16.mxu1 %v3874_v24  ;;  %v1756_v51 = vpop.permute.xlu0 %1755 }
 0x10d   : > { %v1764_v52 = vpop.permute.xlu1 %1763  ;;  %2498 = vperm.xlu1 %3591, %v2464_v39  }
 0x10e   : > { %3264 = vmatmul.mubr.msk.bf16.gmra.mrb[20].mxu1 %vm389_vm2, %v3685_v0  ;;  %3060 = vmatmul.mubr.msk.bf16.vlgmr.msra.gmra.mrb[0].mxu0 %vm389_vm2, %v4198_v1 }
 0x10f   : > { %3272 = vmatpush3.bf16.msra.mxu1 %v3874_v24  ;;  %3275 = vmatprep.mubr.msk.bf16.mxu1 %vm389_vm2, %v3895_v33  ;;  %v1770_v24 = vsel %vm1767_vm6, %v1750_v46, %v1752_v41  ;;  %v3697_v46 = vld [vmem:[%s4720_s0 + $0xe8] sm:$0xff]  }
 0x110   : > { %3273 = vmatprep.subr.bf16.mxu1 %v3887_v29  ;;  %1594 = vmatprep.mubr.bf16.mxu0 %v3714_v12  ;;  %v4215_v6 = vpop.permute.xlu0 %1765 }
 0x111   : > { %1801 = vmatpush1.bf16.msra.mxu0 %v1768_v15 }
 0x112   : > { %1802 = vmatprep.subr.bf16.mxu0 %v1771_v19  ;;  %v1762_v9 = vpop.permute.xlu1 %1761 }
 0x113   : > { %3274 = vmatpush3.bf16.msra.mxu1 %v3887_v29  ;;  %v1772_v29 = vsel %vm1767_vm6, %v1756_v51, %v1758_v47  ;;  %v1774_v58 = vsel %vm1767_vm6, %v1762_v9, %v1764_v52  ;;  %v3703_v9 = vld [vmem:[%s4720_s0 + $0x118] sm:$0xff]  }
 0x114   : > { %3283 = vmatprep.subr.bf16.mxu1 %v3960_v59  ;;  %v1994_v33 = vpop.permute.xlu0 %1993 }
 0x115   : > { %1803 = vmatpush1.bf16.msra.mxu0 %v1770_v24  ;;  %v3699_v24 = vld [vmem:[%s4720_s0 + $0xf8] sm:$0xff]  }
 0x116   : > { %3276 = vmatmul.mubr.msk.bf16.vlgmr.msra.gmra.mrb[16].mxu1 %vm389_vm2, %v3913_v40  ;;  %3061 = vmatmul.mubr.msk.bf16.gmra.mrb[4].mxu0 %vm389_vm2, %v4220_v53  ;;  %v1775_v40 = vsel %vm1767_vm6, %v1764_v52, %v4215_v6  ;;  %v3698_v52 = vld [vmem:[%s4720_s0 + $0xf0] sm:$0xff]  }
 0x117   : > { %3284 = vmatpush3.bf16.msra.mxu1 %v3960_v59  ;;  %3279 = vmatprep.mubr.msk.bf16.mxu1 %vm389_vm2, %v3932_v48  ;;  %v4245_v48 = vpop.permute.xlu1 %1995 }
 0x118   : > { %3285 = vmatprep.subr.bf16.mxu1 %v3982_v14  ;;  %1604 = vmatprep.mubr.bf16.mxu0 %v3714_v12 }
 0x119   : > { %1804 = vmatprep.subr.bf16.mxu0 %v1773_v54  ;;  %v3701_v54 = vld [vmem:[%s4720_s0 + $0x108] sm:$0xff]  }
 0x11a   : > { %1805 = vmatpush1.bf16.msra.mxu0 %v1772_v29  ;;  %v1992_v59 = vpop.permute.xlu0 %1991  ;;  %v3702_v29 = vld [vmem:[%s4720_s0 + $0x110] sm:$0xff]  }
 0x11b   : > { %3286 = vmatpush3.bf16.msra.mxu1 %v3982_v14  ;;  %1806 = vmatprep.subr.bf16.mxu0 %v1775_v40  ;;  %v2017_v14 = vsel %vm2015_vm7, %v1994_v33, %v4245_v48  ;;  %v2000_v11 = vpop.permute.xlu1 %1999 }
 0x11c   : > { %3287 = vmatprep.subr.bf16.mxu1 %v3992_v21 }
 0x11e   : > { %3280 = vmatmul.mubr.msk.bf16.gmra.mrb[20].mxu1 %vm389_vm2, %v3956_v57  ;;  %3062 = vmatmul.mubr.msk.bf16.gmra.mrb[8].mxu0 %vm389_vm2, %v4242_v55  ;;  %v4260_v57 = vpop.permute.xlu0 %2001 }
 0x11f   : > { %3288 = vmatpush3.bf16.msra.mxu1 %v3992_v21  ;;  %3291 = vmatprep.mubr.msk.bf16.mxu1 %vm389_vm2, %v4026_v34  ;;  %v1998_v21 = vpop.permute.xlu1 %1997 }
 0x120   : > { %3289 = vmatprep.subr.bf16.mxu1 %v4011_v28  ;;  %1614 = vmatprep.mubr.bf16.mxu0 %v3714_v12  ;;  %v2018_v61 = vsel %vm2015_vm7, %v1998_v21, %v2000_v11 }
 0x121   : > { %1807 = vmatpush1.bf16.msra.mxu0 %v1774_v58 }
 0x122   : > { %2048 = vmatprep.subr.bf16.mxu0 %v2017_v14  ;;  %v2006_v34 = vpop.permute.xlu0 %2005 }
 0x123   : > { %3290 = vmatpush3.bf16.msra.mxu1 %v4011_v28  ;;  %v4281_v28 = vld [vmem:[%s4720_s0 + $0xc0] sm:$0xff]  }
 0x124   : > { %3299 = vmatprep.subr.bf16.mxu1 %v4028_v36 }
 0x126   : > { %3292 = vmatmul.mubr.msk.bf16.vlgmr.msra.gmra.mrb[16].mxu1 %vm389_vm2, %v4050_v42  ;;  %3063 = vmatmul.mubr.msk.bf16.gmra.mrb[12].mxu0 %vm389_vm2, %v4265_v60  ;;  %v4285_v42 = vpop.permute.xlu1 %2007 }
 0x127   : > { %3300 = vmatpush3.bf16.msra.mxu1 %v4028_v36  ;;  %3295 = vmatprep.mubr.msk.bf16.mxu1 %vm389_vm2, %v4072_v50  ;;  %v2004_v36 = vpop.permute.xlu0 %2003  ;;  %v2016_v50 = vsel %vm2015_vm7, %v1992_v59, %v1994_v33  ;;  %v2021_v63 = vsel %vm2015_vm7, %v2006_v34, %v4285_v42  ;;  %v3700_v33 = vld [vmem:[%s4720_s0 + $0x100] sm:$0xff]  }
 0x128   : > { %3301 = vmatprep.subr.bf16.mxu1 %v4052_v43  ;;  %1832 = vmatprep.mubr.bf16.mxu0 %v3714_v12 }
 0x12b   : > { %3302 = vmatpush3.bf16.msra.mxu1 %v4052_v43  ;;  %v2019_v43 = vsel %vm2015_vm7, %v2000_v11, %v4260_v57 }
 0x12c   : > { %3303 = vmatprep.subr.bf16.mxu1 %v4067_v49 }
 0x12e   : > { %3296 = vmatmul.mubr.msk.bf16.gmra.mrb[20].mxu1 %vm389_vm2, %v4098_v8  ;;  %3080 = vmatmul.mubr.msk.bf16.vlgmr.msra.gmra.mrb[0].mxu0 %vm389_vm2, %v4281_v28  ;;  %v4302_v8 = vld [vmem:[%s4720_s0 + $0xc8] sm:$0xff]  }
 0x12f   : > { %3304 = vmatpush3.bf16.msra.mxu1 %v4067_v49  ;;  %3307 = vmatprep.mubr.msk.bf16.mxu1 %vm389_vm2, %v4121_v62  ;;  %v2012_v49 = vpop.permute.xlu1 %2011  ;;  %v4306_v62 = vpop.permute.xlu0 %2013 }
 0x130   : > { %3305 = vmatprep.subr.bf16.mxu1 %v4086_v5  ;;  %1842 = vmatprep.mubr.bf16.mxu0 %v3714_v12  ;;  %v2023_v16 = vsel %vm2015_vm7, %v2012_v49, %v4306_v62 }
 0x131   : > { %2049 = vmatpush1.bf16.msra.mxu0 %v2016_v50 }
 0x132   : > { %2050 = vmatprep.subr.bf16.mxu0 %v2019_v43  ;;  %v2532_v43 = vlaneseq }
 0x133   : > { %3306 = vmatpush3.bf16.msra.mxu1 %v4086_v5  ;;  %v2020_v5 = vsel %vm2015_vm7, %v2004_v36, %v2006_v34  ;;  %v2242_v13 = vpop.permute.xlu0 %2241  ;;  %v2010_v4 = vpop.permute.xlu1 %2009 }
 0x134   : > { %3315 = vmatprep.subr.bf16.mxu1 %v4103_v56  ;;  %v2022_v20 = vsel %vm2015_vm7, %v2010_v4, %v2012_v49 }
 0x135   : > { %2051 = vmatpush1.bf16.msra.mxu0 %v2018_v61 }
 0x136   : > { %3308 = vmatmul.mubr.msk.bf16.vlgmr.msra.gmra.mrb[16].mxu1 %vm389_vm2, %v4145_v7  ;;  %3081 = vmatmul.mubr.msk.bf16.gmra.mrb[4].mxu0 %vm389_vm2, %v4302_v8 }
 0x137   : > { %3316 = vmatpush3.bf16.msra.mxu1 %v4103_v56  ;;  %3311 = vmatprep.mubr.msk.bf16.mxu1 %vm389_vm2, %v4168_v31  ;;  %v4330_v56 = vpop.permute.xlu1 %2243  ;;  %v2240_v7 = vpop.permute.xlu0 %2239 }
 0x138   : > { %3317 = vmatprep.subr.bf16.mxu1 %v4125_v2  ;;  %1852 = vmatprep.mubr.bf16.mxu0 %v3714_v12  ;;  %v2264_v38 = vsel %vm2263_vm8, %v2240_v7, %v2242_v13 }
 0x139   : > { %2052 = vmatprep.subr.bf16.mxu0 %v2021_v63  ;;  %v2530_v63 = vld [vmem:[%s4722_s2] sm:$0x7] }
 0x13a   : > { %2053 = vmatpush1.bf16.msra.mxu0 %v2020_v5 }
 0x13b   : > { %3318 = vmatpush3.bf16.msra.mxu1 %v4125_v2  ;;  %2054 = vmatprep.subr.bf16.mxu0 %v2023_v16  ;;  %v2265_v2 = vsel %vm2263_vm8, %v2242_v13, %v4330_v56  ;;  %v2248_v26 = vpop.permute.xlu1 %2247  ;;  %v4359_v27 = vpop.permute.xlu0 %2249 }
 0x13c   : > { %3319 = vmatprep.subr.bf16.mxu1 %v4137_v17  ;;  %v2267_v41 = vsel %vm2263_vm8, %v2248_v26, %v4359_v27 }
 0x13e   : > { %3312 = vmatmul.mubr.msk.bf16.gmra.mrb[20].mxu1 %vm389_vm2, %v4184_v44  ;;  %3082 = vmatmul.mubr.msk.bf16.gmra.mrb[8].mxu0 %vm389_vm2, %v4326_v18 }
 0x13f   : > { %3320 = vmatpush3.bf16.msra.mxu1 %v4137_v17  ;;  %3323 = vmatprep.mubr.msk.bf16.mxu1 %vm389_vm2, %v4198_v1  ;;  %v4353_v17 = vld [vmem:[%s4720_s0 + $0xd8] sm:$0xff]   ;;  %v2246_v0 = vpop.permute.xlu1 %2245  ;;  %v2254_v31 = vpop.permute.xlu0 %2253 }
 0x140   : > { %3321 = vmatprep.subr.bf16.mxu1 %v4158_v10  ;;  %1862 = vmatprep.mubr.bf16.mxu0 %v3714_v12  ;;  %v2266_v47 = vsel %vm2263_vm8, %v2246_v0, %v2248_v26 }
 0x141   : > { %2055 = vmatpush1.bf16.msra.mxu0 %v2022_v20 }
 0x142   : > { %2296 = vmatprep.subr.bf16.mxu0 %v2265_v2 }
 0x143   : > { %3322 = vmatpush3.bf16.msra.mxu1 %v4158_v10  ;;  %v2463_v10 = vld [vmem:[%s4721_s1 + $0x28] sm:$0xff]  ;;  %v2256_v44 = vpop.permute.xlu1 %2255 }
 0x144   : > { %3331 = vmatprep.subr.bf16.mxu1 %v4171_v37  ;;  %2493 = vperm.xlu0 %3590, %v2463_v10   ;;  %v2269_v51 = vsel %vm2263_vm8, %v2254_v31, %v2256_v44 }
 0x146   : > { %3324 = vmatmul.mubr.msk.bf16.vlgmr.msra.gmra.mrb[16].mxu1 %vm389_vm2, %v4220_v53  ;;  %3083 = vmatmul.mubr.msk.bf16.gmra.mrb[12].mxu0 %vm389_vm2, %v4353_v17 }
 0x147   : > { %3332 = vmatpush3.bf16.msra.mxu1 %v4171_v37  ;;  %3327 = vmatprep.mubr.msk.bf16.mxu1 %vm389_vm2, %v4242_v55  ;;  %v2465_v37 = vld [vmem:[%s4721_s1 + $0x38] sm:$0xff]  ;;  %v2260_v1 = vpop.permute.xlu1 %2259 }
 0x148   : > { %3333 = vmatprep.subr.bf16.mxu1 %v4186_v45  ;;  %2080 = vmatprep.mubr.bf16.mxu0 %v3714_v12 }
 0x149   : > { %2503 = vperm.xlu0 %3590, %v2465_v37  }
 0x14b   : > { %3334 = vmatpush3.bf16.msra.mxu1 %v4186_v45  ;;  %v2252_v45 = vpop.permute.xlu0 %2251 }
 0x14c   : > { %3335 = vmatprep.subr.bf16.mxu1 %v4201_v3  ;;  %v2268_v15 = vsel %vm2263_vm8, %v2252_v45, %v2254_v31 }
 0x14e   : > { %3328 = vmatmul.mubr.msk.bf16.gmra.mrb[20].mxu1 %vm389_vm2, %v4265_v60  ;;  %3100 = vmatmul.mubr.msk.bf16.vlgmr.msra.gmra.mrb[0].mxu0 %vm389_vm2, %v3696_v32 }
 0x14f   : > { %3336 = vmatpush3.bf16.msra.mxu1 %v4201_v3  ;;  %3339 = vmatprep.mubr.msk.bf16.mxu1 %vm389_vm2, %v4281_v28  ;;  %v2262_v3 = vpop.permute.xlu0 %2261 }
 0x150   : > { %3337 = vmatprep.subr.bf16.mxu1 %v4215_v6  ;;  %2090 = vmatprep.mubr.bf16.mxu0 %v3714_v12  ;;  %v2271_v19 = vsel %vm2263_vm8, %v2260_v1, %v2262_v3 }
 0x151   : > { %2297 = vmatpush1.bf16.msra.mxu0 %v2264_v38 }
 0x152   : > { %2298 = vmatprep.subr.bf16.mxu0 %v2267_v41 }
 0x153   : > { %3338 = vmatpush3.bf16.msra.mxu1 %v4215_v6  ;;  %v2258_v6 = vpop.permute.xlu1 %2257 }
 0x154   : > { %3347 = vmatprep.subr.bf16.mxu1 %v4245_v48  ;;  %v2270_v53 = vsel %vm2263_vm8, %v2258_v6, %v2260_v1 }
 0x155   : > { %2299 = vmatpush1.bf16.msra.mxu0 %v2266_v47 }
 0x156   : > { %3340 = vmatmul.mubr.msk.bf16.vlgmr.msra.gmra.mrb[16].mxu1 %vm389_vm2, %v4302_v8  ;;  %3101 = vmatmul.mubr.msk.bf16.gmra.mrb[4].mxu0 %vm389_vm2, %v3697_v46  ;;  %v2533_v8 = vshrl.u32 %v2532_v43, 7 }
 0x157   : > { %3348 = vmatpush3.bf16.msra.mxu1 %v4245_v48  ;;  %3343 = vmatprep.mubr.msk.bf16.mxu1 %vm389_vm2, %v4326_v18 }
 0x158   : > { %3349 = vmatprep.subr.bf16.mxu1 %v4260_v57  ;;  %2100 = vmatprep.mubr.bf16.mxu0 %v3714_v12  ;;  %v2538_v5 = vsub.s32 1, %v2533_v8  ;;  %v2542_v26 = vsub.s32 2, %v2533_v8 }
 0x159   : > { %2300 = vmatprep.subr.bf16.mxu0 %v2269_v51 }
 0x15a   : > { %2301 = vmatpush1.bf16.msra.mxu0 %v2268_v15  ;;  %v4491_v22 = vrot.slane %v2530_v63, %v2538_v5  ;;  %v4496_v37 = vrot.slane %v2530_v63, %v2542_v26 }
 0x15b   : > { %3350 = vmatpush3.bf16.msra.mxu1 %v4260_v57  ;;  %2302 = vmatprep.subr.bf16.mxu0 %v2271_v19 }
 0x15c   : > { %3351 = vmatprep.subr.bf16.mxu1 %v4285_v42 }
 0x15e   : > { %3344 = vmatmul.mubr.msk.bf16.gmra.mrb[20].mxu1 %vm389_vm2, %v4353_v17  ;;  %3102 = vmatmul.mubr.msk.bf16.gmra.mrb[8].mxu0 %vm389_vm2, %v3698_v52 }
 0x15f   : > { %3352 = vmatpush3.bf16.msra.mxu1 %v4285_v42  ;;  %2110 = vmatprep.mubr.bf16.mxu0 %v3714_v12 }
 0x160   : > { %3353 = vmatprep.subr.bf16.mxu1 %v4306_v62  ;;  %3355 = vmatprep.mubr.msk.bf16.mxu1 %vm389_vm2, %v3696_v32 }
 0x161   : > { %2303 = vmatpush1.bf16.msra.mxu0 %v2270_v53 }
 0x163   : > { %3354 = vmatpush3.bf16.msra.mxu1 %v4306_v62  ;;  %v2534_v62 = vsub.s32 0, %v2533_v8 }
 0x164   : > { %3363 = vmatprep.subr.bf16.mxu1 %v4330_v56 }
 0x166   : > { %3103 = vmatmul.mubr.msk.bf16.gmra.mrb[12].mxu0 %vm389_vm2, %v3699_v24  ;;  %3356 = vmatmul.mubr.msk.bf16.vlgmr.msra.gmra.mrb[16].mxu1 %vm389_vm2, %v3697_v46 }
 0x167   : > { %3364 = vmatpush3.bf16.msra.mxu1 %v4330_v56  ;;  %3359 = vmatprep.mubr.msk.bf16.mxu1 %vm389_vm2, %v3698_v52  ;;  %v4489_v56 = vrot.slane %v2530_v63, %v2534_v62 }
 0x168   : > { %3365 = vmatprep.subr.bf16.mxu1 %v4359_v27  ;;  %2328 = vmatprep.mubr.bf16.mxu0 %v3714_v12 }
 0x16b   : > { %3366 = vmatpush3.bf16.msra.mxu1 %v4359_v27 }
 0x16c   : > { %3367 = vmatprep.subr.bf16.mxu1 %v2256_v44 }
 0x16e   : > { %3360 = vmatmul.mubr.msk.bf16.gmra.mrb[20].mxu1 %vm389_vm2, %v3699_v24  ;;  %3120 = vmatmul.mubr.msk.bf16.vlgmr.msra.gmra.mrb[0].mxu0 %vm389_vm2, %v3700_v33 }
 0x16f   : > { %3368 = vmatpush3.bf16.msra.mxu1 %v2256_v44  ;;  %2338 = vmatprep.mubr.bf16.mxu0 %v3714_v12 }
 0x170   : > { %3369 = vmatprep.subr.bf16.mxu1 %v2262_v3  ;;  %3371 = vmatprep.mubr.msk.bf16.mxu1 %vm389_vm2, %v3700_v33 }
 0x173   : > { %3370 = vmatpush3.bf16.msra.mxu1 %v2262_v3 }
 0x176   : > { %3121 = vmatmul.mubr.msk.bf16.gmra.mrb[4].mxu0 %vm389_vm2, %v3701_v54  ;;  %3372 = vmatmul.mubr.msk.bf16.vlgmr.msra.gmra.mrb[16].mxu1 %vm389_vm2, %v3701_v54 }
 0x177   : > { %2348 = vmatprep.mubr.bf16.mxu0 %v3714_v12  ;;  %3375 = vmatprep.mubr.msk.bf16.mxu1 %vm389_vm2, %v3702_v29  ;;  %v2469_v61 = vpop.permute.xlu0 %2468 }
 0x178   : > { %v2474_v49 = vpop.permute.xlu1 %2473 }
 0x17b   : > { %v2484_v16 = vpop.permute.xlu0 %2483 }
 0x17c   : > { %v2479_v7 = vpop.permute.xlu1 %2478 }
 0x17e   : > { %3122 = vmatmul.mubr.msk.bf16.gmra.mrb[8].mxu0 %vm389_vm2, %v3702_v29  ;;  %3376 = vmatmul.mubr.msk.bf16.gmra.mrb[20].mxu1 %vm389_vm2, %v3703_v9 }
 0x17f   : > { %2358 = vmatprep.mubr.bf16.mxu0 %v3714_v12 }
 0x186   : > { %3123 = vmatmul.mubr.msk.bf16.gmra.mrb[12].mxu0 %vm389_vm2, %v3703_v9 }
 0x188   : > { %v4500_v39 = vpop.permute.xlu1 %2488 }
 0x1b9   : > { %v618_v40 = vpop.f32.mrb[0].mxu1 }
 0x1ba   : > { %v620_v55 = vpop.f32.mrb[1].mxu1 }
 0x1bb   : > { %v622_v48 = vpop.f32.mrb[2].mxu1 }
 0x1bc   : > { %v624_v59 = vpop.f32.mrb[3].mxu1 }
 0x1c1   : > { %v628_v58 = vpop.f32.mrb[4].mxu1 }
 0x1c2   : > { %v630_v14 = vpop.f32.mrb[5].mxu1 }
 0x1c3   : > { %v632_v11 = vpop.f32.mrb[6].mxu1  ;;  %v4498_v38 = vpop.permute.xlu0 %2493 }
 0x1c4   : > { %v4468_v57 = vpop.f32.mrb[7].mxu1 }
 0x1c9   : > { %v4470_v60 = vpop.f32.mrb[8].mxu1 }
 0x1ca   : > { %v4472_v21 = vpop.f32.mrb[9].mxu1 }
 0x1cb   : > { %v4474_v34 = vpop.f32.mrb[10].mxu1 }
 0x1cc   : > { %v4476_v28 = vpop.f32.mrb[11].mxu1 }
 0x1d1   : > { %v4478_v12 = vpop.f32.mrb[12].mxu1 }
 0x1d2   : > { %v4480_v42 = vpop.f32.mrb[13].mxu1 }
 0x1d3   : > { %v4482_v36 = vpop.f32.mrb[14].mxu1 }
 0x1d4   : > { %v4484_v50 = vpop.f32.mrb[15].mxu1 }
 0x241   : > { %v2330_v13 = vpop.f32.mrb[0].mxu0 }
 0x242   : > { %v3379_v4 = vadd.f32 %v2330_v13, %v618_v40  ;;  %v2332_v18 = vpop.f32.mrb[1].mxu0 }
 0x243   : > { %v3380_v20 = vadd.f32 %v2332_v18, %v620_v55  ;;  %v2334_v2 = vpop.f32.mrb[2].mxu0 }
 0x244   : > { %v2506_v23 = vadd.f32 %v3379_v4, %v2469_v61  ;;  %v3381_v17 = vadd.f32 %v2334_v2, %v622_v48  ;;  %v2336_v25 = vpop.f32.mrb[3].mxu0  ;;  %v4525_v4 = vpop.permute.xlu1 %2498 }
 0x245   : > { %v2507_v27 = vadd.f32 %v3380_v20, %v2469_v61  ;;  %v3382_v30 = vadd.f32 %v2336_v25, %v624_v59 }
 0x246   : > { %v2547_v10 = vmul.f32 %v4489_v56, %v2506_v23  ;;  %v2509_v0 = vadd.f32 %v3381_v17, %v2474_v49 }
 0x247   : > { %v2548_v31 = vmul.f32 %v4491_v22, %v2507_v27  ;;  %v2510_v32 = vadd.f32 %v3382_v30, %v2474_v49 }
 0x248   : > { %v2550_v35 = vmul.f32 %v4489_v56, %v2509_v0 }
 0x249   : > { %v2551_v41 = vmul.f32 %v4491_v22, %v2510_v32  ;;  %v2340_v44 = vpop.f32.mrb[4].mxu0  ;;  %v3373_v45 = vpop.f32.mrb[16].mxu1  ;;  %v2571_v46 = vadd.f32 %v2548_v31, %v2547_v10 }
 0x24a   : > { %v3383_v47 = vadd.f32 %v2340_v44, %v628_v58  ;;  %v2514_v1 = vadd.f32 %v3373_v45, %v2479_v7  ;;  %v2342_v3 = vpop.f32.mrb[5].mxu0  ;;  %v2403_v51 = vpop.f32.mrb[17].mxu1  ;;  %v3597_v15 = vpack.i.bf16 %v2550_v35, %v2547_v10 }
 0x24b   : > { %v3384_v19 = vadd.f32 %v2342_v3, %v630_v14  ;;  %v2508_v52 = vadd.f32 %v2469_v61, %v2403_v51  ;;  %v2344_v6 = vpop.f32.mrb[6].mxu0  ;;  %v3374_v53 = vpop.f32.mrb[18].mxu1  ;;  %v2577_v24 = vadd.f32 %v2551_v41, %v2550_v35 }
 0x24c   : > { %v2512_v33 = vadd.f32 %v3383_v47, %v2479_v7  ;;  %v4504_v54 = vmul.f32 %v4496_v37, %v2514_v1  ;;  %v3385_v29 = vadd.f32 %v2344_v6, %v632_v11  ;;  %v2517_v9 = vadd.f32 %v3374_v53, %v2484_v16  ;;  %v2346_v40 = vpop.f32.mrb[7].mxu0  ;;  %v2406_v55 = vpop.f32.mrb[19].mxu1  ;;  %3598 = vrot.lane.b32.xlu1 %v3597_v15, %s3721_s9 }
 0x24d   : > { %v2513_v48 = vadd.f32 %v3384_v19, %v2479_v7  ;;  %v2549_v59 = vmul.f32 %v4496_v37, %v2508_v52  ;;  %v3386_v58 = vadd.f32 %v2346_v40, %v4468_v57  ;;  %v2511_v14 = vadd.f32 %v2474_v49, %v2406_v55  ;;  %v4523_v49 = vpop.permute.xlu0 %2503 }
 0x24e   : > { %v4510_v43 = vmul.f32 %v4489_v56, %v2512_v33  ;;  %v2515_v8 = vadd.f32 %v3385_v29, %v2484_v16  ;;  %v4513_v61 = vmul.f32 %v4496_v37, %v2517_v9  ;;  %v2583_v7 = vsel %vm2572_vm9, %v4504_v54, 0.0 }
 0x24f   : > { %v4516_v11 = vmul.f32 %v4491_v22, %v2513_v48  ;;  %v2573_v62 = vsel %vm2572_vm9, %v2549_v59, 0.0  ;;  %v3592_v63 = vpack.i.bf16 %v2549_v59, %v2548_v31  ;;  %v2516_v5 = vadd.f32 %v3386_v58, %v2484_v16 }
 0x250   : > { %v4520_v13 = vmul.f32 %v4489_v56, %v2515_v8  ;;  %v2552_v57 = vmul.f32 %v4496_v37, %v2511_v14  ;;  %v4527_v18 = vadd.f32 %v2573_v62, %v2571_v46  ;;  %v2588_v16 = vsel %vm2572_vm9, %v4513_v61, 0.0 }
 0x251   : > { %v3607_v20 = vpack.i.bf16 %v4504_v54, %v4516_v11  ;;  %v4536_v2 = vmul.f32 %v4491_v22, %v2516_v5  ;;  %v3377_v23 = vpop.f32.mrb[20].mxu1  ;;  %3593 = vrot.lane.b32.xlu0 %v3592_v63, %s3721_s9  ;;  %v2350_v17 = vpop.f32.mrb[8].mxu0  ;;  %v2582_v25 = vadd.f32 %v4516_v11, %v4510_v43 }
 0x252   : > { %v3612_v26 = vpack.i.bf16 %v4520_v13, %v4510_v43  ;;  %v3602_v27 = vpack.i.bf16 %v2552_v57, %v2551_v41  ;;  %v2578_v30 = vsel %vm2572_vm9, %v2552_v57, 0.0  ;;  %v3387_v10 = vadd.f32 %v2350_v17, %v4470_v60  ;;  %v2352_v0 = vpop.f32.mrb[9].mxu0  ;;  %v2419_v31 = vpop.f32.mrb[21].mxu1 }
 0x253   : > { %v3617_v32 = vpack.i.bf16 %v4513_v61, %v4536_v2  ;;  %v2526_v35 = vadd.f32 %v3377_v23, %v4525_v4  ;;  %v3388_v44 = vadd.f32 %v2352_v0, %v4472_v21  ;;  %v2520_v45 = vadd.f32 %v4500_v39, %v2419_v31  ;;  %v2354_v46 = vpop.f32.mrb[10].mxu0  ;;  %v3378_v47 = vpop.f32.mrb[22].mxu1 }
 0x254   : > { %v2518_v1 = vadd.f32 %v3387_v10, %v4500_v39  ;;  %v3389_v41 = vadd.f32 %v2354_v46, %v4474_v34  ;;  %v2529_v3 = vadd.f32 %v3378_v47, %v4523_v49  ;;  %3603 = vrot.lane.b32.xlu1 %v3602_v27, %s3721_s9  ;;  %v2356_v60 = vpop.f32.mrb[11].mxu0  ;;  %v2422_v51 = vpop.f32.mrb[23].mxu1  ;;  %v2579_v15 = vadd.f32 %v2578_v30, %v2577_v24 }
 0x255   : > { %v4555_v19 = vmul.f32 %v4496_v37, %v2526_v35  ;;  %v2519_v21 = vadd.f32 %v3388_v44, %v4500_v39  ;;  %v2561_v52 = vmul.f32 %v4496_v37, %v2520_v45  ;;  %v3390_v6 = vadd.f32 %v2356_v60, %v4476_v28 }
 0x256   : > { %v4561_v53 = vmul.f32 %v4489_v56, %v2518_v1  ;;  %v2521_v34 = vadd.f32 %v3389_v41, %v4498_v38  ;;  %v4565_v33 = vmul.f32 %v4496_v37, %v2529_v3  ;;  %v2523_v29 = vadd.f32 %v4498_v38, %v2422_v51 }
 0x257   : > { %v2560_v24 = vmul.f32 %v4491_v22, %v2519_v21  ;;  %v2593_v9 = vsel %vm2572_vm9, %v2561_v52, 0.0  ;;  %v2522_v39 = vadd.f32 %v3390_v6, %v4498_v38  ;;  %v2584_v40 = vadd.f32 %v2583_v7, %v2582_v25 }
 0x258   : > { %v4572_v55 = vmul.f32 %v4489_v56, %v2521_v34  ;;  %v2608_v28 = vsel %vm2572_vm9, %v4565_v33, 0.0  ;;  %v2564_v48 = vmul.f32 %v4496_v37, %v2523_v29  ;;  %v2587_v59 = vadd.f32 %v4536_v2, %v4520_v13 }
 0x259   : > { %v3622_v58 = vpack.i.bf16 %v2561_v52, %v2560_v24  ;;  %v2563_v14 = vmul.f32 %v4491_v22, %v2522_v39  ;;  %v2360_v8 = vpop.f32.mrb[12].mxu0  ;;  %v2592_v62 = vadd.f32 %v2560_v24, %v4561_v53  ;;  %v2603_v38 = vsel %vm2572_vm9, %v4555_v19, 0.0 }
 0x25a   : > { %v3642_v63 = vpack.i.bf16 %v4572_v55, %v4561_v53  ;;  %v2598_v5 = vsel %vm2572_vm9, %v2564_v48, 0.0  ;;  %v3391_v57 = vadd.f32 %v2360_v8, %v4478_v12  ;;  %v2362_v37 = vpop.f32.mrb[13].mxu0  ;;  %v2589_v7 = vadd.f32 %v2588_v16, %v2587_v59 }
 0x25b   : > { %v3627_v23 = vpack.i.bf16 %v2564_v48, %v2563_v14  ;;  %v3392_v17 = vadd.f32 %v2362_v37, %v4480_v42  ;;  %v2364_v25 = vpop.f32.mrb[14].mxu0  ;;  %v2594_v27 = vadd.f32 %v2593_v9, %v2592_v62  ;;  %v2597_v30 = vadd.f32 %v2563_v14, %v4572_v55 }
 0x25c   : > { %v2524_v10 = vadd.f32 %v3391_v57, %v4525_v4  ;;  %v3393_v0 = vadd.f32 %v2364_v25, %v4482_v36  ;;  %v2366_v31 = vpop.f32.mrb[15].mxu0 }
 0x25d   : > { %v2525_v35 = vadd.f32 %v3392_v17, %v4525_v4  ;;  %v3394_v44 = vadd.f32 %v2366_v31, %v4484_v50  ;;  %v2599_v45 = vadd.f32 %v2598_v5, %v2597_v30 }
 0x25e   : > { %v4594_v12 = vmul.f32 %v4489_v56, %v2524_v10  ;;  %v2527_v16 = vadd.f32 %v3393_v0, %v4523_v49 }
 0x25f   : > { %v2566_v42 = vmul.f32 %v4491_v22, %v2525_v35  ;;  %v2528_v46 = vadd.f32 %v3394_v44, %v4523_v49 }
 0x260   : > { %v4600_v47 = vmul.f32 %v4489_v56, %v2527_v16 }
 0x261   : > { %v3632_v36 = vpack.i.bf16 %v4555_v19, %v2566_v42  ;;  %v2569_v1 = vmul.f32 %v4491_v22, %v2528_v46  ;;  %v2602_v4 = vadd.f32 %v2566_v42, %v4594_v12 }
 0x262   : > { %v3647_v50 = vpack.i.bf16 %v4600_v47, %v4594_v12 }
 0x263   : > { %v3637_v41 = vpack.i.bf16 %v4565_v33, %v2569_v1  ;;  %v4608_v3 = vadd.f32 %v2603_v38, %v2602_v4  ;;  %v2607_v60 = vadd.f32 %v2569_v1, %v4600_v47 }
 0x265   : > { %v4611_v51 = vadd.f32 %v2608_v28, %v2607_v60 }
 0x270   : > { %2580 = vadd.xlane.f32.xlu0 %v2579_v15 }
 0x278   : > { %2575 = vadd.xlane.f32.xlu1 %v4527_v18 }
 0x286   : > { %3613 = vrot.lane.b32.xlu0 %v3612_v26, %s3721_s9 }
 0x289   : > { %3608 = vrot.lane.b32.xlu1 %v3607_v20, %s3721_s9 }
 0x28a   : > { %3618 = vrot.lane.b32.xlu0 %v3617_v32, %s3721_s9 }
 0x2a9   : > { %2585 = vadd.xlane.f32.xlu0 %v2584_v40 }
 0x2ad   : > { %2590 = vadd.xlane.f32.xlu1 %v2589_v7 }
 0x2be   : > { %3623 = vrot.lane.b32.xlu1 %v3622_v58, %s3721_s9  ;;  %v3599_v56 = vpop.permute.xlu1 %3598 }
 0x2bf   : > { %3628 = vrot.lane.b32.xlu0 %v3627_v23, %s3721_s9  ;;  %v3600_v22 = vunpack.i.l.bf16 %v3599_v56  ;;  %v3601_v11 = vunpack.i.h.bf16 %v3599_v56 }
 0x2c1   : > { %v2734_v49 = vsel %vm2693_vm10, 0.0, %v3600_v22  ;;  %v2735_v21 = vsel %vm2693_vm10, 0.0, %v3601_v11 }
 0x2c3   : > { %v3594_v43 = vpop.permute.xlu0 %3593 }
 0x2c4   : > { %v3596_v13 = vunpack.i.h.bf16 %v3594_v43  ;;  %v3595_v54 = vunpack.i.l.bf16 %v3594_v43 }
 0x2c6   : > { %v2694_v61 = vsel %vm2693_vm10, %v3600_v22, %v3595_v54  ;;  %v2695_v18 = vsel %vm2693_vm10, %v3595_v54, %v3596_v13  ;;  %v3604_v20 = vpop.permute.xlu1 %3603 }
 0x2c7   : > { %v2743_v2 = vsel %vm2742_vm11, %v2695_v18, 0.0  ;;  %v3147_v26 = vpack.c.bf16 %v2694_v61, %v2734_v49  ;;  %v3606_v32 = vunpack.i.h.bf16 %v3604_v20  ;;  %v3605_v15 = vunpack.i.l.bf16 %v3604_v20 }
 0x2c8   : > { %v3148_v19 = vpack.c.bf16 %v2743_v2, %v2743_v2 }
 0x2c9   : > { %2831 = vst [vmem:[%s4634_s12] sm:$0xff] %v3147_v26  ;;  %v2696_v52 = vsel %vm2693_vm10, %v3601_v11, %v3605_v15  ;;  %v2697_v6 = vsel %vm2693_vm10, %v3605_v15, %v3606_v32 }
 0x2ca   : > { %2832 = vst [vmem:[%s4634_s12 + $0x8] sm:$0xf] %v3148_v19  ;;  %v2744_v34 = vsel %vm2742_vm11, %v2697_v6, 0.0  ;;  %v3149_v33 = vpack.c.bf16 %v2696_v52, %v2735_v21 }
 0x2cb   : > { %v3150_v29 = vpack.c.bf16 %v2744_v34, %v2744_v34 }
 0x2cc   : > { %2833 = vst [vmem:[%s4634_s12 + $0xc] sm:$0xff] %v3149_v33 }
 0x2cd   : > { %2834 = vst [vmem:[%s4634_s12 + $0x14] sm:$0xf] %v3150_v29 }
 0x2de   : > { %2595 = vadd.xlane.f32.xlu0 %v2594_v27 }
 0x2e2   : > { %2600 = vadd.xlane.f32.xlu1 %v2599_v45 }
 0x2f3   : > { %3633 = vrot.lane.b32.xlu1 %v3632_v36, %s3721_s9 }
 0x2f4   : > { %3638 = vrot.lane.b32.xlu0 %v3637_v41, %s3721_s9 }
 0x2fd   : > { %v2581_v24 = vpop.xlane.xlu0 %2580 }
 0x2fe   : > { %2614 = vst.msk [vmem:[%s4653_s15 + $0x8] sm:$0xff] %vm2612_vm12, %v2581_v24 }
 0x301   : > { %v3614_v9 = vpop.permute.xlu0 %3613 }
 0x302   : > { %v3616_v39 = vunpack.i.h.bf16 %v3614_v9  ;;  %v3615_v14 = vunpack.i.l.bf16 %v3614_v9 }
 0x304   : > { %v2737_v58 = vsel %vm2693_vm10, 0.0, %v3616_v39  ;;  %v2736_v17 = vsel %vm2693_vm10, 0.0, %v3615_v14 }
 0x305   : > { %v2576_v40 = vpop.xlane.xlu1 %2575  ;;  %v3619_v28 = vpop.permute.xlu0 %3618 }
 0x306   : > { %2613 = vst.msk [vmem:[%s4653_s15] sm:$0xff] %vm2612_vm12, %v2576_v40  ;;  %v3621_v48 = vunpack.i.h.bf16 %v3619_v28  ;;  %v3620_v59 = vunpack.i.l.bf16 %v3619_v28 }
 0x308   : > { %v2700_v8 = vsel %vm2693_vm10, %v3616_v39, %v3620_v59  ;;  %v2701_v62 = vsel %vm2693_vm10, %v3620_v59, %v3621_v48 }
 0x309   : > { %v2746_v38 = vsel %vm2742_vm11, %v2701_v62, 0.0  ;;  %v3153_v5 = vpack.c.bf16 %v2700_v8, %v2737_v58  ;;  %v3609_v57 = vpop.permute.xlu1 %3608 }
 0x30a   : > { %v3154_v37 = vpack.c.bf16 %v2746_v38, %v2746_v38  ;;  %v3611_v7 = vunpack.i.h.bf16 %v3609_v57  ;;  %v3610_v23 = vunpack.i.l.bf16 %v3609_v57 }
 0x30b   : > { %2837 = vst [vmem:[%s4634_s12 + $0x24] sm:$0xff] %v3153_v5 }
 0x30c   : > { %2838 = vst [vmem:[%s4634_s12 + $0x2c] sm:$0xf] %v3154_v37  ;;  %v2698_v25 = vsel %vm2693_vm10, %v3615_v14, %v3610_v23  ;;  %v2699_v27 = vsel %vm2693_vm10, %v3610_v23, %v3611_v7 }
 0x30d   : > { %v2745_v30 = vsel %vm2742_vm11, %v2699_v27, 0.0  ;;  %v3151_v10 = vpack.c.bf16 %v2698_v25, %v2736_v17 }
 0x30e   : > { %v3152_v0 = vpack.c.bf16 %v2745_v30, %v2745_v30 }
 0x30f   : > { %2835 = vst [vmem:[%s4634_s12 + $0x18] sm:$0xff] %v3151_v10 }
 0x310   : > { %2836 = vst [vmem:[%s4634_s12 + $0x20] sm:$0xf] %v3152_v0 }
 0x313   : > { %2605 = vadd.xlane.f32.xlu0 %v4608_v3 }
 0x317   : > { %2610 = vadd.xlane.f32.xlu1 %v4611_v51 }
 0x328   : > { %3643 = vrot.lane.b32.xlu1 %v3642_v63, %s3721_s9 }
 0x329   : > { %3648 = vrot.lane.b32.xlu0 %v3647_v50, %s3721_s9 }
 0x336   : > { %v2586_v31 = vpop.xlane.xlu0 %2585 }
 0x337   : > { %2615 = vst.msk [vmem:[%s4653_s15 + $0x10] sm:$0xff] %vm2612_vm12, %v2586_v31 }
 0x33a   : > { %v2591_v35 = vpop.xlane.xlu1 %2590  ;;  %v3629_v44 = vpop.permute.xlu0 %3628 }
 0x33b   : > { %2616 = vst.msk [vmem:[%s4653_s15 + $0x18] sm:$0xff] %vm2612_vm12, %v2591_v35  ;;  %v3631_v45 = vunpack.i.h.bf16 %v3629_v44  ;;  %v3630_v16 = vunpack.i.l.bf16 %v3629_v44 }
 0x33d   : > { %v2705_v53 = vsel %vm2693_vm10, %v3630_v16, %v3631_v45 }
 0x33e   : > { %v2748_v55 = vsel %vm2742_vm11, %v2705_v53, 0.0  ;;  %v3624_v63 = vpop.permute.xlu1 %3623 }
 0x33f   : > { %v3158_v42 = vpack.c.bf16 %v2748_v55, %v2748_v55  ;;  %v3626_v12 = vunpack.i.h.bf16 %v3624_v63  ;;  %v3625_v46 = vunpack.i.l.bf16 %v3624_v63 }
 0x341   : > { %2842 = vst [vmem:[%s4634_s12 + $0x44] sm:$0xf] %v3158_v42  ;;  %v2703_v47 = vsel %vm2693_vm10, %v3625_v46, %v3626_v12 }
 0x342   : > { %v2747_v36 = vsel %vm2742_vm11, %v2703_v47, 0.0 }
 0x343   : > { %v3156_v1 = vpack.c.bf16 %v2747_v36, %v2747_v36 }
 0x345   : > { %2840 = vst [vmem:[%s4634_s12 + $0x38] sm:$0xf] %v3156_v1 }
 0x36b   : > { %v2596_v4 = vpop.xlane.xlu0 %2595 }
 0x36c   : > { %2617 = vst.msk [vmem:[%s4653_s15 + $0x20] sm:$0xff] %vm2612_vm12, %v2596_v4 }
 0x36f   : > { %v2601_v50 = vpop.xlane.xlu1 %2600  ;;  %v3639_v41 = vpop.permute.xlu0 %3638 }
 0x370   : > { %2618 = vst.msk [vmem:[%s4653_s15 + $0x28] sm:$0xff] %vm2612_vm12, %v2601_v50  ;;  %v3641_v3 = vunpack.i.h.bf16 %v3639_v41  ;;  %v3640_v60 = vunpack.i.l.bf16 %v3639_v41 }
 0x372   : > { %v2709_v51 = vsel %vm2693_vm10, %v3640_v60, %v3641_v3 }
 0x373   : > { %v2750_v56 = vsel %vm2742_vm11, %v2709_v51, 0.0  ;;  %v3634_v22 = vpop.permute.xlu1 %3633 }
 0x374   : > { %v3162_v43 = vpack.c.bf16 %v2750_v56, %v2750_v56  ;;  %v3636_v13 = vunpack.i.h.bf16 %v3634_v22  ;;  %v3635_v54 = vunpack.i.l.bf16 %v3634_v22 }
 0x376   : > { %2846 = vst [vmem:[%s4634_s12 + $0x5c] sm:$0xf] %v3162_v43  ;;  %v2707_v11 = vsel %vm2693_vm10, %v3635_v54, %v3636_v13 }
 0x377   : > { %v2749_v49 = vsel %vm2742_vm11, %v2707_v11, 0.0 }
 0x378   : > { %v3160_v61 = vpack.c.bf16 %v2749_v49, %v2749_v49 }
 0x37a   : > { %2844 = vst [vmem:[%s4634_s12 + $0x50] sm:$0xf] %v3160_v61 }
 0x3a0   : > { %v2606_v18 = vpop.xlane.xlu0 %2605 }
 0x3a1   : > { %2619 = vst.msk [vmem:[%s4653_s15 + $0x30] sm:$0xff] %vm2612_vm12, %v2606_v18 }
 0x3a4   : > { %v2611_v20 = vpop.xlane.xlu1 %2610  ;;  %v3649_v2 = vpop.permute.xlu0 %3648 }
 0x3a5   : > { %2620 = vst.msk [vmem:[%s4653_s15 + $0x38] sm:$0xff] %vm2612_vm12, %v2611_v20  ;;  %v3651_v26 = vunpack.i.h.bf16 %v3649_v2  ;;  %v3650_v32 = vunpack.i.l.bf16 %v3649_v2 }
 0x3a7   : > { %v2708_v15 = vsel %vm2693_vm10, %v3651_v26, %v3640_v60  ;;  %v2741_v19 = vsel %vm2693_vm10, 0.0, %v3651_v26  ;;  %v2706_v21 = vsel %vm2693_vm10, %v3650_v32, %v3635_v54  ;;  %v2740_v52 = vsel %vm2693_vm10, 0.0, %v3650_v32 }
 0x3a8   : > { %v3161_v6 = vpack.c.bf16 %v2708_v15, %v2741_v19  ;;  %v3159_v34 = vpack.c.bf16 %v2706_v21, %v2740_v52  ;;  %v3644_v33 = vpop.permute.xlu1 %3643 }
 0x3a9   : > { %v3646_v29 = vunpack.i.h.bf16 %v3644_v33  ;;  %v3645_v24 = vunpack.i.l.bf16 %v3644_v33 }
 0x3aa   : > { %2845 = vst [vmem:[%s4634_s12 + $0x54] sm:$0xff] %v3161_v6  ;;  %2843 = vst [vmem:[%s4634_s12 + $0x48] sm:$0xff] %v3159_v34 }
 0x3ab   : > { %v2704_v9 = vsel %vm2693_vm10, %v3646_v29, %v3630_v16  ;;  %v2739_v39 = vsel %vm2693_vm10, 0.0, %v3646_v29  ;;  %v2702_v40 = vsel %vm2693_vm10, %v3645_v24, %v3625_v46  ;;  %v2738_v28 = vsel %vm2693_vm10, 0.0, %v3645_v24 }
 0x3ac   : > { %v3157_v48 = vpack.c.bf16 %v2704_v9, %v2739_v39  ;;  %v3155_v59 = vpack.c.bf16 %v2702_v40, %v2738_v28 }
 0x3ae   : > { %2841 = vst [vmem:[%s4634_s12 + $0x3c] sm:$0xff] %v3157_v48  ;;  %2839 = vst [vmem:[%s4634_s12 + $0x30] sm:$0xff] %v3155_v59 }
 0x3af PF: > { %s16_s18 = sadd.s32 1, %s3710_s18  }
 0x3b0   : > { %p13_p4 = scmp.ge.s32.totalorder %s16_s18, 4  }
 0x3b2   :  { %15 = sbr.rel (!%p13_p4) target bundleno = 1 (0x1), region = 86 }

// kernel: block_forward.3
= control target key start
LH: loop header
LB: loop body
LE: loop exit
PB: predicated region body
PF: predicated region fallthrough
CT: control target
= control target key end

     0   :  { %s3645_s15 = smov 0   ;;  %s4566_s0 = inlined_call_operand.vmem [shape: bf16[9,64,64], index: 0, kind: input, shape index: {}]   ;;  %s4567_s1 = inlined_call_operand.vmem [shape: f32[64,1], index: 1, kind: input, shape index: {}]   ;;  %s4568_s2 = inlined_call_operand.vmem [shape: f32[1,288], index: 2, kind: input, shape index: {}]   ;;  %s4569_s3 = inlined_call_operand.vmem [shape: bf16[2,64,384], index: 3, kind: input, shape index: {}]   ;;  %s4570_s4 = inlined_call_operand.vmem [shape: bf16[2,64,384], index: 4, kind: output, shape index: {}]  }
   0x1 LB: > { %s2884_s16 = sadd.s32 4294967295, %s3608_s15   ;;  %p2888_p0 = scmp.ge.s32.totalorder %s3608_s15, 1  ;;  %s3608_s15 = sphi %s3645_s15, %s14_s15  }
   0x2   : > { %p162_p1 = scmp.lt.s32.totalorder %s3608_s15, 3 }
   0x4   : > { %p163_p2 = pnand %p2888_p0, %p162_p1 }
   0x5   : > { %p188_p3 = scmp.lt.s32.totalorder (!%p163_p2), %s2884_s16, 1  ;;  %s3610_s21 = smov (!%p163_p2), 126   ;;  %v3612_v28 = vmov (!%p163_p2), 0   ;;  %vm735_vm0 = vcmask (!%p163_p2), 1031168   ;;  %vm328_vm1 = vcmask (!%p163_p2), 1039360   ;;  %v3818_v49 = vld [vmem:[%s4566_s0 + $0x40] sm:$0xff] (!%p163_p2)  }
   0x6   : > { %166 = sbr.rel (%p163_p2) target bundleno = 759 (0x2f7), region = 36  ;;  %s3611_s22 = smov (!%p163_p2), 127   ;;  %800 = vmatprep.mubr.bf16.mxu0 (!%p163_p2), %v3612_v28  ;;  %394 = vmatprep.mubr.bf16.mxu1 (!%p163_p2), %v3612_v28  ;;  %vm349_vm2 = vcmask (!%p163_p2), 523264   ;;  %v3836_v56 = vld [vmem:[%s4566_s0 + $0x48] sm:$0xff] (!%p163_p2)   ;;  %vm983_vm3 = vcmask (!%p163_p2), 900096   ;;  %vm1231_vm4 = vcmask (!%p163_p2), 891904  }
   0x7   : > { %3537 = vset.pattern.permute.xlu1 (!%p163_p2), %v3612_v28  ;;  %3536 = vset.pattern.permute.xlu0 (!%p163_p2), %v3612_v28  ;;  %s3613_s23 = smov (!%p163_p2), 110   ;;  %s3614_s24 = smov (!%p163_p2), 109   ;;  %vm1479_vm5 = vcmask (!%p163_p2), 883712   ;;  %vm1727_vm6 = vcmask (!%p163_p2), 752640   ;;  %vm1975_vm7 = vcmask (!%p163_p2), 744448   ;;  %vm2223_vm8 = vcmask (!%p163_p2), 736256  }
   0x8   : > { %s3615_s25 = smov (!%p163_p2), 108   ;;  %s3616_s26 = smov (!%p163_p2), 92   ;;  %vm2627_vm9 = vcmask (!%p163_p2), 154624   ;;  %vm2676_vm10 = vcmask (!%p163_p2), 416768  }
   0x9   : > { %s3617_s5 = smov (!%p163_p2), 91   ;;  %s3618_s14 = smov (!%p163_p2), 90  }
   0xd   : > { %s4572_s16 = smov (!%p188_p3, %s2884_s16), 1 }
   0xe   : > { %s3517_s17 = smul.u32 96, %s4572_s16 }
  0x10   : > { %s3661_s20 = scalar_lea.vmem %s4569_s3, %s3517_s17  ;;  %s4496_s8 = scalar_lea.vmem %s4570_s4, %s3517_s17 }
  0x11   : > { %v199_v0 = vld [vmem:[%s3661_s20] sm:$0xff]  ;;  %v201_v1 = vld [vmem:[%s3661_s20 + $0xc] sm:$0xff]  ;;  %v200_v2 = vld [vmem:[%s3661_s20 + $0x8] sm:$0xf] }
  0x12   : > { %v3666_v3 = vcombine.high %v199_v0, %v201_v1  ;;  %v3668_v4 = vcombine.low %v199_v0, %v201_v1  ;;  %v202_v5 = vld [vmem:[%s3661_s20 + $0x14] sm:$0xf]  ;;  %v203_v6 = vld [vmem:[%s3661_s20 + $0x18] sm:$0xff]  ;;  %v205_v7 = vld [vmem:[%s3661_s20 + $0x24] sm:$0xff] }
  0x13   : > { %v3677_v8 = vcombine.low %v200_v2, %v202_v5  ;;  %v3679_v9 = vcombine.high %v203_v6, %v205_v7  ;;  %v204_v10 = vld [vmem:[%s3661_s20 + $0x20] sm:$0xf]  ;;  %v206_v11 = vld [vmem:[%s3661_s20 + $0x2c] sm:$0xf]  ;;  %v207_v12 = vld [vmem:[%s3661_s20 + $0x30] sm:$0xff]  ;;  %v3693_v17 = vcombine.low %v203_v6, %v205_v7 }
  0x14   : > { %713 = vrot.lane.b32.xlu0 %v3666_v3, %s3610_s21  ;;  %711 = vrot.lane.b32.xlu1 %v3668_v4, %s3610_s21  ;;  %v209_v13 = vld [vmem:[%s3661_s20 + $0x3c] sm:$0xff]  ;;  %v208_v14 = vld [vmem:[%s3661_s20 + $0x38] sm:$0xf]  ;;  %v3691_v16 = vcombine.low %v204_v10, %v206_v11 }
  0x15   : > { %v210_v15 = vld [vmem:[%s3661_s20 + $0x44] sm:$0xf]  ;;  %v211_v18 = vld [vmem:[%s3661_s20 + $0x48] sm:$0xff]  ;;  %v213_v19 = vld [vmem:[%s3661_s20 + $0x54] sm:$0xff]  ;;  %v3701_v20 = vcombine.high %v207_v12, %v209_v13  ;;  %v3711_v24 = vcombine.low %v207_v12, %v209_v13 }
  0x16   : > { %v3703_v21 = vcombine.low %v208_v14, %v210_v15  ;;  %v212_v22 = vld [vmem:[%s3661_s20 + $0x50] sm:$0xf]  ;;  %v214_v23 = vld [vmem:[%s3661_s20 + $0x5c] sm:$0xf]  ;;  %v3713_v25 = vcombine.high %v211_v18, %v213_v19  ;;  %v3721_v27 = vcombine.low %v211_v18, %v213_v19  ;;  %v3874_v12 = vld [vmem:[%s4566_s0 + $0x20] sm:$0xff]  }
  0x17   : > { %v3719_v26 = vcombine.low %v212_v22, %v214_v23  ;;  %v3855_v0 = vld [vmem:[%s4566_s0 + $0x50] sm:$0xff]   ;;  %v3881_v15 = vld [vmem:[%s4566_s0 + $0x58] sm:$0xff]  }
  0x18   : > { %715 = vrot.lane.b32.xlu0 %v3677_v8, %s3610_s21  ;;  %719 = vrot.lane.b32.xlu1 %v3679_v9, %s3610_s21 }
  0x1c   : > { %721 = vrot.lane.b32.xlu0 %v3691_v16, %s3610_s21  ;;  %717 = vrot.lane.b32.xlu1 %v3693_v17, %s3610_s21 }
  0x20   : > { %725 = vrot.lane.b32.xlu0 %v3701_v20, %s3610_s21  ;;  %727 = vrot.lane.b32.xlu1 %v3703_v21, %s3610_s21 }
  0x24   : > { %723 = vrot.lane.b32.xlu0 %v3711_v24, %s3610_s21  ;;  %731 = vrot.lane.b32.xlu1 %v3713_v25, %s3610_s21 }
  0x28   : > { %733 = vrot.lane.b32.xlu0 %v3719_v26, %s3610_s21  ;;  %729 = vrot.lane.b32.xlu1 %v3721_v27, %s3610_s21 }
  0x2c   : > { %306 = vrot.lane.b32.xlu0 %v3666_v3, %s3611_s22  ;;  %308 = vrot.lane.b32.xlu1 %v3677_v8, %s3611_s22 }
  0x30   : > { %304 = vrot.lane.b32.xlu0 %v3668_v4, %s3611_s22  ;;  %312 = vrot.lane.b32.xlu1 %v3679_v9, %s3611_s22 }
  0x34   : > { %314 = vrot.lane.b32.xlu0 %v3691_v16, %s3611_s22  ;;  %310 = vrot.lane.b32.xlu1 %v3693_v17, %s3611_s22 }
  0x38   : > { %318 = vrot.lane.b32.xlu0 %v3701_v20, %s3611_s22  ;;  %320 = vrot.lane.b32.xlu1 %v3703_v21, %s3611_s22 }
  0x3c   : > { %316 = vrot.lane.b32.xlu0 %v3711_v24, %s3611_s22  ;;  %324 = vrot.lane.b32.xlu1 %v3713_v25, %s3611_s22 }
  0x40   : > { %326 = vrot.lane.b32.xlu0 %v3719_v26, %s3611_s22  ;;  %322 = vrot.lane.b32.xlu1 %v3721_v27, %s3611_s22 }
  0x44   : > { %961 = vrot.lane.b32.xlu0 %v3666_v3, %s3613_s23  ;;  %963 = vrot.lane.b32.xlu1 %v3677_v8, %s3613_s23 }
  0x48   : > { %959 = vrot.lane.b32.xlu0 %v3668_v4, %s3613_s23  ;;  %967 = vrot.lane.b32.xlu1 %v3679_v9, %s3613_s23 }
  0x4c   : > { %969 = vrot.lane.b32.xlu0 %v3691_v16, %s3613_s23  ;;  %965 = vrot.lane.b32.xlu1 %v3693_v17, %s3613_s23 }
  0x50   : > { %973 = vrot.lane.b32.xlu0 %v3701_v20, %s3613_s23  ;;  %975 = vrot.lane.b32.xlu1 %v3703_v21, %s3613_s23 }
  0x54   : > { %971 = vrot.lane.b32.xlu0 %v3711_v24, %s3613_s23  ;;  %979 = vrot.lane.b32.xlu1 %v3713_v25, %s3613_s23 }
  0x58   : > { %981 = vrot.lane.b32.xlu0 %v3719_v26, %s3613_s23  ;;  %977 = vrot.lane.b32.xlu1 %v3721_v27, %s3613_s23 }
  0x5c   : > { %1209 = vrot.lane.b32.xlu0 %v3666_v3, %s3614_s24  ;;  %1211 = vrot.lane.b32.xlu1 %v3677_v8, %s3614_s24 }
  0x60   : > { %1207 = vrot.lane.b32.xlu0 %v3668_v4, %s3614_s24  ;;  %1215 = vrot.lane.b32.xlu1 %v3679_v9, %s3614_s24 }
  0x64   : > { %1217 = vrot.lane.b32.xlu0 %v3691_v16, %s3614_s24  ;;  %1213 = vrot.lane.b32.xlu1 %v3693_v17, %s3614_s24 }
  0x68   : > { %1221 = vrot.lane.b32.xlu0 %v3701_v20, %s3614_s24  ;;  %1223 = vrot.lane.b32.xlu1 %v3703_v21, %s3614_s24 }
  0x6c   : > { %1219 = vrot.lane.b32.xlu0 %v3711_v24, %s3614_s24  ;;  %1227 = vrot.lane.b32.xlu1 %v3713_v25, %s3614_s24 }
  0x70   : > { %1229 = vrot.lane.b32.xlu0 %v3719_v26, %s3614_s24  ;;  %1225 = vrot.lane.b32.xlu1 %v3721_v27, %s3614_s24 }
  0x74   : > { %1457 = vrot.lane.b32.xlu0 %v3666_v3, %s3615_s25  ;;  %1459 = vrot.lane.b32.xlu1 %v3677_v8, %s3615_s25 }
  0x78   : > { %1455 = vrot.lane.b32.xlu0 %v3668_v4, %s3615_s25  ;;  %1463 = vrot.lane.b32.xlu1 %v3679_v9, %s3615_s25 }
  0x7c   : > { %1465 = vrot.lane.b32.xlu0 %v3691_v16, %s3615_s25  ;;  %1461 = vrot.lane.b32.xlu1 %v3693_v17, %s3615_s25 }
  0x80   : > { %1469 = vrot.lane.b32.xlu0 %v3701_v20, %s3615_s25  ;;  %1471 = vrot.lane.b32.xlu1 %v3703_v21, %s3615_s25 }
  0x84   : > { %1467 = vrot.lane.b32.xlu0 %v3711_v24, %s3615_s25  ;;  %1475 = vrot.lane.b32.xlu1 %v3713_v25, %s3615_s25 }
  0x86   : > { %v714_v29 = vpop.permute.xlu0 %713  ;;  %v712_v30 = vpop.permute.xlu1 %711 }
  0x87   : > { %v736_v34 = vsel %vm735_vm0, %v712_v30, %v714_v29 }
  0x88   : > { %1477 = vrot.lane.b32.xlu0 %v3719_v26, %s3615_s25  ;;  %1473 = vrot.lane.b32.xlu1 %v3721_v27, %s3615_s25 }
  0x8a   : > { %v3779_v31 = vpop.permute.xlu0 %715  ;;  %v720_v32 = vpop.permute.xlu1 %719 }
  0x8b   : > { %v737_v33 = vsel %vm735_vm0, %v714_v29, %v3779_v31  ;;  %v3901_v29 = vld [vmem:[%s4566_s0 + $0x28] sm:$0xff]  }
  0x8c   : > { %768 = vmatprep.subr.bf16.mxu0 %v737_v33  ;;  %1705 = vrot.lane.b32.xlu0 %v3666_v3, %s3616_s26 }
  0x8d   : > { %769 = vmatpush1.bf16.msra.mxu0 %v736_v34  ;;  %1707 = vrot.lane.b32.xlu1 %v3677_v8, %s3616_s26 }
  0x8e   : > { %v3788_v35 = vpop.permute.xlu0 %721  ;;  %v718_v36 = vpop.permute.xlu1 %717 }
  0x8f   : > { %v739_v37 = vsel %vm735_vm0, %v720_v32, %v3788_v35  ;;  %v738_v38 = vsel %vm735_vm0, %v718_v36, %v720_v32 }
  0x90   : > { %770 = vmatprep.subr.bf16.mxu0 %v739_v37  ;;  %1703 = vrot.lane.b32.xlu0 %v3668_v4, %s3616_s26 }
  0x91   : > { %771 = vmatpush1.bf16.msra.mxu0 %v738_v38  ;;  %1711 = vrot.lane.b32.xlu1 %v3679_v9, %s3616_s26 }
  0x92   : > { %v726_v39 = vpop.permute.xlu0 %725  ;;  %v3797_v40 = vpop.permute.xlu1 %727 }
  0x93   : > { %v741_v41 = vsel %vm735_vm0, %v726_v39, %v3797_v40 }
  0x94   : > { %772 = vmatprep.subr.bf16.mxu0 %v741_v41  ;;  %1713 = vrot.lane.b32.xlu0 %v3691_v16, %s3616_s26 }
  0x95   : > { %1709 = vrot.lane.b32.xlu1 %v3693_v17, %s3616_s26 }
  0x96   : > { %v724_v42 = vpop.permute.xlu0 %723  ;;  %v732_v43 = vpop.permute.xlu1 %731 }
  0x97   : > { %v740_v44 = vsel %vm735_vm0, %v724_v42, %v726_v39  ;;  %v3555_v39 = vld [vmem:[%s4566_s0 + $0x30] sm:$0xff]  }
  0x98   : > { %773 = vmatpush1.bf16.msra.mxu0 %v740_v44  ;;  %1717 = vrot.lane.b32.xlu0 %v3701_v20, %s3616_s26 }
  0x99   : > { %1719 = vrot.lane.b32.xlu1 %v3703_v21, %s3616_s26 }
  0x9a   : > { %v3810_v45 = vpop.permute.xlu0 %733  ;;  %v730_v46 = vpop.permute.xlu1 %729 }
  0x9b   : > { %v743_v47 = vsel %vm735_vm0, %v732_v43, %v3810_v45  ;;  %v742_v48 = vsel %vm735_vm0, %v730_v46, %v732_v43 }
  0x9c   : > { %774 = vmatprep.subr.bf16.mxu0 %v743_v47  ;;  %1715 = vrot.lane.b32.xlu0 %v3711_v24, %s3616_s26 }
  0x9d   : > { %775 = vmatpush1.bf16.msra.mxu0 %v742_v48  ;;  %1723 = vrot.lane.b32.xlu1 %v3713_v25, %s3616_s26  ;;  %v3557_v48 = vld [vmem:[%s4566_s0 + $0x38] sm:$0xff]  }
  0x9e   : > { %v307_v50 = vpop.permute.xlu0 %306  ;;  %v309_v51 = vpop.permute.xlu1 %308 }
  0x9f   : > { %v330_v52 = vsel %vm328_vm1, %v307_v50, %v309_v51 }
  0xa0   : > { %362 = vmatprep.subr.bf16.mxu1 %v330_v52  ;;  %2947 = vmatmul.mubr.msk.bf16.vlgmr.msra.gmra.mrb[0].mxu0 %vm349_vm2, %v3818_v49 }
  0xa1   : > { %810 = vmatprep.mubr.bf16.mxu0 %v3612_v28  ;;  %1725 = vrot.lane.b32.xlu0 %v3719_v26, %s3616_s26 }
  0xa2   : > { %v305_v53 = vpop.permute.xlu0 %304  ;;  %v313_v54 = vpop.permute.xlu1 %312  ;;  %1721 = vrot.lane.b32.xlu1 %v3721_v27, %s3616_s26 }
  0xa3   : > { %v329_v55 = vsel %vm328_vm1, %v305_v53, %v307_v50  ;;  %v3949_v50 = vld [vmem:[%s4566_s0 + $0x60] sm:$0xff]  }
  0xa4   : > { %363 = vmatpush1.bf16.msra.mxu1 %v329_v55 }
  0xa5   : > { %1953 = vrot.lane.b32.xlu0 %v3666_v3, %s3617_s5 }
  0xa6   : > { %v315_v57 = vpop.permute.xlu0 %314  ;;  %v311_v58 = vpop.permute.xlu1 %310  ;;  %1955 = vrot.lane.b32.xlu1 %v3677_v8, %s3617_s5 }
  0xa7   : > { %v332_v59 = vsel %vm328_vm1, %v313_v54, %v315_v57  ;;  %v331_v60 = vsel %vm328_vm1, %v311_v58, %v313_v54  ;;  %v3973_v58 = vld [vmem:[%s4566_s0 + $0x68] sm:$0xff]  }
  0xa8   : > { %364 = vmatprep.subr.bf16.mxu1 %v332_v59  ;;  %2948 = vmatmul.mubr.msk.bf16.gmra.mrb[4].mxu0 %vm349_vm2, %v3836_v56 }
  0xa9   : > { %365 = vmatpush1.bf16.msra.mxu1 %v331_v60  ;;  %820 = vmatprep.mubr.bf16.mxu0 %v3612_v28 }
  0xaa   : > { %v319_v61 = vpop.permute.xlu0 %318  ;;  %v321_v62 = vpop.permute.xlu1 %320  ;;  %1951 = vrot.lane.b32.xlu0 %v3668_v4, %s3617_s5  ;;  %1959 = vrot.lane.b32.xlu1 %v3679_v9, %s3617_s5 }
  0xab   : > { %v334_v63 = vsel %vm328_vm1, %v319_v61, %v321_v62 }
  0xac   : > { %366 = vmatprep.subr.bf16.mxu1 %v334_v63 }
  0xae   : > { %v317_v1 = vpop.permute.xlu0 %316  ;;  %v325_v2 = vpop.permute.xlu1 %324  ;;  %1961 = vrot.lane.b32.xlu0 %v3691_v16, %s3617_s5  ;;  %1957 = vrot.lane.b32.xlu1 %v3693_v17, %s3617_s5 }
  0xaf   : > { %v333_v5 = vsel %vm328_vm1, %v317_v1, %v319_v61 }
  0xb0   : > { %367 = vmatpush1.bf16.msra.mxu1 %v333_v5  ;;  %2949 = vmatmul.mubr.msk.bf16.gmra.mrb[8].mxu0 %vm349_vm2, %v3855_v0  ;;  %v3997_v5 = vld [vmem:[%s4566_s0 + $0x70] sm:$0xff]  }
  0xb1   : > { %830 = vmatprep.mubr.bf16.mxu0 %v3612_v28 }
  0xb2   : > { %v327_v6 = vpop.permute.xlu0 %326  ;;  %v323_v7 = vpop.permute.xlu1 %322  ;;  %1965 = vrot.lane.b32.xlu0 %v3701_v20, %s3617_s5  ;;  %1967 = vrot.lane.b32.xlu1 %v3703_v21, %s3617_s5 }
  0xb3   : > { %v336_v10 = vsel %vm328_vm1, %v325_v2, %v327_v6  ;;  %v335_v11 = vsel %vm328_vm1, %v323_v7, %v325_v2 }
  0xb4   : > { %368 = vmatprep.subr.bf16.mxu1 %v336_v10  ;;  %v4016_v10 = vld [vmem:[%s4566_s0] sm:$0xff]  }
  0xb5   : > { %369 = vmatpush1.bf16.msra.mxu1 %v335_v11 }
  0xb6   : > { %v962_v13 = vpop.permute.xlu0 %961  ;;  %3181 = vmatprep.subr.bf16.mxu1 %v309_v51  ;;  %v3876_v14 = vpop.permute.xlu1 %963  ;;  %1963 = vrot.lane.b32.xlu0 %v3711_v24, %s3617_s5 }
  0xb7   : > { %v985_v18 = vsel %vm983_vm3, %v962_v13, %v3876_v14  ;;  %1971 = vrot.lane.b32.xlu1 %v3713_v25, %s3617_s5 }
  0xb8   : > { %2915 = vmatmul.mubr.msk.bf16.vlgmr.msra.gmra.mrb[0].mxu1 %vm349_vm2, %v3874_v12  ;;  %1016 = vmatprep.subr.bf16.mxu0 %v985_v18 }
  0xb9   : > { %3182 = vmatpush3.bf16.msra.mxu1 %v309_v51  ;;  %404 = vmatprep.mubr.bf16.mxu1 %v3612_v28 }
  0xba   : > { %v960_v19 = vpop.permute.xlu0 %959  ;;  %3183 = vmatprep.subr.bf16.mxu1 %v315_v57  ;;  %v968_v22 = vpop.permute.xlu1 %967  ;;  %2950 = vmatmul.mubr.msk.bf16.gmra.mrb[12].mxu0 %vm349_vm2, %v3881_v15 }
  0xbb   : > { %v984_v23 = vsel %vm983_vm3, %v960_v19, %v962_v13  ;;  %1048 = vmatprep.mubr.bf16.mxu0 %v3612_v28  ;;  %1973 = vrot.lane.b32.xlu0 %v3719_v26, %s3617_s5  ;;  %v3563_v19 = vld [vmem:[%s4566_s0 + $0x8] sm:$0xff]  }
  0xbc   : > { %1017 = vmatpush1.bf16.msra.mxu0 %v984_v23  ;;  %1969 = vrot.lane.b32.xlu1 %v3721_v27, %s3617_s5  ;;  %s3619_s5 = smov 19  }
  0xbd   : > { %3184 = vmatpush3.bf16.msra.mxu1 %v315_v57 }
  0xbe   : > { %v3905_v30 = vpop.permute.xlu0 %969  ;;  %3185 = vmatprep.subr.bf16.mxu1 %v321_v62  ;;  %v966_v32 = vpop.permute.xlu1 %965 }
  0xbf   : > { %v986_v33 = vsel %vm983_vm3, %v966_v32, %v968_v22  ;;  %v987_v34 = vsel %vm983_vm3, %v968_v22, %v3905_v30  ;;  %2201 = vrot.lane.b32.xlu0 %v3666_v3, %s3618_s14  ;;  %v4044_v22 = vld [vmem:[%s4566_s0 + $0x80] sm:$0xff]  }
  0xc0   : > { %2916 = vmatmul.mubr.msk.bf16.gmra.mrb[4].mxu1 %vm349_vm2, %v3901_v29  ;;  %1018 = vmatprep.subr.bf16.mxu0 %v987_v34  ;;  %v3565_v34 = vld [vmem:[%s4566_s0 + $0x10] sm:$0xff]  }
  0xc1   : > { %3186 = vmatpush3.bf16.msra.mxu1 %v321_v62  ;;  %1019 = vmatpush1.bf16.msra.mxu0 %v986_v33 }
  0xc2   : > { %v974_v36 = vpop.permute.xlu0 %973  ;;  %3187 = vmatprep.subr.bf16.mxu1 %v327_v6  ;;  %v3914_v37 = vpop.permute.xlu1 %975  ;;  %414 = vmatprep.mubr.bf16.mxu1 %v3612_v28 }
  0xc3   : > { %v989_v38 = vsel %vm983_vm3, %v974_v36, %v3914_v37  ;;  %2203 = vrot.lane.b32.xlu1 %v3677_v8, %s3618_s14  ;;  %2199 = vrot.lane.b32.xlu0 %v3668_v4, %s3618_s14 }
  0xc4   : > { %1020 = vmatprep.subr.bf16.mxu0 %v989_v38 }
  0xc5   : > { %3188 = vmatpush3.bf16.msra.mxu1 %v327_v6 }
  0xc6   : > { %v972_v41 = vpop.permute.xlu0 %971  ;;  %v980_v42 = vpop.permute.xlu1 %979  ;;  %544 = vmatprep.subr.bf16.mxu1 %v3666_v3 }
  0xc7   : > { %v988_v43 = vsel %vm983_vm3, %v972_v41, %v974_v36  ;;  %2207 = vrot.lane.b32.xlu1 %v3679_v9, %s3618_s14  ;;  %2209 = vrot.lane.b32.xlu0 %v3691_v16, %s3618_s14 }
  0xc8   : > { %2917 = vmatmul.mubr.msk.bf16.gmra.mrb[8].mxu1 %vm349_vm2, %v3555_v39  ;;  %1021 = vmatpush1.bf16.msra.mxu0 %v988_v43 }
  0xc9   : > { %424 = vmatprep.mubr.bf16.mxu1 %v3612_v28 }
  0xca   : > { %v3934_v44 = vpop.permute.xlu0 %981  ;;  %v978_v46 = vpop.permute.xlu1 %977 }
  0xcb   : > { %v990_v47 = vsel %vm983_vm3, %v978_v46, %v980_v42  ;;  %v991_v3 = vsel %vm983_vm3, %v980_v42, %v3934_v44  ;;  %2205 = vrot.lane.b32.xlu1 %v3693_v17, %s3618_s14  ;;  %2213 = vrot.lane.b32.xlu0 %v3701_v20, %s3618_s14 }
  0xcc   : > { %1022 = vmatprep.subr.bf16.mxu0 %v991_v3  ;;  %v4091_v3 = vld [vmem:[%s4566_s0 + $0x90] sm:$0xff]  }
  0xcd   : > { %1023 = vmatpush1.bf16.msra.mxu0 %v990_v47  ;;  %v3567_v47 = vld [vmem:[%s4566_s0 + $0x18] sm:$0xff]  }
  0xce   : > { %v1210_v51 = vpop.permute.xlu0 %1209  ;;  %v3951_v52 = vpop.permute.xlu1 %1211 }
  0xcf   : > { %v1233_v53 = vsel %vm1231_vm4, %v1210_v51, %v3951_v52  ;;  %2215 = vrot.lane.b32.xlu1 %v3703_v21, %s3618_s14  ;;  %2211 = vrot.lane.b32.xlu0 %v3711_v24, %s3618_s14 }
  0xd0   : > { %2918 = vmatmul.mubr.msk.bf16.gmra.mrb[12].mxu1 %vm349_vm2, %v3557_v48  ;;  %2967 = vmatmul.mubr.msk.bf16.vlgmr.msra.gmra.mrb[0].mxu0 %vm349_vm2, %v3949_v50 }
  0xd1   : > { %3189 = vmatprep.mubr.msk.bf16.mxu1 %vm349_vm2, %v3874_v12  ;;  %1058 = vmatprep.mubr.bf16.mxu0 %v3612_v28 }
  0xd2   : > { %v1208_v54 = vpop.permute.xlu0 %1207  ;;  %1264 = vmatprep.subr.bf16.mxu0 %v1233_v53  ;;  %v1216_v55 = vpop.permute.xlu1 %1215 }
  0xd3   : > { %v1232_v57 = vsel %vm1231_vm4, %v1208_v54, %v1210_v51  ;;  %2219 = vrot.lane.b32.xlu1 %v3713_v25, %s3618_s14  ;;  %2221 = vrot.lane.b32.xlu0 %v3719_v26, %s3618_s14 }
  0xd4   : > { %1265 = vmatpush1.bf16.msra.mxu0 %v1232_v57 }
  0xd6   : > { %v3975_v59 = vpop.permute.xlu0 %1217  ;;  %v1214_v60 = vpop.permute.xlu1 %1213 }
  0xd7   : > { %2217 = vrot.lane.b32.xlu1 %v3721_v27, %s3618_s14  ;;  %v1235_v61 = vsel %vm1231_vm4, %v1216_v55, %v3975_v59  ;;  %v1234_v62 = vsel %vm1231_vm4, %v1214_v60, %v1216_v55  ;;  %v4107_v60 = vld [vmem:[%s4566_s0 + $0x98] sm:$0xff]  }
  0xd8   : > { %3190 = vmatmul.mubr.msk.bf16.vlgmr.msra.gmra.mrb[16].mxu1 %vm349_vm2, %v3901_v29  ;;  %2968 = vmatmul.mubr.msk.bf16.gmra.mrb[4].mxu0 %vm349_vm2, %v3973_v58 }
  0xd9   : > { %545 = vmatpush1.bf16.msra.mxu1 %v3668_v4  ;;  %3193 = vmatprep.mubr.msk.bf16.mxu1 %vm349_vm2, %v3555_v39 }
  0xda   : > { %546 = vmatprep.subr.bf16.mxu1 %v3679_v9  ;;  %1068 = vmatprep.mubr.bf16.mxu0 %v3612_v28  ;;  %v1222_v63 = vpop.permute.xlu0 %1221  ;;  %v3990_v1 = vpop.permute.xlu1 %1223 }
  0xdb   : > { %1266 = vmatprep.subr.bf16.mxu0 %v1235_v61  ;;  %v1237_v2 = vsel %vm1231_vm4, %v1222_v63, %v3990_v1 }
  0xdc   : > { %1267 = vmatpush1.bf16.msra.mxu0 %v1234_v62 }
  0xdd   : > { %547 = vmatpush1.bf16.msra.mxu1 %v3693_v17  ;;  %1268 = vmatprep.subr.bf16.mxu0 %v1237_v2  ;;  %v4121_v2 = vld [vmem:[%s4566_s0 + $0xa0] sm:$0xff]  }
  0xde   : > { %548 = vmatprep.subr.bf16.mxu1 %v3701_v20  ;;  %v1220_v4 = vpop.permute.xlu0 %1219  ;;  %v1228_v9 = vpop.permute.xlu1 %1227 }
  0xdf   : > { %v1236_v6 = vsel %vm1231_vm4, %v1220_v4, %v1222_v63 }
  0xe0   : > { %3194 = vmatmul.mubr.msk.bf16.gmra.mrb[20].mxu1 %vm349_vm2, %v3557_v48  ;;  %2969 = vmatmul.mubr.msk.bf16.gmra.mrb[8].mxu0 %vm349_vm2, %v3997_v5 }
  0xe1   : > { %549 = vmatpush1.bf16.msra.mxu1 %v3711_v24  ;;  %576 = vmatprep.mubr.bf16.mxu1 %v3612_v28  ;;  %v4021_v24 = vld [vmem:[%s4566_s0 + $0x78] sm:$0xff]  }
  0xe2   : > { %550 = vmatprep.subr.bf16.mxu1 %v3713_v25  ;;  %1078 = vmatprep.mubr.bf16.mxu0 %v3612_v28  ;;  %v4009_v17 = vpop.permute.xlu0 %1229  ;;  %v1226_v20 = vpop.permute.xlu1 %1225 }
  0xe3   : > { %1269 = vmatpush1.bf16.msra.mxu0 %v1236_v6  ;;  %v1239_v7 = vsel %vm1231_vm4, %v1228_v9, %v4009_v17  ;;  %v1238_v25 = vsel %vm1231_vm4, %v1226_v20, %v1228_v9 }
  0xe4   : > { %1270 = vmatprep.subr.bf16.mxu0 %v1239_v7  ;;  %v4143_v7 = vld [vmem:[%s4566_s0 + $0xa8] sm:$0xff]  }
  0xe5   : > { %551 = vmatpush1.bf16.msra.mxu1 %v3721_v27 }
  0xe6   : > { %3197 = vmatprep.subr.bf16.mxu1 %v3677_v8  ;;  %v1458_v11 = vpop.permute.xlu0 %1457  ;;  %v4026_v12 = vpop.permute.xlu1 %1459 }
  0xe7   : > { %1271 = vmatpush1.bf16.msra.mxu0 %v1238_v25  ;;  %v1481_v13 = vsel %vm1479_vm5, %v1458_v11, %v4026_v12 }
  0xe8   : > { %2927 = vmatmul.mubr.msk.bf16.vlgmr.msra.gmra.mrb[0].mxu1 %vm349_vm2, %v4016_v10  ;;  %2970 = vmatmul.mubr.msk.bf16.gmra.mrb[12].mxu0 %vm349_vm2, %v4021_v24 }
  0xe9   : > { %3198 = vmatpush3.bf16.msra.mxu1 %v3677_v8  ;;  %586 = vmatprep.mubr.bf16.mxu1 %v3612_v28 }
  0xea   : > { %3199 = vmatprep.subr.bf16.mxu1 %v3691_v16  ;;  %1296 = vmatprep.mubr.bf16.mxu0 %v3612_v28  ;;  %v1456_v27 = vpop.permute.xlu0 %1455  ;;  %v1464_v18 = vpop.permute.xlu1 %1463 }
  0xeb   : > { %1512 = vmatprep.subr.bf16.mxu0 %v1481_v13  ;;  %v1480_v29 = vsel %vm1479_vm5, %v1456_v27, %v1458_v11  ;;  %v4165_v11 = vld [vmem:[%s4566_s0 + $0xb0] sm:$0xff]  }
  0xed   : > { %3200 = vmatpush3.bf16.msra.mxu1 %v3691_v16 }
  0xee   : > { %3201 = vmatprep.subr.bf16.mxu1 %v3703_v21  ;;  %v4048_v8 = vpop.permute.xlu0 %1465  ;;  %v1462_v23 = vpop.permute.xlu1 %1461 }
  0xef   : > { %v1483_v32 = vsel %vm1479_vm5, %v1464_v18, %v4048_v8  ;;  %v1482_v36 = vsel %vm1479_vm5, %v1462_v23, %v1464_v18  ;;  %v4188_v18 = vld [vmem:[%s4566_s0 + $0xb8] sm:$0xff]  }
  0xf0   : > { %2928 = vmatmul.mubr.msk.bf16.gmra.mrb[4].mxu1 %vm349_vm2, %v3563_v19  ;;  %2987 = vmatmul.mubr.msk.bf16.vlgmr.msra.gmra.mrb[0].mxu0 %vm349_vm2, %v4044_v22 }
  0xf1   : > { %3202 = vmatpush3.bf16.msra.mxu1 %v3703_v21  ;;  %596 = vmatprep.mubr.bf16.mxu1 %v3612_v28  ;;  %v4068_v21 = vld [vmem:[%s4566_s0 + $0x88] sm:$0xff]  }
  0xf2   : > { %3203 = vmatprep.subr.bf16.mxu1 %v3719_v26  ;;  %1306 = vmatprep.mubr.bf16.mxu0 %v3612_v28  ;;  %v1470_v16 = vpop.permute.xlu0 %1469  ;;  %v4060_v33 = vpop.permute.xlu1 %1471 }
  0xf3   : > { %1513 = vmatpush1.bf16.msra.mxu0 %v1480_v29  ;;  %v1485_v41 = vsel %vm1479_vm5, %v1470_v16, %v4060_v33 }
  0xf4   : > { %1514 = vmatprep.subr.bf16.mxu0 %v1483_v32 }
  0xf5   : > { %3204 = vmatpush3.bf16.msra.mxu1 %v3719_v26 }
  0xf6   : > { %3213 = vmatprep.subr.bf16.mxu1 %v3779_v31  ;;  %v1468_v38 = vpop.permute.xlu0 %1467  ;;  %v1476_v39 = vpop.permute.xlu1 %1475 }
  0xf7   : > { %1515 = vmatpush1.bf16.msra.mxu0 %v1482_v36  ;;  %v1484_v42 = vsel %vm1479_vm5, %v1468_v38, %v1470_v16 }
  0xf8   : > { %2929 = vmatmul.mubr.msk.bf16.gmra.mrb[8].mxu1 %vm349_vm2, %v3565_v34  ;;  %2988 = vmatmul.mubr.msk.bf16.gmra.mrb[4].mxu0 %vm349_vm2, %v4068_v21 }
  0xf9   : > { %606 = vmatprep.mubr.bf16.mxu1 %v3612_v28  ;;  %1316 = vmatprep.mubr.bf16.mxu0 %v3612_v28 }
  0xfa   : > { %1516 = vmatprep.subr.bf16.mxu0 %v1485_v41  ;;  %v4081_v26 = vpop.permute.xlu0 %1477  ;;  %v1474_v43 = vpop.permute.xlu1 %1473  ;;  %v2420_v41 = vld [vmem:[%s4567_s1 + $0x10] sm:$0xff] }
  0xfb   : > { %1517 = vmatpush1.bf16.msra.mxu0 %v1484_v42  ;;  %v1487_v46 = vsel %vm1479_vm5, %v1476_v39, %v4081_v26  ;;  %v1486_v48 = vsel %vm1479_vm5, %v1474_v43, %v1476_v39  ;;  %v2421_v42 = vld [vmem:[%s4567_s1 + $0x18] sm:$0xff] }
  0xfc   : > { %1518 = vmatprep.subr.bf16.mxu0 %v1487_v46 }
  0xfe   : > { %v1706_v51 = vpop.permute.xlu0 %1705 }
  0xff   : > { %1519 = vmatpush1.bf16.msra.mxu0 %v1486_v48  ;;  %v4094_v53 = vpop.permute.xlu1 %1707 }
 0x100   : > { %2930 = vmatmul.mubr.msk.bf16.gmra.mrb[12].mxu1 %vm349_vm2, %v3567_v47  ;;  %2989 = vmatmul.mubr.msk.bf16.gmra.mrb[8].mxu0 %vm349_vm2, %v4091_v3  ;;  %v1729_v54 = vsel %vm1727_vm6, %v1706_v51, %v4094_v53 }
 0x101   : > { %3205 = vmatprep.mubr.msk.bf16.mxu1 %vm349_vm2, %v4016_v10  ;;  %1326 = vmatprep.mubr.bf16.mxu0 %v3612_v28 }
 0x102   : > { %v1704_v55 = vpop.permute.xlu0 %1703  ;;  %1760 = vmatprep.subr.bf16.mxu0 %v1729_v54  ;;  %v2424_v54 = vld [vmem:[%s4567_s1 + $0x30] sm:$0xff] }
 0x103   : > { %v1712_v57 = vpop.permute.xlu1 %1711 }
 0x106   : > { %v4109_v61 = vpop.permute.xlu0 %1713 }
 0x107   : > { %v1710_v62 = vpop.permute.xlu1 %1709 }
 0x108   : > { %3206 = vmatmul.mubr.msk.bf16.vlgmr.msra.gmra.mrb[16].mxu1 %vm349_vm2, %v3563_v19  ;;  %2990 = vmatmul.mubr.msk.bf16.gmra.mrb[12].mxu0 %vm349_vm2, %v4107_v60 }
 0x109   : > { %3214 = vmatpush3.bf16.msra.mxu1 %v3779_v31  ;;  %3209 = vmatprep.mubr.msk.bf16.mxu1 %vm349_vm2, %v3565_v34  ;;  %v1728_v31 = vsel %vm1727_vm6, %v1704_v55, %v1706_v51  ;;  %v4249_v34 = vld [vmem:[%s4566_s0 + $0xd0] sm:$0xff]   ;;  %v3578_v51 = vld [vmem:[%s4566_s0 + $0xe0] sm:$0xff]  }
 0x10a   : > { %3215 = vmatprep.subr.bf16.mxu1 %v3788_v35  ;;  %1544 = vmatprep.mubr.bf16.mxu0 %v3612_v28  ;;  %v1718_v63 = vpop.permute.xlu0 %1717 }
 0x10b   : > { %v4124_v4 = vpop.permute.xlu1 %1719 }
 0x10c   : > { %v1733_v10 = vsel %vm1727_vm6, %v1718_v63, %v4124_v4 }
 0x10d   : > { %3216 = vmatpush3.bf16.msra.mxu1 %v3788_v35  ;;  %v1731_v35 = vsel %vm1727_vm6, %v1712_v57, %v4109_v61 }
 0x10e   : > { %3217 = vmatprep.subr.bf16.mxu1 %v3797_v40  ;;  %v1716_v9 = vpop.permute.xlu0 %1715 }
 0x10f   : > { %v1724_v6 = vpop.permute.xlu1 %1723 }
 0x110   : > { %3210 = vmatmul.mubr.msk.bf16.gmra.mrb[20].mxu1 %vm349_vm2, %v3567_v47  ;;  %3007 = vmatmul.mubr.msk.bf16.vlgmr.msra.gmra.mrb[0].mxu0 %vm349_vm2, %v4121_v2  ;;  %v2422_v47 = vld [vmem:[%s4567_s1 + $0x20] sm:$0xff] }
 0x111   : > { %3218 = vmatpush3.bf16.msra.mxu1 %v3797_v40  ;;  %3221 = vmatprep.mubr.msk.bf16.mxu1 %vm349_vm2, %v3818_v49  ;;  %v1730_v40 = vsel %vm1727_vm6, %v1710_v62, %v1712_v57  ;;  %v3579_v62 = vld [vmem:[%s4566_s0 + $0xe8] sm:$0xff]  }
 0x112   : > { %3219 = vmatprep.subr.bf16.mxu1 %v3810_v45  ;;  %1554 = vmatprep.mubr.bf16.mxu0 %v3612_v28 }
 0x113   : > { %1761 = vmatpush1.bf16.msra.mxu0 %v1728_v31  ;;  %v4138_v20 = vpop.permute.xlu0 %1725 }
 0x114   : > { %1762 = vmatprep.subr.bf16.mxu0 %v1731_v35  ;;  %v1722_v25 = vpop.permute.xlu1 %1721 }
 0x115   : > { %3220 = vmatpush3.bf16.msra.mxu1 %v3810_v45  ;;  %v1732_v45 = vsel %vm1727_vm6, %v1716_v9, %v1718_v63  ;;  %v1734_v13 = vsel %vm1727_vm6, %v1722_v25, %v1724_v6  ;;  %v3585_v25 = vld [vmem:[%s4566_s0 + $0x118] sm:$0xff]  }
 0x116   : > { %3229 = vmatprep.subr.bf16.mxu1 %v3876_v14 }
 0x117   : > { %1763 = vmatpush1.bf16.msra.mxu0 %v1730_v40  ;;  %v1954_v49 = vpop.permute.xlu0 %1953  ;;  %v3581_v40 = vld [vmem:[%s4566_s0 + $0xf8] sm:$0xff]  }
 0x118   : > { %3222 = vmatmul.mubr.msk.bf16.vlgmr.msra.gmra.mrb[16].mxu1 %vm349_vm2, %v3836_v56  ;;  %3008 = vmatmul.mubr.msk.bf16.gmra.mrb[4].mxu0 %vm349_vm2, %v4143_v7  ;;  %v1735_v56 = vsel %vm1727_vm6, %v1724_v6, %v4138_v20  ;;  %v3580_v6 = vld [vmem:[%s4566_s0 + $0xf0] sm:$0xff]  }
 0x119   : > { %3230 = vmatpush3.bf16.msra.mxu1 %v3876_v14  ;;  %3225 = vmatprep.mubr.msk.bf16.mxu1 %vm349_vm2, %v3855_v0  ;;  %v4168_v0 = vpop.permute.xlu1 %1955 }
 0x11a   : > { %3231 = vmatprep.subr.bf16.mxu1 %v3905_v30  ;;  %1564 = vmatprep.mubr.bf16.mxu0 %v3612_v28 }
 0x11b   : > { %1764 = vmatprep.subr.bf16.mxu0 %v1733_v10  ;;  %v3583_v10 = vld [vmem:[%s4566_s0 + $0x108] sm:$0xff]  }
 0x11c   : > { %1765 = vmatpush1.bf16.msra.mxu0 %v1732_v45  ;;  %v1952_v14 = vpop.permute.xlu0 %1951  ;;  %v3584_v45 = vld [vmem:[%s4566_s0 + $0x110] sm:$0xff]  }
 0x11d   : > { %3232 = vmatpush3.bf16.msra.mxu1 %v3905_v30  ;;  %1766 = vmatprep.subr.bf16.mxu0 %v1735_v56  ;;  %v1977_v30 = vsel %vm1975_vm7, %v1954_v49, %v4168_v0  ;;  %v1960_v27 = vpop.permute.xlu1 %1959 }
 0x11e   : > { %3233 = vmatprep.subr.bf16.mxu1 %v3914_v37 }
 0x120   : > { %3226 = vmatmul.mubr.msk.bf16.gmra.mrb[20].mxu1 %vm349_vm2, %v3881_v15  ;;  %3009 = vmatmul.mubr.msk.bf16.gmra.mrb[8].mxu0 %vm349_vm2, %v4165_v11  ;;  %v4183_v15 = vpop.permute.xlu0 %1961 }
 0x121   : > { %3234 = vmatpush3.bf16.msra.mxu1 %v3914_v37  ;;  %3237 = vmatprep.mubr.msk.bf16.mxu1 %vm349_vm2, %v3949_v50  ;;  %v1958_v37 = vpop.permute.xlu1 %1957 }
 0x122   : > { %3235 = vmatprep.subr.bf16.mxu1 %v3934_v44  ;;  %1574 = vmatprep.mubr.bf16.mxu0 %v3612_v28  ;;  %v1978_v19 = vsel %vm1975_vm7, %v1958_v37, %v1960_v27 }
 0x123   : > { %1767 = vmatpush1.bf16.msra.mxu0 %v1734_v13 }
 0x124   : > { %2008 = vmatprep.subr.bf16.mxu0 %v1977_v30  ;;  %v1966_v50 = vpop.permute.xlu0 %1965 }
 0x125   : > { %3236 = vmatpush3.bf16.msra.mxu1 %v3934_v44  ;;  %v4204_v44 = vld [vmem:[%s4566_s0 + $0xc0] sm:$0xff]  }
 0x126   : > { %3245 = vmatprep.subr.bf16.mxu1 %v3951_v52 }
 0x128   : > { %3238 = vmatmul.mubr.msk.bf16.vlgmr.msra.gmra.mrb[16].mxu1 %vm349_vm2, %v3973_v58  ;;  %3010 = vmatmul.mubr.msk.bf16.gmra.mrb[12].mxu0 %vm349_vm2, %v4188_v18  ;;  %v4208_v58 = vpop.permute.xlu1 %1967 }
 0x129   : > { %3246 = vmatpush3.bf16.msra.mxu1 %v3951_v52  ;;  %3241 = vmatprep.mubr.msk.bf16.mxu1 %vm349_vm2, %v3997_v5  ;;  %v1964_v52 = vpop.permute.xlu0 %1963  ;;  %v1976_v5 = vsel %vm1975_vm7, %v1952_v14, %v1954_v49  ;;  %v1981_v23 = vsel %vm1975_vm7, %v1966_v50, %v4208_v58  ;;  %v3582_v49 = vld [vmem:[%s4566_s0 + $0x100] sm:$0xff]  }
 0x12a   : > { %3247 = vmatprep.subr.bf16.mxu1 %v3975_v59  ;;  %1792 = vmatprep.mubr.bf16.mxu0 %v3612_v28 }
 0x12d   : > { %3248 = vmatpush3.bf16.msra.mxu1 %v3975_v59  ;;  %v1979_v59 = vsel %vm1975_vm7, %v1960_v27, %v4183_v15 }
 0x12e   : > { %3249 = vmatprep.subr.bf16.mxu1 %v3990_v1 }
 0x130   : > { %3242 = vmatmul.mubr.msk.bf16.gmra.mrb[20].mxu1 %vm349_vm2, %v4021_v24  ;;  %3027 = vmatmul.mubr.msk.bf16.vlgmr.msra.gmra.mrb[0].mxu0 %vm349_vm2, %v4204_v44  ;;  %v4225_v24 = vld [vmem:[%s4566_s0 + $0xc8] sm:$0xff]  }
 0x131   : > { %3250 = vmatpush3.bf16.msra.mxu1 %v3990_v1  ;;  %3253 = vmatprep.mubr.msk.bf16.mxu1 %vm349_vm2, %v4044_v22  ;;  %v1972_v1 = vpop.permute.xlu1 %1971  ;;  %v4229_v22 = vpop.permute.xlu0 %1973 }
 0x132   : > { %3251 = vmatprep.subr.bf16.mxu1 %v4009_v17  ;;  %1802 = vmatprep.mubr.bf16.mxu0 %v3612_v28  ;;  %v1983_v32 = vsel %vm1975_vm7, %v1972_v1, %v4229_v22 }
 0x133   : > { %2009 = vmatpush1.bf16.msra.mxu0 %v1976_v5 }
 0x134   : > { %2010 = vmatprep.subr.bf16.mxu0 %v1979_v59  ;;  %v2516_v59 = vlaneseq }
 0x135   : > { %3252 = vmatpush3.bf16.msra.mxu1 %v4009_v17  ;;  %v1980_v17 = vsel %vm1975_vm7, %v1964_v52, %v1966_v50  ;;  %v2202_v29 = vpop.permute.xlu0 %2201  ;;  %v1970_v16 = vpop.permute.xlu1 %1969 }
 0x136   : > { %3261 = vmatprep.subr.bf16.mxu1 %v4026_v12  ;;  %v1982_v38 = vsel %vm1975_vm7, %v1970_v16, %v1972_v1 }
 0x137   : > { %2011 = vmatpush1.bf16.msra.mxu0 %v1978_v19 }
 0x138   : > { %3254 = vmatmul.mubr.msk.bf16.vlgmr.msra.gmra.mrb[16].mxu1 %vm349_vm2, %v4068_v21  ;;  %3028 = vmatmul.mubr.msk.bf16.gmra.mrb[4].mxu0 %vm349_vm2, %v4225_v24 }
 0x139   : > { %3262 = vmatpush3.bf16.msra.mxu1 %v4026_v12  ;;  %3257 = vmatprep.mubr.msk.bf16.mxu1 %vm349_vm2, %v4091_v3  ;;  %v2419_v12 = vld [vmem:[%s4567_s1 + $0x8] sm:$0xff]  ;;  %v4256_v21 = vpop.permute.xlu1 %2203  ;;  %v2200_v36 = vpop.permute.xlu0 %2199 }
 0x13a   : > { %3263 = vmatprep.subr.bf16.mxu1 %v4048_v8  ;;  %1812 = vmatprep.mubr.bf16.mxu0 %v3612_v28  ;;  %v2225_v39 = vsel %vm2223_vm8, %v2202_v29, %v4256_v21  ;;  %v2224_v55 = vsel %vm2223_vm8, %v2200_v36, %v2202_v29 }
 0x13b   : > { %2012 = vmatprep.subr.bf16.mxu0 %v1981_v23  ;;  %2433 = vperm.xlu1 %3537, %v2419_v12  }
 0x13c   : > { %2013 = vmatpush1.bf16.msra.mxu0 %v1980_v17 }
 0x13d   : > { %3264 = vmatpush3.bf16.msra.mxu1 %v4048_v8  ;;  %2014 = vmatprep.subr.bf16.mxu0 %v1983_v32  ;;  %v2418_v8 = vld [vmem:[%s4567_s1] sm:$0xff]  ;;  %v2208_v43 = vpop.permute.xlu1 %2207  ;;  %v4285_v46 = vpop.permute.xlu0 %2209 }
 0x13e   : > { %3265 = vmatprep.subr.bf16.mxu1 %v4060_v33  ;;  %2428 = vperm.xlu0 %3536, %v2418_v8   ;;  %v2227_v57 = vsel %vm2223_vm8, %v2208_v43, %v4285_v46 }
 0x13f   : > { %2438 = vperm.xlu1 %3537, %v2420_v41  }
 0x140   : > { %3258 = vmatmul.mubr.msk.bf16.gmra.mrb[20].mxu1 %vm349_vm2, %v4107_v60  ;;  %3029 = vmatmul.mubr.msk.bf16.gmra.mrb[8].mxu0 %vm349_vm2, %v4249_v34 }
 0x141   : > { %3266 = vmatpush3.bf16.msra.mxu1 %v4060_v33  ;;  %3269 = vmatprep.mubr.msk.bf16.mxu1 %vm349_vm2, %v4121_v2  ;;  %v4279_v33 = vld [vmem:[%s4566_s0 + $0xd8] sm:$0xff]   ;;  %v2206_v3 = vpop.permute.xlu1 %2205  ;;  %v2214_v48 = vpop.permute.xlu0 %2213 }
 0x142   : > { %3267 = vmatprep.subr.bf16.mxu1 %v4081_v26  ;;  %1822 = vmatprep.mubr.bf16.mxu0 %v3612_v28  ;;  %v2226_v63 = vsel %vm2223_vm8, %v2206_v3, %v2208_v43 }
 0x143   : > { %2015 = vmatpush1.bf16.msra.mxu0 %v1982_v38  ;;  %2443 = vperm.xlu0 %3536, %v2421_v42  }
 0x144   : > { %2256 = vmatprep.subr.bf16.mxu0 %v2225_v39  ;;  %2448 = vperm.xlu1 %3537, %v2422_v47  }
 0x145   : > { %3268 = vmatpush3.bf16.msra.mxu1 %v4081_v26  ;;  %v2423_v26 = vld [vmem:[%s4567_s1 + $0x28] sm:$0xff]  ;;  %v2216_v60 = vpop.permute.xlu1 %2215 }
 0x146   : > { %3277 = vmatprep.subr.bf16.mxu1 %v4094_v53  ;;  %v2229_v9 = vsel %vm2223_vm8, %v2214_v48, %v2216_v60 }
 0x147   : > { %2453 = vperm.xlu0 %3536, %v2423_v26  }
 0x148   : > { %3270 = vmatmul.mubr.msk.bf16.vlgmr.msra.gmra.mrb[16].mxu1 %vm349_vm2, %v4143_v7  ;;  %3030 = vmatmul.mubr.msk.bf16.gmra.mrb[12].mxu0 %vm349_vm2, %v4279_v33 }
 0x149   : > { %3278 = vmatpush3.bf16.msra.mxu1 %v4094_v53  ;;  %3273 = vmatprep.mubr.msk.bf16.mxu1 %vm349_vm2, %v4165_v11  ;;  %v2425_v53 = vld [vmem:[%s4567_s1 + $0x38] sm:$0xff]  ;;  %v2220_v2 = vpop.permute.xlu1 %2219 }
 0x14a   : > { %3279 = vmatprep.subr.bf16.mxu1 %v4109_v61  ;;  %2040 = vmatprep.mubr.bf16.mxu0 %v3612_v28 }
 0x14b   : > { %2458 = vperm.xlu1 %3537, %v2424_v54   ;;  %2463 = vperm.xlu0 %3536, %v2425_v53  }
 0x14d   : > { %3280 = vmatpush3.bf16.msra.mxu1 %v4109_v61  ;;  %v2212_v61 = vpop.permute.xlu0 %2211 }
 0x14e   : > { %3281 = vmatprep.subr.bf16.mxu1 %v4124_v4  ;;  %v2228_v31 = vsel %vm2223_vm8, %v2212_v61, %v2214_v48 }
 0x150   : > { %3274 = vmatmul.mubr.msk.bf16.gmra.mrb[20].mxu1 %vm349_vm2, %v4188_v18  ;;  %3047 = vmatmul.mubr.msk.bf16.vlgmr.msra.gmra.mrb[0].mxu0 %vm349_vm2, %v3578_v51 }
 0x151   : > { %3282 = vmatpush3.bf16.msra.mxu1 %v4124_v4  ;;  %3285 = vmatprep.mubr.msk.bf16.mxu1 %vm349_vm2, %v4204_v44  ;;  %v2222_v4 = vpop.permute.xlu0 %2221 }
 0x152   : > { %3283 = vmatprep.subr.bf16.mxu1 %v4138_v20  ;;  %2050 = vmatprep.mubr.bf16.mxu0 %v3612_v28  ;;  %v2231_v35 = vsel %vm2223_vm8, %v2220_v2, %v2222_v4 }
 0x153   : > { %2257 = vmatpush1.bf16.msra.mxu0 %v2224_v55 }
 0x154   : > { %2258 = vmatprep.subr.bf16.mxu0 %v2227_v57 }
 0x155   : > { %3284 = vmatpush3.bf16.msra.mxu1 %v4138_v20  ;;  %v2218_v20 = vpop.permute.xlu1 %2217 }
 0x156   : > { %3293 = vmatprep.subr.bf16.mxu1 %v4168_v0  ;;  %v2230_v7 = vsel %vm2223_vm8, %v2218_v20, %v2220_v2 }
 0x157   : > { %2259 = vmatpush1.bf16.msra.mxu0 %v2226_v63 }
 0x158   : > { %3286 = vmatmul.mubr.msk.bf16.vlgmr.msra.gmra.mrb[16].mxu1 %vm349_vm2, %v4225_v24  ;;  %3048 = vmatmul.mubr.msk.bf16.gmra.mrb[4].mxu0 %vm349_vm2, %v3579_v62  ;;  %v2517_v24 = vshrl.u32 %v2516_v59, 7 }
 0x159   : > { %3294 = vmatpush3.bf16.msra.mxu1 %v4168_v0  ;;  %3289 = vmatprep.mubr.msk.bf16.mxu1 %vm349_vm2, %v4249_v34 }
 0x15a   : > { %3295 = vmatprep.subr.bf16.mxu1 %v4183_v15  ;;  %2060 = vmatprep.mubr.bf16.mxu0 %v3612_v28  ;;  %v2518_v19 = vsub.s32 0, %v2517_v24  ;;  %v2522_v16 = vsub.s32 1, %v2517_v24  ;;  %v2526_v42 = vsub.s32 2, %v2517_v24 }
 0x15b   : > { %2260 = vmatprep.subr.bf16.mxu0 %v2229_v9 }
 0x15c   : > { %2261 = vmatpush1.bf16.msra.mxu0 %v2228_v31 }
 0x15d   : > { %3296 = vmatpush3.bf16.msra.mxu1 %v4183_v15  ;;  %2262 = vmatprep.subr.bf16.mxu0 %v2231_v35 }
 0x15e   : > { %3297 = vmatprep.subr.bf16.mxu1 %v4208_v58 }
 0x160   : > { %3290 = vmatmul.mubr.msk.bf16.gmra.mrb[20].mxu1 %vm349_vm2, %v4279_v33  ;;  %3049 = vmatmul.mubr.msk.bf16.gmra.mrb[8].mxu0 %vm349_vm2, %v3580_v6 }
 0x161   : > { %3298 = vmatpush3.bf16.msra.mxu1 %v4208_v58  ;;  %2070 = vmatprep.mubr.bf16.mxu0 %v3612_v28 }
 0x162   : > { %3299 = vmatprep.subr.bf16.mxu1 %v4229_v22  ;;  %3301 = vmatprep.mubr.msk.bf16.mxu1 %vm349_vm2, %v3578_v51 }
 0x163   : > { %2263 = vmatpush1.bf16.msra.mxu0 %v2230_v7 }
 0x165   : > { %3300 = vmatpush3.bf16.msra.mxu1 %v4229_v22  ;;  %v2514_v22 = vld [vmem:[%s4568_s2] sm:$0x7] }
 0x166   : > { %3309 = vmatprep.subr.bf16.mxu1 %v4256_v21  ;;  %v4414_v43 = vrot.slane %v2514_v22, %v2522_v16  ;;  %v4418_v55 = vrot.slane %v2514_v22, %v2526_v42 }
 0x168   : > { %3050 = vmatmul.mubr.msk.bf16.gmra.mrb[12].mxu0 %vm349_vm2, %v3581_v40  ;;  %3302 = vmatmul.mubr.msk.bf16.vlgmr.msra.gmra.mrb[16].mxu1 %vm349_vm2, %v3579_v62 }
 0x169   : > { %3310 = vmatpush3.bf16.msra.mxu1 %v4256_v21  ;;  %3305 = vmatprep.mubr.msk.bf16.mxu1 %vm349_vm2, %v3580_v6  ;;  %v4412_v21 = vrot.slane %v2514_v22, %v2518_v19 }
 0x16a   : > { %3311 = vmatprep.subr.bf16.mxu1 %v4285_v46  ;;  %2288 = vmatprep.mubr.bf16.mxu0 %v3612_v28 }
 0x16d   : > { %3312 = vmatpush3.bf16.msra.mxu1 %v4285_v46 }
 0x16e   : > { %3313 = vmatprep.subr.bf16.mxu1 %v2216_v60 }
 0x170   : > { %3306 = vmatmul.mubr.msk.bf16.gmra.mrb[20].mxu1 %vm349_vm2, %v3581_v40  ;;  %3067 = vmatmul.mubr.msk.bf16.vlgmr.msra.gmra.mrb[0].mxu0 %vm349_vm2, %v3582_v49 }
 0x171   : > { %3314 = vmatpush3.bf16.msra.mxu1 %v2216_v60  ;;  %2298 = vmatprep.mubr.bf16.mxu0 %v3612_v28 }
 0x172   : > { %3315 = vmatprep.subr.bf16.mxu1 %v2222_v4  ;;  %3317 = vmatprep.mubr.msk.bf16.mxu1 %vm349_vm2, %v3582_v49 }
 0x175   : > { %3316 = vmatpush3.bf16.msra.mxu1 %v2222_v4 }
 0x178   : > { %3068 = vmatmul.mubr.msk.bf16.gmra.mrb[4].mxu0 %vm349_vm2, %v3583_v10  ;;  %3318 = vmatmul.mubr.msk.bf16.vlgmr.msra.gmra.mrb[16].mxu1 %vm349_vm2, %v3583_v10 }
 0x179   : > { %2308 = vmatprep.mubr.bf16.mxu0 %v3612_v28  ;;  %3321 = vmatprep.mubr.msk.bf16.mxu1 %vm349_vm2, %v3584_v45 }
 0x180   : > { %3069 = vmatmul.mubr.msk.bf16.gmra.mrb[8].mxu0 %vm349_vm2, %v3584_v45  ;;  %3322 = vmatmul.mubr.msk.bf16.gmra.mrb[20].mxu1 %vm349_vm2, %v3585_v25 }
 0x181   : > { %2318 = vmatprep.mubr.bf16.mxu0 %v3612_v28 }
 0x188   : > { %3070 = vmatmul.mubr.msk.bf16.gmra.mrb[12].mxu0 %vm349_vm2, %v3585_v25 }
 0x1ba   : > { %v4410_v23 = vpop.permute.xlu1 %2433 }
 0x1bb   : > { %v578_v56 = vpop.f32.mrb[0].mxu1 }
 0x1bc   : > { %v580_v11 = vpop.f32.mrb[1].mxu1 }
 0x1bd   : > { %v582_v0 = vpop.f32.mrb[2].mxu1  ;;  %v2429_v34 = vpop.permute.xlu0 %2428 }
 0x1be   : > { %v584_v14 = vpop.f32.mrb[3].mxu1  ;;  %v2439_v26 = vpop.permute.xlu1 %2438 }
 0x1c2   : > { %v4424_v40 = vpop.permute.xlu0 %2443 }
 0x1c3   : > { %v588_v13 = vpop.f32.mrb[4].mxu1 }
 0x1c4   : > { %v590_v30 = vpop.f32.mrb[5].mxu1 }
 0x1c5   : > { %v592_v27 = vpop.f32.mrb[6].mxu1 }
 0x1c6   : > { %v594_v15 = vpop.f32.mrb[7].mxu1 }
 0x1cb   : > { %v4391_v18 = vpop.f32.mrb[8].mxu1 }
 0x1cc   : > { %v4393_v37 = vpop.f32.mrb[9].mxu1 }
 0x1cd   : > { %v4395_v50 = vpop.f32.mrb[10].mxu1 }
 0x1ce   : > { %v4397_v44 = vpop.f32.mrb[11].mxu1 }
 0x1d3   : > { %v4399_v58 = vpop.f32.mrb[12].mxu1 }
 0x1d4   : > { %v4401_v28 = vpop.f32.mrb[13].mxu1 }
 0x1d5   : > { %v4403_v52 = vpop.f32.mrb[14].mxu1 }
 0x1d6   : > { %v4405_v5 = vpop.f32.mrb[15].mxu1 }
 0x243   : > { %v2290_v1 = vpop.f32.mrb[0].mxu0 }
 0x244   : > { %v3325_v17 = vadd.f32 %v2290_v1, %v578_v56  ;;  %v2292_v29 = vpop.f32.mrb[1].mxu0 }
 0x245   : > { %v3326_v32 = vadd.f32 %v2292_v29, %v580_v11  ;;  %v2294_v12 = vpop.f32.mrb[2].mxu0  ;;  %v2449_v11 = vpop.permute.xlu1 %2448 }
 0x246   : > { %v2466_v36 = vadd.f32 %v3325_v17, %v2429_v34  ;;  %v3327_v38 = vadd.f32 %v2294_v12, %v582_v0  ;;  %v2296_v8 = vpop.f32.mrb[3].mxu0 }
 0x247   : > { %v2467_v39 = vadd.f32 %v3326_v32, %v2429_v34  ;;  %v3328_v41 = vadd.f32 %v2296_v8, %v584_v14 }
 0x248   : > { %v2490_v33 = vmax.f32 %v2466_v36, 0.0 }
 0x249   : > { %v2491_v46 = vmax.f32 %v2467_v39, 0.0  ;;  %v2470_v3 = vadd.f32 %v3328_v41, %v4410_v23  ;;  %v2469_v39 = vadd.f32 %v3327_v38, %v4410_v23  ;;  %v2454_v38 = vpop.permute.xlu0 %2453 }
 0x24a   : > { %v2531_v47 = vmul.f32 %v4412_v21, %v2490_v33 }
 0x24b   : > { %v2300_v48 = vpop.f32.mrb[4].mxu0  ;;  %v3319_v51 = vpop.f32.mrb[16].mxu1  ;;  %v2532_v61 = vmul.f32 %v4414_v43, %v2491_v46  ;;  %v2494_v9 = vmax.f32 %v2470_v3, 0.0 }
 0x24c   : > { %v3329_v54 = vadd.f32 %v2300_v48, %v588_v13  ;;  %v2474_v53 = vadd.f32 %v3319_v51, %v2439_v26  ;;  %v2363_v57 = vpop.f32.mrb[17].mxu1  ;;  %2579 = vrot.lane.b32.xlu1 %v2531_v47, %s3619_s5  ;;  %v2302_v60 = vpop.f32.mrb[5].mxu0 }
 0x24d   : > { %v2468_v62 = vadd.f32 %v2429_v34, %v2363_v57  ;;  %v3330_v63 = vadd.f32 %v2302_v60, %v590_v30  ;;  %v2304_v2 = vpop.f32.mrb[6].mxu0  ;;  %v3320_v4 = vpop.f32.mrb[18].mxu1  ;;  %v2535_v56 = vmul.f32 %v4414_v43, %v2494_v9 }
 0x24e   : > { %v2472_v31 = vadd.f32 %v3329_v54, %v2439_v26  ;;  %v2498_v35 = vmax.f32 %v2474_v53, 0.0  ;;  %v4422_v6 = vadd.f32 %v2304_v2, %v592_v27  ;;  %v2306_v20 = vpop.f32.mrb[7].mxu0  ;;  %v2366_v7 = vpop.f32.mrb[19].mxu1  ;;  %v2477_v25 = vadd.f32 %v3320_v4, %v4424_v40 }
 0x24f   : > { %v3332_v49 = vadd.f32 %v2306_v20, %v594_v15  ;;  %v2492_v45 = vmax.f32 %v2468_v62, 0.0  ;;  %v2473_v14 = vadd.f32 %v3330_v63, %v2439_v26  ;;  %v2471_v15 = vadd.f32 %v4410_v23, %v2366_v7 }
 0x250   : > { %v2539_v10 = vmul.f32 %v4418_v55, %v2498_v35  ;;  %2581 = vrot.lane.b32.xlu1 %v2532_v61, %s3619_s5  ;;  %v2496_v0 = vmax.f32 %v2472_v31, 0.0  ;;  %v2501_v59 = vmax.f32 %v2477_v25, 0.0  ;;  %v2493_v26 = vmax.f32 %v2469_v39, 0.0  ;;  %v2464_v35 = vpop.permute.xlu0 %2463 }
 0x251   : > { %v2533_v27 = vmul.f32 %v4418_v55, %v2492_v45  ;;  %v2497_v16 = vmax.f32 %v2473_v14, 0.0  ;;  %v2476_v34 = vadd.f32 %v3332_v49, %v4424_v40  ;;  %v2495_v41 = vmax.f32 %v2471_v15, 0.0 }
 0x252   : > { %2595 = vrot.lane.b32.xlu0 %v2539_v10, %s3619_s5  ;;  %v2537_v32 = vmul.f32 %v4412_v21, %v2496_v0 }
 0x253   : > { %v2310_v13 = vpop.f32.mrb[8].mxu0  ;;  %v3323_v30 = vpop.f32.mrb[20].mxu1  ;;  %v2538_v33 = vmul.f32 %v4414_v43, %v2497_v16  ;;  %v2500_v42 = vmax.f32 %v2476_v34, 0.0  ;;  %v2536_v3 = vmul.f32 %v4418_v55, %v2495_v41 }
 0x254   : > { %v3333_v24 = vadd.f32 %v2310_v13, %v4391_v18  ;;  %v2312_v19 = vpop.f32.mrb[9].mxu0  ;;  %v2379_v1 = vpop.f32.mrb[21].mxu1  ;;  %2587 = vrot.lane.b32.xlu1 %v2535_v56, %s3619_s5  ;;  %v2475_v13 = vadd.f32 %v4422_v6, %v4424_v40 }
 0x255   : > { %v3334_v22 = vadd.f32 %v2312_v19, %v4393_v37  ;;  %v2314_v17 = vpop.f32.mrb[10].mxu0  ;;  %v3324_v29 = vpop.f32.mrb[22].mxu1  ;;  %v2542_v37 = vmul.f32 %v4418_v55, %v2501_v59  ;;  %v2541_v53 = vmul.f32 %v4414_v43, %v2500_v42  ;;  %v2480_v4 = vadd.f32 %v2449_v11, %v2379_v1 }
 0x256   : > { %v4439_v12 = vadd.f32 %v2314_v17, %v4395_v50  ;;  %v2316_v36 = vpop.f32.mrb[11].mxu0  ;;  %v2382_v8 = vpop.f32.mrb[23].mxu1  ;;  %2583 = vrot.lane.b32.xlu0 %v2533_v27, %s3619_s5  ;;  %v2478_v46 = vadd.f32 %v3333_v24, %v2449_v11  ;;  %v2489_v7 = vadd.f32 %v3324_v29, %v2464_v35  ;;  %v2499_v19 = vmax.f32 %v2475_v13, 0.0 }
 0x257   : > { %v3336_v18 = vadd.f32 %v2316_v36, %v4397_v44  ;;  %v2459_v50 = vpop.permute.xlu1 %2458  ;;  %v2479_v60 = vadd.f32 %v3334_v22, %v2449_v11  ;;  %v2504_v20 = vmax.f32 %v2480_v4, 0.0  ;;  %v2483_v56 = vadd.f32 %v2454_v38, %v2382_v8  ;;  %v3586_v36 = vld [vmem:[%s3661_s20] sm:$0xff] }
 0x258   : > { %2591 = vrot.lane.b32.xlu1 %v2537_v32, %s3619_s5  ;;  %v2486_v48 = vadd.f32 %v3323_v30, %v2459_v50  ;;  %v2502_v57 = vmax.f32 %v2478_v46, 0.0  ;;  %v2513_v25 = vmax.f32 %v2489_v7, 0.0  ;;  %v2481_v1 = vadd.f32 %v4439_v12, %v2454_v38 }
 0x259   : > { %v2503_v9 = vmax.f32 %v2479_v60, 0.0  ;;  %v2482_v31 = vadd.f32 %v3336_v18, %v2454_v38  ;;  %v2545_v45 = vmul.f32 %v4418_v55, %v2504_v20  ;;  %v2507_v27 = vmax.f32 %v2483_v56, 0.0 }
 0x25a   : > { %2601 = vrot.lane.b32.xlu0 %v2542_v37, %s3619_s5  ;;  %v2510_v2 = vmax.f32 %v2486_v48, 0.0  ;;  %v2554_v30 = vmul.f32 %v4418_v55, %v2513_v25  ;;  %v2540_v40 = vmul.f32 %v4412_v21, %v2499_v19  ;;  %v2505_v29 = vmax.f32 %v2481_v1, 0.0 }
 0x25b   : > { %v2320_v47 = vpop.f32.mrb[12].mxu0  ;;  %v2506_v49 = vmax.f32 %v2482_v31, 0.0  ;;  %v2548_v22 = vmul.f32 %v4418_v55, %v2507_v27  ;;  %v2685_v8 = vunpack.c.l.bf16 %v3586_v36  ;;  %v2686_v18 = vunpack.c.h.bf16 %v3586_v36 }
 0x25c   : > { %v3337_v44 = vadd.f32 %v2320_v47, %v4399_v58  ;;  %v2322_v23 = vpop.f32.mrb[13].mxu0  ;;  %2593 = vrot.lane.b32.xlu1 %v2538_v33, %s3619_s5  ;;  %v2534_v58 = vmul.f32 %v4412_v21, %v2493_v26  ;;  %v3587_v47 = vld [vmem:[%s3661_s20 + $0x8] sm:$0xf] }
 0x25d   : > { %v3338_v51 = vadd.f32 %v2322_v23, %v4401_v28  ;;  %v2324_v54 = vpop.f32.mrb[14].mxu0  ;;  %v2543_v28 = vmul.f32 %v4412_v21, %v2502_v57  ;;  %v2547_v11 = vmul.f32 %v4414_v43, %v2506_v49  ;;  %v2687_v26 = vunpack.c.l.bf16 %v3587_v47  ;;  %v3591_v49 = vld [vmem:[%s3661_s20 + $0x2c] sm:$0xf] }
 0x25e   : > { %v3339_v61 = vadd.f32 %v2324_v54, %v4403_v52  ;;  %v2326_v62 = vpop.f32.mrb[15].mxu0  ;;  %2589 = vrot.lane.b32.xlu0 %v2536_v3, %s3619_s5  ;;  %v2551_v52 = vmul.f32 %v4418_v55, %v2510_v2  ;;  %v2484_v59 = vadd.f32 %v3337_v44, %v2459_v50  ;;  %v2546_v55 = vmul.f32 %v4412_v21, %v2505_v29 }
 0x25f   : > { %v3340_v63 = vadd.f32 %v2326_v62, %v4405_v5  ;;  %v2544_v5 = vmul.f32 %v4414_v43, %v2503_v9  ;;  %v2485_v10 = vadd.f32 %v3338_v51, %v2459_v50  ;;  %v3588_v51 = vld [vmem:[%s3661_s20 + $0x18] sm:$0xff]  ;;  %v3589_v62 = vld [vmem:[%s3661_s20 + $0x20] sm:$0xf] }
 0x260   : > { %2599 = vrot.lane.b32.xlu1 %v2541_v53, %s3619_s5  ;;  %v2508_v17 = vmax.f32 %v2484_v59, 0.0  ;;  %v2487_v32 = vadd.f32 %v3339_v61, %v2464_v35  ;;  %v2691_v54 = vunpack.c.l.bf16 %v3588_v51  ;;  %v2692_v57 = vunpack.c.h.bf16 %v3588_v51  ;;  %v3596_v51 = vld [vmem:[%s3661_s20 + $0x44] sm:$0xf] }
 0x261   : > { %v2509_v0 = vmax.f32 %v2485_v10, 0.0  ;;  %v2488_v14 = vadd.f32 %v3340_v63, %v2464_v35  ;;  %v2693_v63 = vunpack.c.l.bf16 %v3589_v62  ;;  %v2696_v10 = vunpack.c.l.bf16 %v3591_v49  ;;  %v3597_v62 = vld [vmem:[%s3661_s20 + $0x5c] sm:$0xf] }
 0x262   : > { %2585 = vrot.lane.b32.xlu0 %v2534_v58, %s3619_s5  ;;  %v2549_v16 = vmul.f32 %v4412_v21, %v2508_v17  ;;  %v2511_v34 = vmax.f32 %v2487_v32, 0.0 }
 0x263   : > { %v2550_v15 = vmul.f32 %v4414_v43, %v2509_v0  ;;  %v2512_v24 = vmax.f32 %v2488_v14, 0.0 }
 0x264   : > { %2603 = vrot.lane.b32.xlu1 %v2543_v28, %s3619_s5  ;;  %v3590_v28 = vld [vmem:[%s3661_s20 + $0x14] sm:$0xf] }
 0x265   : > { %v2553_v6 = vmul.f32 %v4414_v43, %v2512_v24  ;;  %v2552_v43 = vmul.f32 %v4412_v21, %v2511_v34  ;;  %v2690_v9 = vunpack.c.l.bf16 %v3590_v28 }
 0x266   : > { %2619 = vrot.lane.b32.xlu0 %v2551_v52, %s3619_s5 }
 0x268   : > { %2605 = vrot.lane.b32.xlu1 %v2544_v5, %s3619_s5 }
 0x26a   : > { %2607 = vrot.lane.b32.xlu0 %v2545_v45, %s3619_s5 }
 0x26c   : > { %2611 = vrot.lane.b32.xlu1 %v2547_v11, %s3619_s5  ;;  %v3592_v11 = vld [vmem:[%s3661_s20 + $0xc] sm:$0xff] }
 0x26d   : > { %v2688_v0 = vunpack.c.l.bf16 %v3592_v11  ;;  %v2689_v14 = vunpack.c.h.bf16 %v3592_v11 }
 0x26e   : > { %2625 = vrot.lane.b32.xlu0 %v2554_v30, %s3619_s5 }
 0x270   : > { %2617 = vrot.lane.b32.xlu1 %v2550_v15, %s3619_s5 }
 0x272   : > { %2613 = vrot.lane.b32.xlu0 %v2548_v22, %s3619_s5 }
 0x274   : > { %2623 = vrot.lane.b32.xlu1 %v2553_v6, %s3619_s5 }
 0x276   : > { %2597 = vrot.lane.b32.xlu0 %v2540_v40, %s3619_s5 }
 0x278   : > { %2615 = vrot.lane.b32.xlu1 %v2549_v16, %s3619_s5  ;;  %v3593_v16 = vld [vmem:[%s3661_s20 + $0x30] sm:$0xff] }
 0x27a   : > { %2609 = vrot.lane.b32.xlu0 %v2546_v55, %s3619_s5  ;;  %v2697_v55 = vunpack.c.l.bf16 %v3593_v16 }
 0x27e   : > { %2621 = vrot.lane.b32.xlu0 %v2552_v43, %s3619_s5  ;;  %v2698_v43 = vunpack.c.h.bf16 %v3593_v16 }
 0x2be   : > { %v2580_v12 = vpop.permute.xlu1 %2579 }
 0x2bf   : > { %v2668_v39 = vsel %vm2627_vm9, 0.0, %v2580_v12 }
 0x2c0   : > { %v2709_v33 = vadd.f32 %v2685_v8, %v2668_v39 }
 0x2c2   : > { %v2582_v37 = vpop.permute.xlu1 %2581 }
 0x2c3   : > { %v2628_v41 = vsel %vm2627_vm9, %v2580_v12, %v2582_v37 }
 0x2c4   : > { %v2710_v42 = vadd.f32 %v2686_v18, %v2628_v41  ;;  %v2596_v46 = vpop.permute.xlu0 %2595  ;;  %v3594_v18 = vld [vmem:[%s3661_s20 + $0x38] sm:$0xf] }
 0x2c5   : > { %v2699_v39 = vunpack.c.l.bf16 %v3594_v18 }
 0x2c6   : > { %v3093_v21 = vpack.c.bf16 %v2710_v42, %v2709_v33  ;;  %v2588_v50 = vpop.permute.xlu1 %2587 }
 0x2c8   : > { %2813 = vst [vmem:[%s4496_s8] sm:$0xff] %v3093_v21  ;;  %v2584_v3 = vpop.permute.xlu0 %2583 }
 0x2c9   : > { %v2629_v48 = vsel %vm2627_vm9, %v2582_v37, %v2584_v3 }
 0x2ca   : > { %v2677_v44 = vsel %vm2676_vm10, %v2629_v48, 0.0  ;;  %v2592_v23 = vpop.permute.xlu1 %2591  ;;  %v3595_v48 = vld [vmem:[%s3661_s20 + $0x50] sm:$0xf] }
 0x2cb   : > { %v2711_v38 = vadd.f32 %v2687_v26, %v2677_v44  ;;  %v2670_v61 = vsel %vm2627_vm9, 0.0, %v2592_v23  ;;  %v2705_v44 = vunpack.c.l.bf16 %v3595_v48 }
 0x2cc   : > { %v2602_v53 = vpop.permute.xlu0 %2601  ;;  %v2715_v31 = vadd.f32 %v2691_v54, %v2670_v61  ;;  %v2702_v54 = vunpack.c.l.bf16 %v3596_v51 }
 0x2cd   : > { %v3094_v60 = vpack.c.bf16 %v2711_v38, %v2711_v38 }
 0x2ce   : > { %v2594_v58 = vpop.permute.xlu1 %2593 }
 0x2cf   : > { %2814 = vst [vmem:[%s4496_s8 + $0x8] sm:$0xf] %v3094_v60  ;;  %v2632_v2 = vsel %vm2627_vm9, %v2592_v23, %v2594_v58  ;;  %v2633_v4 = vsel %vm2627_vm9, %v2594_v58, %v2596_v46 }
 0x2d0   : > { %v2679_v35 = vsel %vm2676_vm10, %v2633_v4, 0.0  ;;  %v2716_v52 = vadd.f32 %v2692_v57, %v2632_v2  ;;  %v2590_v20 = vpop.permute.xlu0 %2589  ;;  %v3598_v4 = vld [vmem:[%s3661_s20 + $0x24] sm:$0xff] }
 0x2d1   : > { %v2717_v7 = vadd.f32 %v2693_v63, %v2679_v35  ;;  %v2631_v5 = vsel %vm2627_vm9, %v2588_v50, %v2590_v20  ;;  %v2708_v63 = vunpack.c.l.bf16 %v3597_v62  ;;  %v2694_v28 = vunpack.c.l.bf16 %v3598_v4 }
 0x2d2   : > { %v3097_v45 = vpack.c.bf16 %v2716_v52, %v2715_v31  ;;  %v2678_v25 = vsel %vm2676_vm10, %v2631_v5, 0.0  ;;  %v4513_v56 = vpop.permute.xlu1 %2599  ;;  %v3599_v5 = vld [vmem:[%s3661_s20 + $0x48] sm:$0xff] }
 0x2d3   : > { %v3098_v13 = vpack.c.bf16 %v2717_v7, %v2717_v7  ;;  %v2714_v30 = vadd.f32 %v2690_v9, %v2678_v25  ;;  %v2635_v27 = vsel %vm2627_vm9, %v4513_v56, %v2602_v53  ;;  %v2695_v9 = vunpack.c.h.bf16 %v3598_v4 }
 0x2d4   : > { %2817 = vst [vmem:[%s4496_s8 + $0x18] sm:$0xff] %v3097_v45  ;;  %v2680_v59 = vsel %vm2676_vm10, %v2635_v27, 0.0  ;;  %v2586_v15 = vpop.permute.xlu0 %2585  ;;  %v2703_v49 = vunpack.c.l.bf16 %v3599_v5  ;;  %v3600_v27 = vld [vmem:[%s3661_s20 + $0x3c] sm:$0xff] }
 0x2d5   : > { %2818 = vst [vmem:[%s4496_s8 + $0x20] sm:$0xf] %v3098_v13  ;;  %v3096_v24 = vpack.c.bf16 %v2714_v30, %v2714_v30  ;;  %v2720_v19 = vadd.f32 %v2696_v10, %v2680_v59  ;;  %v2630_v1 = vsel %vm2627_vm9, %v2586_v15, %v2588_v50  ;;  %v2669_v22 = vsel %vm2627_vm9, 0.0, %v2586_v15 }
 0x2d6   : > { %v2712_v17 = vadd.f32 %v2688_v0, %v2669_v22  ;;  %v2713_v6 = vadd.f32 %v2689_v14, %v2630_v1  ;;  %v2604_v40 = vpop.permute.xlu1 %2603  ;;  %v2704_v10 = vunpack.c.h.bf16 %v3599_v5  ;;  %v2700_v59 = vunpack.c.l.bf16 %v3600_v27 }
 0x2d7   : > { %2816 = vst [vmem:[%s4496_s8 + $0x14] sm:$0xf] %v3096_v24  ;;  %v3100_v29 = vpack.c.bf16 %v2720_v19, %v2720_v19  ;;  %v2672_v12 = vsel %vm2627_vm9, 0.0, %v2604_v40  ;;  %v2701_v15 = vunpack.c.h.bf16 %v3600_v27 }
 0x2d8   : > { %v3095_v32 = vpack.c.bf16 %v2713_v6, %v2712_v17  ;;  %v2620_v34 = vpop.permute.xlu0 %2619  ;;  %v2721_v37 = vadd.f32 %v2697_v55, %v2672_v12 }
 0x2d9   : > { %2820 = vst [vmem:[%s4496_s8 + $0x2c] sm:$0xf] %v3100_v29 }
 0x2da   : > { %2815 = vst [vmem:[%s4496_s8 + $0xc] sm:$0xff] %v3095_v32  ;;  %v2606_v36 = vpop.permute.xlu1 %2605  ;;  %v3601_v32 = vld [vmem:[%s3661_s20 + $0x54] sm:$0xff] }
 0x2db   : > { %v2636_v8 = vsel %vm2627_vm9, %v2604_v40, %v2606_v36  ;;  %v2706_v16 = vunpack.c.l.bf16 %v3601_v32  ;;  %v2707_v12 = vunpack.c.h.bf16 %v3601_v32 }
 0x2dc   : > { %v2722_v41 = vadd.f32 %v2698_v43, %v2636_v8  ;;  %v2608_v33 = vpop.permute.xlu0 %2607 }
 0x2dd   : > { %v2637_v42 = vsel %vm2627_vm9, %v2606_v36, %v2608_v33 }
 0x2de   : > { %v3101_v46 = vpack.c.bf16 %v2722_v41, %v2721_v37  ;;  %v2681_v21 = vsel %vm2676_vm10, %v2637_v42, 0.0  ;;  %v2612_v50 = vpop.permute.xlu1 %2611 }
 0x2df   : > { %v2723_v47 = vadd.f32 %v2699_v39, %v2681_v21 }
 0x2e0   : > { %2821 = vst [vmem:[%s4496_s8 + $0x30] sm:$0xff] %v3101_v46  ;;  %v2626_v26 = vpop.permute.xlu0 %2625 }
 0x2e1   : > { %v3102_v3 = vpack.c.bf16 %v2723_v47, %v2723_v47 }
 0x2e2   : > { %v2618_v23 = vpop.permute.xlu1 %2617 }
 0x2e3   : > { %2822 = vst [vmem:[%s4496_s8 + $0x38] sm:$0xf] %v3102_v3  ;;  %v2641_v38 = vsel %vm2627_vm9, %v2618_v23, %v2620_v34 }
 0x2e4   : > { %v2683_v53 = vsel %vm2676_vm10, %v2641_v38, 0.0  ;;  %v2614_v57 = vpop.permute.xlu0 %2613 }
 0x2e5   : > { %v2729_v60 = vadd.f32 %v2705_v44, %v2683_v53  ;;  %v2639_v61 = vsel %vm2627_vm9, %v2612_v50, %v2614_v57 }
 0x2e6   : > { %v2682_v58 = vsel %vm2676_vm10, %v2639_v61, 0.0  ;;  %v2624_v2 = vpop.permute.xlu1 %2623 }
 0x2e7   : > { %v3106_v31 = vpack.c.bf16 %v2729_v60, %v2729_v60  ;;  %v2726_v35 = vadd.f32 %v2702_v54, %v2682_v58  ;;  %v2643_v52 = vsel %vm2627_vm9, %v2624_v2, %v2626_v26 }
 0x2e8   : > { %v2684_v20 = vsel %vm2676_vm10, %v2643_v52, 0.0  ;;  %v2598_v7 = vpop.permute.xlu0 %2597 }
 0x2e9   : > { %2826 = vst [vmem:[%s4496_s8 + $0x50] sm:$0xf] %v3106_v31  ;;  %v3104_v45 = vpack.c.bf16 %v2726_v35, %v2726_v35  ;;  %v2732_v25 = vadd.f32 %v2708_v63, %v2684_v20  ;;  %v2634_v11 = vsel %vm2627_vm9, %v2598_v7, %v4513_v56  ;;  %v2671_v0 = vsel %vm2627_vm9, 0.0, %v2598_v7 }
 0x2ea   : > { %v2718_v14 = vadd.f32 %v2694_v28, %v2671_v0  ;;  %v2719_v13 = vadd.f32 %v2695_v9, %v2634_v11  ;;  %v2616_v30 = vpop.permute.xlu1 %2615 }
 0x2eb   : > { %2824 = vst [vmem:[%s4496_s8 + $0x44] sm:$0xf] %v3104_v45  ;;  %v3108_v24 = vpack.c.bf16 %v2732_v25, %v2732_v25  ;;  %v2640_v19 = vsel %vm2627_vm9, %v2616_v30, %v2618_v23  ;;  %v2674_v1 = vsel %vm2627_vm9, 0.0, %v2616_v30 }
 0x2ec   : > { %v3099_v22 = vpack.c.bf16 %v2719_v13, %v2718_v14  ;;  %v2727_v56 = vadd.f32 %v2703_v49, %v2674_v1  ;;  %v2728_v17 = vadd.f32 %v2704_v10, %v2640_v19  ;;  %v2610_v6 = vpop.permute.xlu0 %2609 }
 0x2ed   : > { %2828 = vst [vmem:[%s4496_s8 + $0x5c] sm:$0xf] %v3108_v24  ;;  %v2638_v40 = vsel %vm2627_vm9, %v2610_v6, %v2612_v50  ;;  %v2673_v29 = vsel %vm2627_vm9, 0.0, %v2610_v6 }
 0x2ee   : > { %2819 = vst [vmem:[%s4496_s8 + $0x24] sm:$0xff] %v3099_v22  ;;  %v3105_v55 = vpack.c.bf16 %v2728_v17, %v2727_v56  ;;  %v2724_v34 = vadd.f32 %v2700_v59, %v2673_v29  ;;  %v2725_v43 = vadd.f32 %v2701_v15, %v2638_v40 }
 0x2f0   : > { %2825 = vst [vmem:[%s4496_s8 + $0x48] sm:$0xff] %v3105_v55  ;;  %v3103_v36 = vpack.c.bf16 %v2725_v43, %v2724_v34  ;;  %v2622_v8 = vpop.permute.xlu0 %2621 }
 0x2f1   : > { %v2642_v18 = vsel %vm2627_vm9, %v2622_v8, %v2624_v2  ;;  %v2675_v39 = vsel %vm2627_vm9, 0.0, %v2622_v8 }
 0x2f2   : > { %2823 = vst [vmem:[%s4496_s8 + $0x3c] sm:$0xff] %v3103_v36  ;;  %v2730_v37 = vadd.f32 %v2706_v16, %v2675_v39  ;;  %v2731_v41 = vadd.f32 %v2707_v12, %v2642_v18 }
 0x2f4   : > { %v3107_v33 = vpack.c.bf16 %v2731_v41, %v2730_v37 }
 0x2f6   : > { %2827 = vst [vmem:[%s4496_s8 + $0x54] sm:$0xff] %v3107_v33 }
 0x2f7 PF: > { %s14_s15 = sadd.s32 1, %s3608_s15  }
 0x2f8   : > { %p11_p4 = scmp.ge.s32.totalorder %s14_s15, 4  }
 0x2fa   :  { %13 = sbr.rel (!%p11_p4) target bundleno = 1 (0x1), region = 74 }

</bundles_post_ra>
